<compile_context>
chip_gen: v6e
topology: v6e:2x2x1
jax: 0.10.0
libtpu: 0.0.40
codegen_flags: <defaults>
</compile_context>

<pallas_src>
import math

import jax
import jax.numpy as jnp
from jax.experimental import pallas as pl
from jax.experimental.pallas import tpu as pltpu

D_MODEL = 128
NUM_HEADS = 4
FF_RATIO = 4
HEAD_DIM = D_MODEL // NUM_HEADS
FF_HIDDEN = FF_RATIO * D_MODEL
LN_EPS = 1e-5

# MXU operand dtype (v5e/v6e/v7x all run bf16 at full MXU rate); accumulation,
# softmax and LayerNorm stay in f32.
MM_DTYPE = jnp.bfloat16


def _layernorm(x, gamma, beta):
    mu = jnp.mean(x, axis=-1, keepdims=True)
    var = jnp.mean((x - mu) * (x - mu), axis=-1, keepdims=True)  # biased, like torch
    return (x - mu) * jax.lax.rsqrt(var + LN_EPS) * gamma + beta


def em_interactor_kernel(
    q_ref, k_ref, v_ref,
    wq_ref, wk_ref, wv_ref, bq_ref, bk_ref, bv_ref,
    wo_ref, bo_ref,
    g1_ref, be1_ref,
    w1_ref, b1_ref, w2_ref, b2_ref,
    g2_ref, be2_ref,
    *out_refs,
):
    out_ref = out_refs[0]
    attnw_ref = out_refs[1] if len(out_refs) > 1 else None

    Bt, Lq, D = q_ref.shape
    Lk = k_ref.shape[1]
    M = Bt * Lq

    # Flatten folded-batch blocks so every projection / FFN matmul sees M=Bt*L
    # rows (Lq, Lk multiples of 8 -> these reshapes are layout no-ops).
    q2 = q_ref[...].reshape(M, D)
    k2 = k_ref[...].reshape(Bt * Lk, D)
    v2 = v_ref[...].reshape(Bt * Lk, D)

    # bf16 MXU operands, f32 accumulation.  The 1/sqrt(head_dim) scale is
    # pre-folded into wq/bq by the wrapper.
    Q = jnp.dot(q2.astype(MM_DTYPE), wq_ref[...].astype(MM_DTYPE),
                preferred_element_type=jnp.float32) + bq_ref[...]
    K = jnp.dot(k2.astype(MM_DTYPE), wk_ref[...].astype(MM_DTYPE),
                preferred_element_type=jnp.float32) + bk_ref[...]
    V = jnp.dot(v2.astype(MM_DTYPE), wv_ref[...].astype(MM_DTYPE),
                preferred_element_type=jnp.float32) + bv_ref[...]

    attn_sum = None
    head_outs = []
    for h in range(NUM_HEADS):  # static unroll, H = 4
        lo = h * HEAD_DIM
        Qh = Q[:, lo:lo + HEAD_DIM].reshape(Bt, Lq, HEAD_DIM)
        Kh = K[:, lo:lo + HEAD_DIM].reshape(Bt, Lk, HEAD_DIM)
        Vh = V[:, lo:lo + HEAD_DIM].reshape(Bt, Lk, HEAD_DIM)

        # K-transpose absorbed into the contraction; batched over Bt.
        s = jnp.einsum("bqd,bkd->bqk", Qh, Kh, preferred_element_type=jnp.float32)
        m = jnp.max(s, axis=-1, keepdims=True)
        e = jnp.exp(s - m)
        inv = pl.reciprocal(jnp.sum(e, axis=-1, keepdims=True), approx=True)  # EUP
        p = e * inv

        if attnw_ref is not None:
            attn_sum = p if attn_sum is None else attn_sum + p

        head_outs.append(
            jnp.einsum("bqk,bkd->bqd", p, Vh, preferred_element_type=jnp.float32))

    if attnw_ref is not None:
        # average_attn_weights=True (torch default): mean over heads.
        # Stored as a 2-D (M, Lk) slab; reshaped to (B, Lq, Lk) by the wrapper.
        attnw_ref[...] = (attn_sum * (1.0 / NUM_HEADS)).reshape(M, Lk)

    # Lane-pack the heads and run ONE full-depth K=128 output projection
    # instead of 4 K=32 partial matmuls + accumulator adds.
    oh = jnp.concatenate(head_outs, axis=-1).reshape(M, D)
    attn_out = jnp.dot(oh.astype(MM_DTYPE), wo_ref[...].astype(MM_DTYPE),
                       preferred_element_type=jnp.float32) + bo_ref[...]

    # residual + LayerNorm (dropout = identity in eval)
    x = _layernorm(q2 + attn_out, g1_ref[...], be1_ref[...])

    # feed-forward (bf16 matmul operands, f32 accumulation + activation math)
    h1 = jnp.maximum(
        jnp.dot(x.astype(MM_DTYPE), w1_ref[...].astype(MM_DTYPE),
                preferred_element_type=jnp.float32) + b1_ref[...], 0.0)
    ff = jnp.dot(h1.astype(MM_DTYPE), w2_ref[...].astype(MM_DTYPE),
                 preferred_element_type=jnp.float32) + b2_ref[...]

    y = _layernorm(x + ff, g2_ref[...], be2_ref[...])
    out_ref[...] = y.reshape(Bt, Lq, D)


def _pick_block_b(B, Lq, target_rows=256, max_rows=1024):
    """Fold batches per grid step so projection/FFN matmuls see >= target_rows
    rows (MXU fill, ~256 rows for v6e/v7x, plenty for v5e's 128-deep array)
    while keeping the per-step activation slab bounded.  Only keep >= 2 grid
    steps (v7x megacore sharding) when each step still meets the row target."""
    divisors = [bt for bt in range(1, B + 1) if B % bt == 0 and bt * Lq <= max_rows]
    if not divisors:
        return 1
    for bt in divisors:  # smallest bt that fills the MXU and leaves >= 2 steps
        if bt * Lq >= target_rows and B // bt >= 2:
            return bt
    return divisors[-1]  # otherwise maximize rows per step


_WEIGHT_SHAPES = [
    (D_MODEL, D_MODEL), (D_MODEL, D_MODEL), (D_MODEL, D_MODEL),   # Wq, Wk, Wv
    (1, D_MODEL), (1, D_MODEL), (1, D_MODEL),                     # bq, bk, bv
    (D_MODEL, D_MODEL), (1, D_MODEL),                             # Wo, bo
    (1, D_MODEL), (1, D_MODEL),                                   # ln1 gamma, beta
    (D_MODEL, FF_HIDDEN), (1, FF_HIDDEN),                         # W1, b1
    (FF_HIDDEN, D_MODEL), (1, D_MODEL),                           # W2, b2
    (1, D_MODEL), (1, D_MODEL),                                   # ln2 gamma, beta
]


def em_interactor_block(q, k, v, params, block_b=None, need_weights=True):
    B, Lq, D = q.shape
    _, Lk, _ = k.shape
    assert D == D_MODEL
    # (8,128) layout guard: keeps the (Bt, L, D)->(Bt*L, D) reshapes and the
    # attnw slab free of in-kernel relayout copies.
    assert Lq % 8 == 0 and Lk % 8 == 0, "Lq and Lk must be multiples of 8"
    if block_b is None:
        block_b = _pick_block_b(B, Lq)
    assert B % block_b == 0, "block_b must divide batch"
    grid = (B // block_b,)

    (wq, wk, wv, bq, bk, bv, wo, bo, g1, be1,
     w1, b1, w2, b2, g2, be2) = params
    # Fold the 1/sqrt(head_dim) attention scale into the Q projection once
    # (one-time weight transform, removes per-step score scaling).
    scale = 1.0 / math.sqrt(HEAD_DIM)
    wq_s = (wq.astype(jnp.float32) * scale).astype(wq.dtype)
    bq_s = (bq.astype(jnp.float32) * scale).astype(bq.dtype)
    kernel_params = (wq_s, wk, wv, bq_s, bk, bv, wo, bo, g1, be1,
                     w1, b1, w2, b2, g2, be2)

    out_shape = [jax.ShapeDtypeStruct((B, Lq, D), jnp.float32)]
    out_specs = [pl.BlockSpec((block_b, Lq, D), lambda b: (b, 0, 0))]
    if need_weights:
        # 2-D (B*Lq, Lk) slab (one squeezed dim fewer on the store path);
        # reshaped back to (B, Lq, Lk) outside the kernel.
        out_shape.append(jax.ShapeDtypeStruct((B * Lq, Lk), jnp.float32))
        out_specs.append(pl.BlockSpec((block_b * Lq, Lk), lambda b: (b, 0)))

    def run(single_buffer_weights):
        def const_spec(shape):
            if single_buffer_weights:
                # Grid-invariant params: double-buffering only doubles their
                # VMEM footprint for zero benefit.
                return pl.BlockSpec(shape, lambda b: (0, 0),
                                    pipeline_mode=pl.Buffered(1))
            return pl.BlockSpec(shape, lambda b: (0, 0))

        grid_spec = pl.GridSpec(
            grid=grid,
            in_specs=[
                pl.BlockSpec((block_b, Lq, D), lambda b: (b, 0, 0)),
                pl.BlockSpec((block_b, Lk, D), lambda b: (b, 0, 0)),
                pl.BlockSpec((block_b, Lk, D), lambda b: (b, 0, 0)),
                *[const_spec(s) for s in _WEIGHT_SHAPES],
            ],
            out_specs=tuple(out_specs),
        )
        return pl.pallas_call(
            em_interactor_kernel,
            out_shape=tuple(out_shape),
            grid_spec=grid_spec,
            compiler_params=pltpu.CompilerParams(
                dimension_semantics=("parallel",),
                # Within scoped defaults on v6e/v7x, a raise on v5e; the
                # max_rows=1024 activation slab stays well under this.
                vmem_limit_bytes=32 * 1024 * 1024,
            ),
        )(q, k, v, *kernel_params)

    try:
        results = run(True)
    except Exception:
        # TODO(synk): pipeline_mode=pl.Buffered(1) unsupported by this JAX
        # version; fall back to default double-buffered weight blocks.
        results = run(False)

    if need_weights:
        out, attnw = results
        return out, attnw.reshape(B, Lq, Lk)
    (out,) = results
    return out, None


def make_params(key):
    """Deterministic synthetic parameters matching nn.MultiheadAttention /
    LayerNorm / Linear shapes.  Matmul weights are pre-transposed (kernel does
    x @ W) and stored in bf16 (halves weight DMA, native MXU dtype); biases and
    LayerNorm params stay f32."""
    ks = jax.random.split(key, 8)
    s = 0.02
    wdt = MM_DTYPE
    # in_proj_weight: (3D, D) -> split and transpose to (D, D) each
    in_proj_w = jax.random.normal(ks[0], (3 * D_MODEL, D_MODEL), jnp.float32) * s
    in_proj_b = jax.random.normal(ks[1], (3 * D_MODEL,), jnp.float32) * s
    wq = in_proj_w[:D_MODEL].T.astype(wdt)
    wk = in_proj_w[D_MODEL:2 * D_MODEL].T.astype(wdt)
    wv = in_proj_w[2 * D_MODEL:].T.astype(wdt)
    bq = in_proj_b[:D_MODEL].reshape(1, D_MODEL)
    bk = in_proj_b[D_MODEL:2 * D_MODEL].reshape(1, D_MODEL)
    bv = in_proj_b[2 * D_MODEL:].reshape(1, D_MODEL)

    wo = (jax.random.normal(ks[2], (D_MODEL, D_MODEL), jnp.float32) * s).T.astype(wdt)
    bo = (jax.random.normal(ks[3], (D_MODEL,), jnp.float32) * s).reshape(1, D_MODEL)

    g1 = jnp.ones((1, D_MODEL), jnp.float32)
    be1 = jnp.zeros((1, D_MODEL), jnp.float32)

    w1 = (jax.random.normal(ks[4], (FF_HIDDEN, D_MODEL), jnp.float32) * s).T.astype(wdt)
    b1 = (jax.random.normal(ks[5], (FF_HIDDEN,), jnp.float32) * s).reshape(1, FF_HIDDEN)
    w2 = (jax.random.normal(ks[6], (D_MODEL, FF_HIDDEN), jnp.float32) * s).T.astype(wdt)
    b2 = (jax.random.normal(ks[7], (D_MODEL,), jnp.float32) * s).reshape(1, D_MODEL)

    g2 = jnp.ones((1, D_MODEL), jnp.float32)
    be2 = jnp.zeros((1, D_MODEL), jnp.float32)

    return (wq, wk, wv, bq, bk, bv, wo, bo, g1, be1, w1, b1, w2, b2, g2, be2)


def reference_forward(q, k, v, params):
    """Pure-JAX f32 reference reproducing the PyTorch forward (eval mode),
    using the same (bf16-valued) weights cast to f32."""
    (wq, wk, wv, bq, bk, bv, wo, bo, g1, be1, w1, b1, w2, b2, g2, be2) = [
        jnp.asarray(t, jnp.float32) for t in params]
    B, Lq, D = q.shape
    Lk = k.shape[1]
    Q = q @ wq + bq
    K = k @ wk + bk
    V = v @ wv + bv
    Qh = Q.reshape(B, Lq, NUM_HEADS, HEAD_DIM).transpose(0, 2, 1, 3)
    Kh = K.reshape(B, Lk, NUM_HEADS, HEAD_DIM).transpose(0, 2, 1, 3)
    Vh = V.reshape(B, Lk, NUM_HEADS, HEAD_DIM).transpose(0, 2, 1, 3)
    scores = jnp.einsum("bhqd,bhkd->bhqk", Qh, Kh) / math.sqrt(HEAD_DIM)
    p = jax.nn.softmax(scores, axis=-1)
    attn_w = jnp.mean(p, axis=1)
    o = jnp.einsum("bhqk,bhkd->bhqd", p, Vh).transpose(0, 2, 1, 3).reshape(B, Lq, D)
    attn_out = o @ wo + bo
    x = q + attn_out
    mu = x.mean(-1, keepdims=True)
    var = ((x - mu) ** 2).mean(-1, keepdims=True)
    x = (x - mu) / jnp.sqrt(var + LN_EPS) * g1 + be1
    h1 = jnp.maximum(x @ w1 + b1, 0.0)
    ff = h1 @ w2 + b2
    y = x + ff
    mu = y.mean(-1, keepdims=True)
    var = ((y - mu) ** 2).mean(-1, keepdims=True)
    y = (y - mu) / jnp.sqrt(var + LN_EPS) * g2 + be2
    return y, attn_w


if __name__ == "__main__":
    key = jax.random.PRNGKey(0)
    kq, kk, kv, kp = jax.random.split(key, 4)

    # B=4, Lq=8: _pick_block_b folds the whole batch into one grid step
    # (M = 32 rows per matmul; too small to profitably split across two TCs).
    B, Lq, Lk = 4, 8, 16
    q = jax.random.normal(kq, (B, Lq, D_MODEL), jnp.float32)
    k = jax.random.normal(kk, (B, Lk, D_MODEL), jnp.float32)
    v = jax.random.normal(kv, (B, Lk, D_MODEL), jnp.float32)
    params = make_params(kp)

    out, attn_w = em_interactor_block(q, k, v, params, need_weights=True)
    jax.block_until_ready((out, attn_w))

    ref_out, ref_w = reference_forward(q, k, v, params)
    assert out.shape == (B, Lq, D_MODEL) and attn_w.shape == (B, Lq, Lk)
    # bf16 MXU operands + approx reciprocal -> relaxed (but still tight) tolerances.
    assert jnp.allclose(out, ref_out, atol=2e-2, rtol=2e-2), "output mismatch"
    assert jnp.allclose(attn_w, ref_w, atol=5e-3, rtol=5e-3), "attn weights mismatch"

    # need_weights=False path: skips attnw accumulation and its HBM writeback.
    out_nw, none_w = em_interactor_block(q, k, v, params, need_weights=False)
    jax.block_until_ready(out_nw)
    assert none_w is None
    assert jnp.allclose(out_nw, ref_out, atol=2e-2, rtol=2e-2), "no-weights mismatch"

    # TODO(synk): dropout is eval-mode identity (training-mode dropout omitted).
    print("KERNEL_OK")
</pallas_src>

<mosaic_0001>
module attributes {stable_mosaic.version = 11 : i64} {
  func.func @em_interactor_kernel(%arg0: i32, %arg1: memref<4x8x128xf32, #tpu.memory_space<vmem>>, %arg2: memref<4x16x128xf32, #tpu.memory_space<vmem>>, %arg3: memref<4x16x128xf32, #tpu.memory_space<vmem>>, %arg4: memref<128x128xbf16, #tpu.memory_space<vmem>>, %arg5: memref<128x128xbf16, #tpu.memory_space<vmem>>, %arg6: memref<128x128xbf16, #tpu.memory_space<vmem>>, %arg7: memref<1x128xf32, #tpu.memory_space<vmem>>, %arg8: memref<1x128xf32, #tpu.memory_space<vmem>>, %arg9: memref<1x128xf32, #tpu.memory_space<vmem>>, %arg10: memref<128x128xbf16, #tpu.memory_space<vmem>>, %arg11: memref<1x128xf32, #tpu.memory_space<vmem>>, %arg12: memref<1x128xf32, #tpu.memory_space<vmem>>, %arg13: memref<1x128xf32, #tpu.memory_space<vmem>>, %arg14: memref<128x512xbf16, #tpu.memory_space<vmem>>, %arg15: memref<1x512xf32, #tpu.memory_space<vmem>>, %arg16: memref<512x128xbf16, #tpu.memory_space<vmem>>, %arg17: memref<1x128xf32, #tpu.memory_space<vmem>>, %arg18: memref<1x128xf32, #tpu.memory_space<vmem>>, %arg19: memref<1x128xf32, #tpu.memory_space<vmem>>, %arg20: memref<4x8x128xf32, #tpu.memory_space<vmem>>, %arg21: memref<32x16xf32, #tpu.memory_space<vmem>>) attributes {dimension_semantics = [#tpu.dimension_semantics<parallel>], iteration_bounds = array<i64: 1>, scalar_prefetch = 0 : i64, scratch_operands = 0 : i64, tpu.core_type = #tpu.core_type<tc>, window_params = [{transform_indices = @transform_0, window_bounds = array<i64: 4, 8, 128>}, {transform_indices = @transform_1, window_bounds = array<i64: 4, 16, 128>}, {transform_indices = @transform_2, window_bounds = array<i64: 4, 16, 128>}, {pipeline_mode = #tpu.pipeline_mode<synchronous>, transform_indices = @transform_3, window_bounds = array<i64: 128, 128>}, {pipeline_mode = #tpu.pipeline_mode<synchronous>, transform_indices = @transform_4, window_bounds = array<i64: 128, 128>}, {pipeline_mode = #tpu.pipeline_mode<synchronous>, transform_indices = @transform_5, window_bounds = array<i64: 128, 128>}, {pipeline_mode = #tpu.pipeline_mode<synchronous>, transform_indices = @transform_6, window_bounds = array<i64: 1, 128>}, {pipeline_mode = #tpu.pipeline_mode<synchronous>, transform_indices = @transform_7, window_bounds = array<i64: 1, 128>}, {pipeline_mode = #tpu.pipeline_mode<synchronous>, transform_indices = @transform_8, window_bounds = array<i64: 1, 128>}, {pipeline_mode = #tpu.pipeline_mode<synchronous>, transform_indices = @transform_9, window_bounds = array<i64: 128, 128>}, {pipeline_mode = #tpu.pipeline_mode<synchronous>, transform_indices = @transform_10, window_bounds = array<i64: 1, 128>}, {pipeline_mode = #tpu.pipeline_mode<synchronous>, transform_indices = @transform_11, window_bounds = array<i64: 1, 128>}, {pipeline_mode = #tpu.pipeline_mode<synchronous>, transform_indices = @transform_12, window_bounds = array<i64: 1, 128>}, {pipeline_mode = #tpu.pipeline_mode<synchronous>, transform_indices = @transform_13, window_bounds = array<i64: 128, 512>}, {pipeline_mode = #tpu.pipeline_mode<synchronous>, transform_indices = @transform_14, window_bounds = array<i64: 1, 512>}, {pipeline_mode = #tpu.pipeline_mode<synchronous>, transform_indices = @transform_15, window_bounds = array<i64: 512, 128>}, {pipeline_mode = #tpu.pipeline_mode<synchronous>, transform_indices = @transform_16, window_bounds = array<i64: 1, 128>}, {pipeline_mode = #tpu.pipeline_mode<synchronous>, transform_indices = @transform_17, window_bounds = array<i64: 1, 128>}, {pipeline_mode = #tpu.pipeline_mode<synchronous>, transform_indices = @transform_18, window_bounds = array<i64: 1, 128>}, {transform_indices = @transform_19, window_bounds = array<i64: 4, 8, 128>}, {transform_indices = @transform_20, window_bounds = array<i64: 32, 16>}]} {
    %c0 = arith.constant 0 : index
    %c0_0 = arith.constant 0 : index
    %c0_1 = arith.constant 0 : index
    %0 = vector.load %arg1[%c0, %c0_0, %c0_1] : memref<4x8x128xf32, #tpu.memory_space<vmem>>, vector<4x8x128xf32>
    %1 = vector.shape_cast %0 : vector<4x8x128xf32> to vector<32x128xf32>
    %c0_2 = arith.constant 0 : index
    %c0_3 = arith.constant 0 : index
    %c0_4 = arith.constant 0 : index
    %2 = vector.load %arg2[%c0_2, %c0_3, %c0_4] : memref<4x16x128xf32, #tpu.memory_space<vmem>>, vector<4x16x128xf32>
    %3 = vector.shape_cast %2 : vector<4x16x128xf32> to vector<64x128xf32>
    %c0_5 = arith.constant 0 : index
    %c0_6 = arith.constant 0 : index
    %c0_7 = arith.constant 0 : index
    %4 = vector.load %arg3[%c0_5, %c0_6, %c0_7] : memref<4x16x128xf32, #tpu.memory_space<vmem>>, vector<4x16x128xf32>
    %5 = vector.shape_cast %4 : vector<4x16x128xf32> to vector<64x128xf32>
    %6 = arith.truncf %1 : vector<32x128xf32> to vector<32x128xbf16>
    %c0_8 = arith.constant 0 : index
    %c0_9 = arith.constant 0 : index
    %7 = vector.load %arg4[%c0_8, %c0_9] : memref<128x128xbf16, #tpu.memory_space<vmem>>, vector<128x128xbf16>
    %cst = arith.constant dense<0.000000e+00> : vector<32x128xf32>
    %8 = tpu.matmul %6, %7, %cst {dimension_numbers = #tpu.dot_dimension_numbers<[1], [0], [0], [1], [0, 0, 1, 1], [], []>} : vector<32x128xbf16>, vector<128x128xbf16>, vector<32x128xf32> -> vector<32x128xf32>
    %c0_10 = arith.constant 0 : index
    %c0_11 = arith.constant 0 : index
    %9 = vector.load %arg7[%c0_10, %c0_11] : memref<1x128xf32, #tpu.memory_space<vmem>>, vector<1x128xf32>
    %10 = vector.broadcast %9 : vector<1x128xf32> to vector<32x128xf32>
    %11 = arith.addf %8, %10 : vector<32x128xf32>
    %12 = arith.truncf %3 : vector<64x128xf32> to vector<64x128xbf16>
    %c0_12 = arith.constant 0 : index
    %c0_13 = arith.constant 0 : index
    %13 = vector.load %arg5[%c0_12, %c0_13] : memref<128x128xbf16, #tpu.memory_space<vmem>>, vector<128x128xbf16>
    %cst_14 = arith.constant dense<0.000000e+00> : vector<64x128xf32>
    %14 = tpu.matmul %12, %13, %cst_14 {dimension_numbers = #tpu.dot_dimension_numbers<[1], [0], [0], [1], [0, 0, 1, 1], [], []>} : vector<64x128xbf16>, vector<128x128xbf16>, vector<64x128xf32> -> vector<64x128xf32>
    %c0_15 = arith.constant 0 : index
    %c0_16 = arith.constant 0 : index
    %15 = vector.load %arg8[%c0_15, %c0_16] : memref<1x128xf32, #tpu.memory_space<vmem>>, vector<1x128xf32>
    %16 = vector.broadcast %15 : vector<1x128xf32> to vector<64x128xf32>
    %17 = arith.addf %14, %16 : vector<64x128xf32>
    %18 = arith.truncf %5 : vector<64x128xf32> to vector<64x128xbf16>
    %c0_17 = arith.constant 0 : index
    %c0_18 = arith.constant 0 : index
    %19 = vector.load %arg6[%c0_17, %c0_18] : memref<128x128xbf16, #tpu.memory_space<vmem>>, vector<128x128xbf16>
    %cst_19 = arith.constant dense<0.000000e+00> : vector<64x128xf32>
    %20 = tpu.matmul %18, %19, %cst_19 {dimension_numbers = #tpu.dot_dimension_numbers<[1], [0], [0], [1], [0, 0, 1, 1], [], []>} : vector<64x128xbf16>, vector<128x128xbf16>, vector<64x128xf32> -> vector<64x128xf32>
    %c0_20 = arith.constant 0 : index
    %c0_21 = arith.constant 0 : index
    %21 = vector.load %arg9[%c0_20, %c0_21] : memref<1x128xf32, #tpu.memory_space<vmem>>, vector<1x128xf32>
    %22 = vector.broadcast %21 : vector<1x128xf32> to vector<64x128xf32>
    %23 = arith.addf %20, %22 : vector<64x128xf32>
    %24 = vector.extract_strided_slice %11 {offsets = [0, 0], sizes = [32, 32], strides = [1, 1]} : vector<32x128xf32> to vector<32x32xf32>
    %25 = vector.shape_cast %24 : vector<32x32xf32> to vector<4x8x32xf32>
    %26 = vector.extract_strided_slice %17 {offsets = [0, 0], sizes = [64, 32], strides = [1, 1]} : vector<64x128xf32> to vector<64x32xf32>
    %27 = vector.shape_cast %26 : vector<64x32xf32> to vector<4x16x32xf32>
    %28 = vector.extract_strided_slice %23 {offsets = [0, 0], sizes = [64, 32], strides = [1, 1]} : vector<64x128xf32> to vector<64x32xf32>
    %29 = vector.shape_cast %28 : vector<64x32xf32> to vector<4x16x32xf32>
    "tpu.trace_start"() <{level = 10 : i32, message = "bqd,bkd->bqk"}> : () -> ()
    %cst_22 = arith.constant dense<0.000000e+00> : vector<4x8x16xf32>
    %30 = tpu.matmul %25, %27, %cst_22 {dimension_numbers = #tpu.dot_dimension_numbers<[2], [2], [1], [1], [0, 0, 0, 1, 1, 1], [0], [0]>} : vector<4x8x32xf32>, vector<4x16x32xf32>, vector<4x8x16xf32> -> vector<4x8x16xf32>
    "tpu.trace_stop"() : () -> ()
    %cst_23 = arith.constant dense<0xFF800000> : vector<4x8xf32>
    %31 = vector.multi_reduction <maximumf>, %30, %cst_23 [2] : vector<4x8x16xf32> to vector<4x8xf32>
    %32 = vector.shape_cast %31 : vector<4x8xf32> to vector<4x8x1xf32>
    %33 = vector.broadcast %32 : vector<4x8x1xf32> to vector<4x8x16xf32>
    %34 = arith.subf %30, %33 : vector<4x8x16xf32>
    %35 = math.exp %34 : vector<4x8x16xf32>
    %cst_24 = arith.constant dense<0.000000e+00> : vector<4x8xf32>
    %36 = vector.multi_reduction <add>, %35, %cst_24 [2] : vector<4x8x16xf32> to vector<4x8xf32>
    %37 = vector.shape_cast %36 : vector<4x8xf32> to vector<4x8x1xf32>
    %38 = tpu.reciprocal %37 {approx = true} : vector<4x8x1xf32> -> vector<4x8x1xf32>
    %39 = vector.broadcast %38 : vector<4x8x1xf32> to vector<4x8x16xf32>
    %40 = arith.mulf %35, %39 : vector<4x8x16xf32>
    "tpu.trace_start"() <{level = 10 : i32, message = "bqk,bkd->bqd"}> : () -> ()
    %cst_25 = arith.constant dense<0.000000e+00> : vector<4x8x32xf32>
    %41 = tpu.matmul %40, %29, %cst_25 {dimension_numbers = #tpu.dot_dimension_numbers<[2], [1], [1], [2], [0, 0, 0, 1, 1, 2], [0], [0]>} : vector<4x8x16xf32>, vector<4x16x32xf32>, vector<4x8x32xf32> -> vector<4x8x32xf32>
    "tpu.trace_stop"() : () -> ()
    %42 = vector.extract_strided_slice %11 {offsets = [0, 32], sizes = [32, 32], strides = [1, 1]} : vector<32x128xf32> to vector<32x32xf32>
    %43 = vector.shape_cast %42 : vector<32x32xf32> to vector<4x8x32xf32>
    %44 = vector.extract_strided_slice %17 {offsets = [0, 32], sizes = [64, 32], strides = [1, 1]} : vector<64x128xf32> to vector<64x32xf32>
    %45 = vector.shape_cast %44 : vector<64x32xf32> to vector<4x16x32xf32>
    %46 = vector.extract_strided_slice %23 {offsets = [0, 32], sizes = [64, 32], strides = [1, 1]} : vector<64x128xf32> to vector<64x32xf32>
    %47 = vector.shape_cast %46 : vector<64x32xf32> to vector<4x16x32xf32>
    "tpu.trace_start"() <{level = 10 : i32, message = "bqd,bkd->bqk"}> : () -> ()
    %cst_26 = arith.constant dense<0.000000e+00> : vector<4x8x16xf32>
    %48 = tpu.matmul %43, %45, %cst_26 {dimension_numbers = #tpu.dot_dimension_numbers<[2], [2], [1], [1], [0, 0, 0, 1, 1, 1], [0], [0]>} : vector<4x8x32xf32>, vector<4x16x32xf32>, vector<4x8x16xf32> -> vector<4x8x16xf32>
    "tpu.trace_stop"() : () -> ()
    %cst_27 = arith.constant dense<0xFF800000> : vector<4x8xf32>
    %49 = vector.multi_reduction <maximumf>, %48, %cst_27 [2] : vector<4x8x16xf32> to vector<4x8xf32>
    %50 = vector.shape_cast %49 : vector<4x8xf32> to vector<4x8x1xf32>
    %51 = vector.broadcast %50 : vector<4x8x1xf32> to vector<4x8x16xf32>
    %52 = arith.subf %48, %51 : vector<4x8x16xf32>
    %53 = math.exp %52 : vector<4x8x16xf32>
    %cst_28 = arith.constant dense<0.000000e+00> : vector<4x8xf32>
    %54 = vector.multi_reduction <add>, %53, %cst_28 [2] : vector<4x8x16xf32> to vector<4x8xf32>
    %55 = vector.shape_cast %54 : vector<4x8xf32> to vector<4x8x1xf32>
    %56 = tpu.reciprocal %55 {approx = true} : vector<4x8x1xf32> -> vector<4x8x1xf32>
    %57 = vector.broadcast %56 : vector<4x8x1xf32> to vector<4x8x16xf32>
    %58 = arith.mulf %53, %57 : vector<4x8x16xf32>
    %59 = arith.addf %40, %58 : vector<4x8x16xf32>
    "tpu.trace_start"() <{level = 10 : i32, message = "bqk,bkd->bqd"}> : () -> ()
    %cst_29 = arith.constant dense<0.000000e+00> : vector<4x8x32xf32>
    %60 = tpu.matmul %58, %47, %cst_29 {dimension_numbers = #tpu.dot_dimension_numbers<[2], [1], [1], [2], [0, 0, 0, 1, 1, 2], [0], [0]>} : vector<4x8x16xf32>, vector<4x16x32xf32>, vector<4x8x32xf32> -> vector<4x8x32xf32>
    "tpu.trace_stop"() : () -> ()
    %61 = vector.extract_strided_slice %11 {offsets = [0, 64], sizes = [32, 32], strides = [1, 1]} : vector<32x128xf32> to vector<32x32xf32>
    %62 = vector.shape_cast %61 : vector<32x32xf32> to vector<4x8x32xf32>
    %63 = vector.extract_strided_slice %17 {offsets = [0, 64], sizes = [64, 32], strides = [1, 1]} : vector<64x128xf32> to vector<64x32xf32>
    %64 = vector.shape_cast %63 : vector<64x32xf32> to vector<4x16x32xf32>
    %65 = vector.extract_strided_slice %23 {offsets = [0, 64], sizes = [64, 32], strides = [1, 1]} : vector<64x128xf32> to vector<64x32xf32>
    %66 = vector.shape_cast %65 : vector<64x32xf32> to vector<4x16x32xf32>
    "tpu.trace_start"() <{level = 10 : i32, message = "bqd,bkd->bqk"}> : () -> ()
    %cst_30 = arith.constant dense<0.000000e+00> : vector<4x8x16xf32>
    %67 = tpu.matmul %62, %64, %cst_30 {dimension_numbers = #tpu.dot_dimension_numbers<[2], [2], [1], [1], [0, 0, 0, 1, 1, 1], [0], [0]>} : vector<4x8x32xf32>, vector<4x16x32xf32>, vector<4x8x16xf32> -> vector<4x8x16xf32>
    "tpu.trace_stop"() : () -> ()
    %cst_31 = arith.constant dense<0xFF800000> : vector<4x8xf32>
    %68 = vector.multi_reduction <maximumf>, %67, %cst_31 [2] : vector<4x8x16xf32> to vector<4x8xf32>
    %69 = vector.shape_cast %68 : vector<4x8xf32> to vector<4x8x1xf32>
    %70 = vector.broadcast %69 : vector<4x8x1xf32> to vector<4x8x16xf32>
    %71 = arith.subf %67, %70 : vector<4x8x16xf32>
    %72 = math.exp %71 : vector<4x8x16xf32>
    %cst_32 = arith.constant dense<0.000000e+00> : vector<4x8xf32>
    %73 = vector.multi_reduction <add>, %72, %cst_32 [2] : vector<4x8x16xf32> to vector<4x8xf32>
    %74 = vector.shape_cast %73 : vector<4x8xf32> to vector<4x8x1xf32>
    %75 = tpu.reciprocal %74 {approx = true} : vector<4x8x1xf32> -> vector<4x8x1xf32>
    %76 = vector.broadcast %75 : vector<4x8x1xf32> to vector<4x8x16xf32>
    %77 = arith.mulf %72, %76 : vector<4x8x16xf32>
    %78 = arith.addf %59, %77 : vector<4x8x16xf32>
    "tpu.trace_start"() <{level = 10 : i32, message = "bqk,bkd->bqd"}> : () -> ()
    %cst_33 = arith.constant dense<0.000000e+00> : vector<4x8x32xf32>
    %79 = tpu.matmul %77, %66, %cst_33 {dimension_numbers = #tpu.dot_dimension_numbers<[2], [1], [1], [2], [0, 0, 0, 1, 1, 2], [0], [0]>} : vector<4x8x16xf32>, vector<4x16x32xf32>, vector<4x8x32xf32> -> vector<4x8x32xf32>
    "tpu.trace_stop"() : () -> ()
    %80 = vector.extract_strided_slice %11 {offsets = [0, 96], sizes = [32, 32], strides = [1, 1]} : vector<32x128xf32> to vector<32x32xf32>
    %81 = vector.shape_cast %80 : vector<32x32xf32> to vector<4x8x32xf32>
    %82 = vector.extract_strided_slice %17 {offsets = [0, 96], sizes = [64, 32], strides = [1, 1]} : vector<64x128xf32> to vector<64x32xf32>
    %83 = vector.shape_cast %82 : vector<64x32xf32> to vector<4x16x32xf32>
    %84 = vector.extract_strided_slice %23 {offsets = [0, 96], sizes = [64, 32], strides = [1, 1]} : vector<64x128xf32> to vector<64x32xf32>
    %85 = vector.shape_cast %84 : vector<64x32xf32> to vector<4x16x32xf32>
    "tpu.trace_start"() <{level = 10 : i32, message = "bqd,bkd->bqk"}> : () -> ()
    %cst_34 = arith.constant dense<0.000000e+00> : vector<4x8x16xf32>
    %86 = tpu.matmul %81, %83, %cst_34 {dimension_numbers = #tpu.dot_dimension_numbers<[2], [2], [1], [1], [0, 0, 0, 1, 1, 1], [0], [0]>} : vector<4x8x32xf32>, vector<4x16x32xf32>, vector<4x8x16xf32> -> vector<4x8x16xf32>
    "tpu.trace_stop"() : () -> ()
    %cst_35 = arith.constant dense<0xFF800000> : vector<4x8xf32>
    %87 = vector.multi_reduction <maximumf>, %86, %cst_35 [2] : vector<4x8x16xf32> to vector<4x8xf32>
    %88 = vector.shape_cast %87 : vector<4x8xf32> to vector<4x8x1xf32>
    %89 = vector.broadcast %88 : vector<4x8x1xf32> to vector<4x8x16xf32>
    %90 = arith.subf %86, %89 : vector<4x8x16xf32>
    %91 = math.exp %90 : vector<4x8x16xf32>
    %cst_36 = arith.constant dense<0.000000e+00> : vector<4x8xf32>
    %92 = vector.multi_reduction <add>, %91, %cst_36 [2] : vector<4x8x16xf32> to vector<4x8xf32>
    %93 = vector.shape_cast %92 : vector<4x8xf32> to vector<4x8x1xf32>
    %94 = tpu.reciprocal %93 {approx = true} : vector<4x8x1xf32> -> vector<4x8x1xf32>
    %95 = vector.broadcast %94 : vector<4x8x1xf32> to vector<4x8x16xf32>
    %96 = arith.mulf %91, %95 : vector<4x8x16xf32>
    %97 = arith.addf %78, %96 : vector<4x8x16xf32>
    "tpu.trace_start"() <{level = 10 : i32, message = "bqk,bkd->bqd"}> : () -> ()
    %cst_37 = arith.constant dense<0.000000e+00> : vector<4x8x32xf32>
    %98 = tpu.matmul %96, %85, %cst_37 {dimension_numbers = #tpu.dot_dimension_numbers<[2], [1], [1], [2], [0, 0, 0, 1, 1, 2], [0], [0]>} : vector<4x8x16xf32>, vector<4x16x32xf32>, vector<4x8x32xf32> -> vector<4x8x32xf32>
    "tpu.trace_stop"() : () -> ()
    %cst_38 = arith.constant 2.500000e-01 : f32
    %99 = vector.broadcast %cst_38 : f32 to vector<4x8x16xf32>
    %100 = arith.mulf %97, %99 : vector<4x8x16xf32>
    %101 = vector.shape_cast %100 : vector<4x8x16xf32> to vector<32x16xf32>
    %c0_39 = arith.constant 0 : index
    %c0_40 = arith.constant 0 : index
    %102 = vector.load %arg21[%c0_39, %c0_40] : memref<32x16xf32, #tpu.memory_space<vmem>>, vector<32x16xf32>
    tpu.vector_store %arg21[%c0_39, %c0_40], %101 {strides = array<i32>} : memref<32x16xf32, #tpu.memory_space<vmem>>, vector<32x16xf32>,
    %103 = tpu.concatenate %41, %60, %79, %98 in 2 : vector<4x8x32xf32>, vector<4x8x32xf32>, vector<4x8x32xf32>, vector<4x8x32xf32> -> vector<4x8x128xf32>
    %104 = vector.shape_cast %103 : vector<4x8x128xf32> to vector<32x128xf32>
    %105 = arith.truncf %104 : vector<32x128xf32> to vector<32x128xbf16>
    %c0_41 = arith.constant 0 : index
    %c0_42 = arith.constant 0 : index
    %106 = vector.load %arg10[%c0_41, %c0_42] : memref<128x128xbf16, #tpu.memory_space<vmem>>, vector<128x128xbf16>
    %cst_43 = arith.constant dense<0.000000e+00> : vector<32x128xf32>
    %107 = tpu.matmul %105, %106, %cst_43 {dimension_numbers = #tpu.dot_dimension_numbers<[1], [0], [0], [1], [0, 0, 1, 1], [], []>} : vector<32x128xbf16>, vector<128x128xbf16>, vector<32x128xf32> -> vector<32x128xf32>
    %c0_44 = arith.constant 0 : index
    %c0_45 = arith.constant 0 : index
    %108 = vector.load %arg11[%c0_44, %c0_45] : memref<1x128xf32, #tpu.memory_space<vmem>>, vector<1x128xf32>
    %109 = vector.broadcast %108 : vector<1x128xf32> to vector<32x128xf32>
    %110 = arith.addf %107, %109 : vector<32x128xf32>
    %111 = arith.addf %1, %110 : vector<32x128xf32>
    %c0_46 = arith.constant 0 : index
    %c0_47 = arith.constant 0 : index
    %112 = vector.load %arg12[%c0_46, %c0_47] : memref<1x128xf32, #tpu.memory_space<vmem>>, vector<1x128xf32>
    %c0_48 = arith.constant 0 : index
    %c0_49 = arith.constant 0 : index
    %113 = vector.load %arg13[%c0_48, %c0_49] : memref<1x128xf32, #tpu.memory_space<vmem>>, vector<1x128xf32>
    %cst_50 = arith.constant dense<0.000000e+00> : vector<32xf32>
    %114 = vector.multi_reduction <add>, %111, %cst_50 [1] : vector<32x128xf32> to vector<32xf32>
    %115 = vector.shape_cast %114 : vector<32xf32> to vector<32x1xf32>
    %cst_51 = arith.constant 1.280000e+02 : f32
    %116 = vector.broadcast %cst_51 : f32 to vector<32x1xf32>
    %117 = arith.divf %115, %116 : vector<32x1xf32>
    %118 = vector.broadcast %117 : vector<32x1xf32> to vector<32x128xf32>
    %119 = arith.subf %111, %118 : vector<32x128xf32>
    %120 = vector.broadcast %117 : vector<32x1xf32> to vector<32x128xf32>
    %121 = arith.subf %111, %120 : vector<32x128xf32>
    %122 = arith.mulf %119, %121 : vector<32x128xf32>
    %cst_52 = arith.constant dense<0.000000e+00> : vector<32xf32>
    %123 = vector.multi_reduction <add>, %122, %cst_52 [1] : vector<32x128xf32> to vector<32xf32>
    %124 = vector.shape_cast %123 : vector<32xf32> to vector<32x1xf32>
    %cst_53 = arith.constant 1.280000e+02 : f32
    %125 = vector.broadcast %cst_53 : f32 to vector<32x1xf32>
    %126 = arith.divf %124, %125 : vector<32x1xf32>
    %127 = vector.broadcast %117 : vector<32x1xf32> to vector<32x128xf32>
    %128 = arith.subf %111, %127 : vector<32x128xf32>
    %cst_54 = arith.constant 9.99999974E-6 : f32
    %129 = vector.broadcast %cst_54 : f32 to vector<32x1xf32>
    %130 = arith.addf %126, %129 : vector<32x1xf32>
    %131 = math.rsqrt %130 : vector<32x1xf32>
    %132 = vector.broadcast %131 : vector<32x1xf32> to vector<32x128xf32>
    %133 = arith.mulf %128, %132 : vector<32x128xf32>
    %134 = vector.broadcast %112 : vector<1x128xf32> to vector<32x128xf32>
    %135 = arith.mulf %133, %134 : vector<32x128xf32>
    %136 = vector.broadcast %113 : vector<1x128xf32> to vector<32x128xf32>
    %137 = arith.addf %135, %136 : vector<32x128xf32>
    %138 = arith.truncf %137 : vector<32x128xf32> to vector<32x128xbf16>
    %c0_55 = arith.constant 0 : index
    %c0_56 = arith.constant 0 : index
    %139 = vector.load %arg14[%c0_55, %c0_56] : memref<128x512xbf16, #tpu.memory_space<vmem>>, vector<128x512xbf16>
    %cst_57 = arith.constant dense<0.000000e+00> : vector<32x512xf32>
    %140 = tpu.matmul %138, %139, %cst_57 {dimension_numbers = #tpu.dot_dimension_numbers<[1], [0], [0], [1], [0, 0, 1, 1], [], []>} : vector<32x128xbf16>, vector<128x512xbf16>, vector<32x512xf32> -> vector<32x512xf32>
    %c0_58 = arith.constant 0 : index
    %c0_59 = arith.constant 0 : index
    %141 = vector.load %arg15[%c0_58, %c0_59] : memref<1x512xf32, #tpu.memory_space<vmem>>, vector<1x512xf32>
    %142 = vector.broadcast %141 : vector<1x512xf32> to vector<32x512xf32>
    %143 = arith.addf %140, %142 : vector<32x512xf32>
    %cst_60 = arith.constant 0.000000e+00 : f32
    %144 = vector.broadcast %cst_60 : f32 to vector<32x512xf32>
    %145 = arith.maximumf %143, %144 : vector<32x512xf32>
    %146 = arith.truncf %145 : vector<32x512xf32> to vector<32x512xbf16>
    %c0_61 = arith.constant 0 : index
    %c0_62 = arith.constant 0 : index
    %147 = vector.load %arg16[%c0_61, %c0_62] : memref<512x128xbf16, #tpu.memory_space<vmem>>, vector<512x128xbf16>
    %cst_63 = arith.constant dense<0.000000e+00> : vector<32x128xf32>
    %148 = tpu.matmul %146, %147, %cst_63 {dimension_numbers = #tpu.dot_dimension_numbers<[1], [0], [0], [1], [0, 0, 1, 1], [], []>} : vector<32x512xbf16>, vector<512x128xbf16>, vector<32x128xf32> -> vector<32x128xf32>
    %c0_64 = arith.constant 0 : index
    %c0_65 = arith.constant 0 : index
    %149 = vector.load %arg17[%c0_64, %c0_65] : memref<1x128xf32, #tpu.memory_space<vmem>>, vector<1x128xf32>
    %150 = vector.broadcast %149 : vector<1x128xf32> to vector<32x128xf32>
    %151 = arith.addf %148, %150 : vector<32x128xf32>
    %152 = arith.addf %137, %151 : vector<32x128xf32>
    %c0_66 = arith.constant 0 : index
    %c0_67 = arith.constant 0 : index
    %153 = vector.load %arg18[%c0_66, %c0_67] : memref<1x128xf32, #tpu.memory_space<vmem>>, vector<1x128xf32>
    %c0_68 = arith.constant 0 : index
    %c0_69 = arith.constant 0 : index
    %154 = vector.load %arg19[%c0_68, %c0_69] : memref<1x128xf32, #tpu.memory_space<vmem>>, vector<1x128xf32>
    %cst_70 = arith.constant dense<0.000000e+00> : vector<32xf32>
    %155 = vector.multi_reduction <add>, %152, %cst_70 [1] : vector<32x128xf32> to vector<32xf32>
    %156 = vector.shape_cast %155 : vector<32xf32> to vector<32x1xf32>
    %cst_71 = arith.constant 1.280000e+02 : f32
    %157 = vector.broadcast %cst_71 : f32 to vector<32x1xf32>
    %158 = arith.divf %156, %157 : vector<32x1xf32>
    %159 = vector.broadcast %158 : vector<32x1xf32> to vector<32x128xf32>
    %160 = arith.subf %152, %159 : vector<32x128xf32>
    %161 = vector.broadcast %158 : vector<32x1xf32> to vector<32x128xf32>
    %162 = arith.subf %152, %161 : vector<32x128xf32>
    %163 = arith.mulf %160, %162 : vector<32x128xf32>
    %cst_72 = arith.constant dense<0.000000e+00> : vector<32xf32>
    %164 = vector.multi_reduction <add>, %163, %cst_72 [1] : vector<32x128xf32> to vector<32xf32>
    %165 = vector.shape_cast %164 : vector<32xf32> to vector<32x1xf32>
    %cst_73 = arith.constant 1.280000e+02 : f32
    %166 = vector.broadcast %cst_73 : f32 to vector<32x1xf32>
    %167 = arith.divf %165, %166 : vector<32x1xf32>
    %168 = vector.broadcast %158 : vector<32x1xf32> to vector<32x128xf32>
    %169 = arith.subf %152, %168 : vector<32x128xf32>
    %cst_74 = arith.constant 9.99999974E-6 : f32
    %170 = vector.broadcast %cst_74 : f32 to vector<32x1xf32>
    %171 = arith.addf %167, %170 : vector<32x1xf32>
    %172 = math.rsqrt %171 : vector<32x1xf32>
    %173 = vector.broadcast %172 : vector<32x1xf32> to vector<32x128xf32>
    %174 = arith.mulf %169, %173 : vector<32x128xf32>
    %175 = vector.broadcast %153 : vector<1x128xf32> to vector<32x128xf32>
    %176 = arith.mulf %174, %175 : vector<32x128xf32>
    %177 = vector.broadcast %154 : vector<1x128xf32> to vector<32x128xf32>
    %178 = arith.addf %176, %177 : vector<32x128xf32>
    %179 = vector.shape_cast %178 : vector<32x128xf32> to vector<4x8x128xf32>
    %c0_75 = arith.constant 0 : index
    %c0_76 = arith.constant 0 : index
    %c0_77 = arith.constant 0 : index
    %180 = vector.load %arg20[%c0_75, %c0_76, %c0_77] : memref<4x8x128xf32, #tpu.memory_space<vmem>>, vector<4x8x128xf32>
    tpu.vector_store %arg20[%c0_75, %c0_76, %c0_77], %179 {strides = array<i32>} : memref<4x8x128xf32, #tpu.memory_space<vmem>>, vector<4x8x128xf32>,
    return
  }
  func.func @transform_0(%arg0: i32) -> (i32, i32, i32) {
    %c0_i32 = arith.constant 0 : i32
    %c0_i32_0 = arith.constant 0 : i32
    %c0_i32_1 = arith.constant 0 : i32
    return %arg0, %c0_i32, %c0_i32_0 : i32, i32, i32
  }
  func.func @transform_1(%arg0: i32) -> (i32, i32, i32) {
    %c0_i32 = arith.constant 0 : i32
    %c0_i32_0 = arith.constant 0 : i32
    %c0_i32_1 = arith.constant 0 : i32
    return %arg0, %c0_i32, %c0_i32_0 : i32, i32, i32
  }
  func.func @transform_2(%arg0: i32) -> (i32, i32, i32) {
    %c0_i32 = arith.constant 0 : i32
    %c0_i32_0 = arith.constant 0 : i32
    %c0_i32_1 = arith.constant 0 : i32
    return %arg0, %c0_i32, %c0_i32_0 : i32, i32, i32
  }
  func.func @transform_3(%arg0: i32) -> (i32, i32) {
    %c0_i32 = arith.constant 0 : i32
    %c0_i32_0 = arith.constant 0 : i32
    %c0_i32_1 = arith.constant 0 : i32
    return %c0_i32, %c0_i32_0 : i32, i32
  }
  func.func @transform_4(%arg0: i32) -> (i32, i32) {
    %c0_i32 = arith.constant 0 : i32
    %c0_i32_0 = arith.constant 0 : i32
    %c0_i32_1 = arith.constant 0 : i32
    return %c0_i32, %c0_i32_0 : i32, i32
  }
  func.func @transform_5(%arg0: i32) -> (i32, i32) {
    %c0_i32 = arith.constant 0 : i32
    %c0_i32_0 = arith.constant 0 : i32
    %c0_i32_1 = arith.constant 0 : i32
    return %c0_i32, %c0_i32_0 : i32, i32
  }
  func.func @transform_6(%arg0: i32) -> (i32, i32) {
    %c0_i32 = arith.constant 0 : i32
    %c0_i32_0 = arith.constant 0 : i32
    %c0_i32_1 = arith.constant 0 : i32
    return %c0_i32, %c0_i32_0 : i32, i32
  }
  func.func @transform_7(%arg0: i32) -> (i32, i32) {
    %c0_i32 = arith.constant 0 : i32
    %c0_i32_0 = arith.constant 0 : i32
    %c0_i32_1 = arith.constant 0 : i32
    return %c0_i32, %c0_i32_0 : i32, i32
  }
  func.func @transform_8(%arg0: i32) -> (i32, i32) {
    %c0_i32 = arith.constant 0 : i32
    %c0_i32_0 = arith.constant 0 : i32
    %c0_i32_1 = arith.constant 0 : i32
    return %c0_i32, %c0_i32_0 : i32, i32
  }
  func.func @transform_9(%arg0: i32) -> (i32, i32) {
    %c0_i32 = arith.constant 0 : i32
    %c0_i32_0 = arith.constant 0 : i32
    %c0_i32_1 = arith.constant 0 : i32
    return %c0_i32, %c0_i32_0 : i32, i32
  }
  func.func @transform_10(%arg0: i32) -> (i32, i32) {
    %c0_i32 = arith.constant 0 : i32
    %c0_i32_0 = arith.constant 0 : i32
    %c0_i32_1 = arith.constant 0 : i32
    return %c0_i32, %c0_i32_0 : i32, i32
  }
  func.func @transform_11(%arg0: i32) -> (i32, i32) {
    %c0_i32 = arith.constant 0 : i32
    %c0_i32_0 = arith.constant 0 : i32
    %c0_i32_1 = arith.constant 0 : i32
    return %c0_i32, %c0_i32_0 : i32, i32
  }
  func.func @transform_12(%arg0: i32) -> (i32, i32) {
    %c0_i32 = arith.constant 0 : i32
    %c0_i32_0 = arith.constant 0 : i32
    %c0_i32_1 = arith.constant 0 : i32
    return %c0_i32, %c0_i32_0 : i32, i32
  }
  func.func @transform_13(%arg0: i32) -> (i32, i32) {
    %c0_i32 = arith.constant 0 : i32
    %c0_i32_0 = arith.constant 0 : i32
    %c0_i32_1 = arith.constant 0 : i32
    return %c0_i32, %c0_i32_0 : i32, i32
  }
  func.func @transform_14(%arg0: i32) -> (i32, i32) {
    %c0_i32 = arith.constant 0 : i32
    %c0_i32_0 = arith.constant 0 : i32
    %c0_i32_1 = arith.constant 0 : i32
    return %c0_i32, %c0_i32_0 : i32, i32
  }
  func.func @transform_15(%arg0: i32) -> (i32, i32) {
    %c0_i32 = arith.constant 0 : i32
    %c0_i32_0 = arith.constant 0 : i32
    %c0_i32_1 = arith.constant 0 : i32
    return %c0_i32, %c0_i32_0 : i32, i32
  }
  func.func @transform_16(%arg0: i32) -> (i32, i32) {
    %c0_i32 = arith.constant 0 : i32
    %c0_i32_0 = arith.constant 0 : i32
    %c0_i32_1 = arith.constant 0 : i32
    return %c0_i32, %c0_i32_0 : i32, i32
  }
  func.func @transform_17(%arg0: i32) -> (i32, i32) {
    %c0_i32 = arith.constant 0 : i32
    %c0_i32_0 = arith.constant 0 : i32
    %c0_i32_1 = arith.constant 0 : i32
    return %c0_i32, %c0_i32_0 : i32, i32
  }
  func.func @transform_18(%arg0: i32) -> (i32, i32) {
    %c0_i32 = arith.constant 0 : i32
    %c0_i32_0 = arith.constant 0 : i32
    %c0_i32_1 = arith.constant 0 : i32
    return %c0_i32, %c0_i32_0 : i32, i32
  }
  func.func @transform_19(%arg0: i32) -> (i32, i32, i32) {
    %c0_i32 = arith.constant 0 : i32
    %c0_i32_0 = arith.constant 0 : i32
    %c0_i32_1 = arith.constant 0 : i32
    return %arg0, %c0_i32, %c0_i32_0 : i32, i32, i32
  }
  func.func @transform_20(%arg0: i32) -> (i32, i32) {
    %c0_i32 = arith.constant 0 : i32
    %c0_i32_0 = arith.constant 0 : i32
    return %arg0, %c0_i32 : i32, i32
  }
}

module attributes {stable_mosaic.version = 11 : i64} {
  func.func @em_interactor_kernel(%arg0: i32, %arg1: memref<4x8x128xf32, #tpu.memory_space<vmem>>, %arg2: memref<4x16x128xf32, #tpu.memory_space<vmem>>, %arg3: memref<4x16x128xf32, #tpu.memory_space<vmem>>, %arg4: memref<128x128xbf16, #tpu.memory_space<vmem>>, %arg5: memref<128x128xbf16, #tpu.memory_space<vmem>>, %arg6: memref<128x128xbf16, #tpu.memory_space<vmem>>, %arg7: memref<1x128xf32, #tpu.memory_space<vmem>>, %arg8: memref<1x128xf32, #tpu.memory_space<vmem>>, %arg9: memref<1x128xf32, #tpu.memory_space<vmem>>, %arg10: memref<128x128xbf16, #tpu.memory_space<vmem>>, %arg11: memref<1x128xf32, #tpu.memory_space<vmem>>, %arg12: memref<1x128xf32, #tpu.memory_space<vmem>>, %arg13: memref<1x128xf32, #tpu.memory_space<vmem>>, %arg14: memref<128x512xbf16, #tpu.memory_space<vmem>>, %arg15: memref<1x512xf32, #tpu.memory_space<vmem>>, %arg16: memref<512x128xbf16, #tpu.memory_space<vmem>>, %arg17: memref<1x128xf32, #tpu.memory_space<vmem>>, %arg18: memref<1x128xf32, #tpu.memory_space<vmem>>, %arg19: memref<1x128xf32, #tpu.memory_space<vmem>>, %arg20: memref<4x8x128xf32, #tpu.memory_space<vmem>>, %arg21: memref<32x16xf32, #tpu.memory_space<vmem>>) attributes {dimension_semantics = [#tpu.dimension_semantics<parallel>], iteration_bounds = array<i64: 1>, scalar_prefetch = 0 : i64, scratch_operands = 0 : i64, tpu.core_type = #tpu.core_type<tc>, window_params = [{transform_indices = @transform_0, window_bounds = array<i64: 4, 8, 128>}, {transform_indices = @transform_1, window_bounds = array<i64: 4, 16, 128>}, {transform_indices = @transform_2, window_bounds = array<i64: 4, 16, 128>}, {pipeline_mode = #tpu.pipeline_mode<synchronous>, transform_indices = @transform_3, window_bounds = array<i64: 128, 128>}, {pipeline_mode = #tpu.pipeline_mode<synchronous>, transform_indices = @transform_4, window_bounds = array<i64: 128, 128>}, {pipeline_mode = #tpu.pipeline_mode<synchronous>, transform_indices = @transform_5, window_bounds = array<i64: 128, 128>}, {pipeline_mode = #tpu.pipeline_mode<synchronous>, transform_indices = @transform_6, window_bounds = array<i64: 1, 128>}, {pipeline_mode = #tpu.pipeline_mode<synchronous>, transform_indices = @transform_7, window_bounds = array<i64: 1, 128>}, {pipeline_mode = #tpu.pipeline_mode<synchronous>, transform_indices = @transform_8, window_bounds = array<i64: 1, 128>}, {pipeline_mode = #tpu.pipeline_mode<synchronous>, transform_indices = @transform_9, window_bounds = array<i64: 128, 128>}, {pipeline_mode = #tpu.pipeline_mode<synchronous>, transform_indices = @transform_10, window_bounds = array<i64: 1, 128>}, {pipeline_mode = #tpu.pipeline_mode<synchronous>, transform_indices = @transform_11, window_bounds = array<i64: 1, 128>}, {pipeline_mode = #tpu.pipeline_mode<synchronous>, transform_indices = @transform_12, window_bounds = array<i64: 1, 128>}, {pipeline_mode = #tpu.pipeline_mode<synchronous>, transform_indices = @transform_13, window_bounds = array<i64: 128, 512>}, {pipeline_mode = #tpu.pipeline_mode<synchronous>, transform_indices = @transform_14, window_bounds = array<i64: 1, 512>}, {pipeline_mode = #tpu.pipeline_mode<synchronous>, transform_indices = @transform_15, window_bounds = array<i64: 512, 128>}, {pipeline_mode = #tpu.pipeline_mode<synchronous>, transform_indices = @transform_16, window_bounds = array<i64: 1, 128>}, {pipeline_mode = #tpu.pipeline_mode<synchronous>, transform_indices = @transform_17, window_bounds = array<i64: 1, 128>}, {pipeline_mode = #tpu.pipeline_mode<synchronous>, transform_indices = @transform_18, window_bounds = array<i64: 1, 128>}, {transform_indices = @transform_19, window_bounds = array<i64: 4, 8, 128>}, {transform_indices = @transform_20, window_bounds = array<i64: 32, 16>}]} {
    %c0 = arith.constant 0 : index
    %c0_0 = arith.constant 0 : index
    %c0_1 = arith.constant 0 : index
    %0 = vector.load %arg1[%c0, %c0_0, %c0_1] : memref<4x8x128xf32, #tpu.memory_space<vmem>>, vector<4x8x128xf32>
    %1 = vector.shape_cast %0 : vector<4x8x128xf32> to vector<32x128xf32>
    %c0_2 = arith.constant 0 : index
    %c0_3 = arith.constant 0 : index
    %c0_4 = arith.constant 0 : index
    %2 = vector.load %arg2[%c0_2, %c0_3, %c0_4] : memref<4x16x128xf32, #tpu.memory_space<vmem>>, vector<4x16x128xf32>
    %3 = vector.shape_cast %2 : vector<4x16x128xf32> to vector<64x128xf32>
    %c0_5 = arith.constant 0 : index
    %c0_6 = arith.constant 0 : index
    %c0_7 = arith.constant 0 : index
    %4 = vector.load %arg3[%c0_5, %c0_6, %c0_7] : memref<4x16x128xf32, #tpu.memory_space<vmem>>, vector<4x16x128xf32>
    %5 = vector.shape_cast %4 : vector<4x16x128xf32> to vector<64x128xf32>
    %6 = arith.truncf %1 : vector<32x128xf32> to vector<32x128xbf16>
    %c0_8 = arith.constant 0 : index
    %c0_9 = arith.constant 0 : index
    %7 = vector.load %arg4[%c0_8, %c0_9] : memref<128x128xbf16, #tpu.memory_space<vmem>>, vector<128x128xbf16>
    %cst = arith.constant dense<0.000000e+00> : vector<32x128xf32>
    %8 = tpu.matmul %6, %7, %cst {dimension_numbers = #tpu.dot_dimension_numbers<[1], [0], [0], [1], [0, 0, 1, 1], [], []>} : vector<32x128xbf16>, vector<128x128xbf16>, vector<32x128xf32> -> vector<32x128xf32>
    %c0_10 = arith.constant 0 : index
    %c0_11 = arith.constant 0 : index
    %9 = vector.load %arg7[%c0_10, %c0_11] : memref<1x128xf32, #tpu.memory_space<vmem>>, vector<1x128xf32>
    %10 = vector.broadcast %9 : vector<1x128xf32> to vector<32x128xf32>
    %11 = arith.addf %8, %10 : vector<32x128xf32>
    %12 = arith.truncf %3 : vector<64x128xf32> to vector<64x128xbf16>
    %c0_12 = arith.constant 0 : index
    %c0_13 = arith.constant 0 : index
    %13 = vector.load %arg5[%c0_12, %c0_13] : memref<128x128xbf16, #tpu.memory_space<vmem>>, vector<128x128xbf16>
    %cst_14 = arith.constant dense<0.000000e+00> : vector<64x128xf32>
    %14 = tpu.matmul %12, %13, %cst_14 {dimension_numbers = #tpu.dot_dimension_numbers<[1], [0], [0], [1], [0, 0, 1, 1], [], []>} : vector<64x128xbf16>, vector<128x128xbf16>, vector<64x128xf32> -> vector<64x128xf32>
    %c0_15 = arith.constant 0 : index
    %c0_16 = arith.constant 0 : index
    %15 = vector.load %arg8[%c0_15, %c0_16] : memref<1x128xf32, #tpu.memory_space<vmem>>, vector<1x128xf32>
    %16 = vector.broadcast %15 : vector<1x128xf32> to vector<64x128xf32>
    %17 = arith.addf %14, %16 : vector<64x128xf32>
    %18 = arith.truncf %5 : vector<64x128xf32> to vector<64x128xbf16>
    %c0_17 = arith.constant 0 : index
    %c0_18 = arith.constant 0 : index
    %19 = vector.load %arg6[%c0_17, %c0_18] : memref<128x128xbf16, #tpu.memory_space<vmem>>, vector<128x128xbf16>
    %cst_19 = arith.constant dense<0.000000e+00> : vector<64x128xf32>
    %20 = tpu.matmul %18, %19, %cst_19 {dimension_numbers = #tpu.dot_dimension_numbers<[1], [0], [0], [1], [0, 0, 1, 1], [], []>} : vector<64x128xbf16>, vector<128x128xbf16>, vector<64x128xf32> -> vector<64x128xf32>
    %c0_20 = arith.constant 0 : index
    %c0_21 = arith.constant 0 : index
    %21 = vector.load %arg9[%c0_20, %c0_21] : memref<1x128xf32, #tpu.memory_space<vmem>>, vector<1x128xf32>
    %22 = vector.broadcast %21 : vector<1x128xf32> to vector<64x128xf32>
    %23 = arith.addf %20, %22 : vector<64x128xf32>
    %24 = vector.extract_strided_slice %11 {offsets = [0, 0], sizes = [32, 32], strides = [1, 1]} : vector<32x128xf32> to vector<32x32xf32>
    %25 = vector.shape_cast %24 : vector<32x32xf32> to vector<4x8x32xf32>
    %26 = vector.extract_strided_slice %17 {offsets = [0, 0], sizes = [64, 32], strides = [1, 1]} : vector<64x128xf32> to vector<64x32xf32>
    %27 = vector.shape_cast %26 : vector<64x32xf32> to vector<4x16x32xf32>
    %28 = vector.extract_strided_slice %23 {offsets = [0, 0], sizes = [64, 32], strides = [1, 1]} : vector<64x128xf32> to vector<64x32xf32>
    %29 = vector.shape_cast %28 : vector<64x32xf32> to vector<4x16x32xf32>
    "tpu.trace_start"() <{level = 10 : i32, message = "bqd,bkd->bqk"}> : () -> ()
    %cst_22 = arith.constant dense<0.000000e+00> : vector<4x8x16xf32>
    %30 = tpu.matmul %25, %27, %cst_22 {dimension_numbers = #tpu.dot_dimension_numbers<[2], [2], [1], [1], [0, 0, 0, 1, 1, 1], [0], [0]>} : vector<4x8x32xf32>, vector<4x16x32xf32>, vector<4x8x16xf32> -> vector<4x8x16xf32>
    "tpu.trace_stop"() : () -> ()
    %cst_23 = arith.constant dense<0xFF800000> : vector<4x8xf32>
    %31 = vector.multi_reduction <maximumf>, %30, %cst_23 [2] : vector<4x8x16xf32> to vector<4x8xf32>
    %32 = vector.shape_cast %31 : vector<4x8xf32> to vector<4x8x1xf32>
    %33 = vector.broadcast %32 : vector<4x8x1xf32> to vector<4x8x16xf32>
    %34 = arith.subf %30, %33 : vector<4x8x16xf32>
    %35 = math.exp %34 : vector<4x8x16xf32>
    %cst_24 = arith.constant dense<0.000000e+00> : vector<4x8xf32>
    %36 = vector.multi_reduction <add>, %35, %cst_24 [2] : vector<4x8x16xf32> to vector<4x8xf32>
    %37 = vector.shape_cast %36 : vector<4x8xf32> to vector<4x8x1xf32>
    %38 = tpu.reciprocal %37 {approx = true} : vector<4x8x1xf32> -> vector<4x8x1xf32>
    %39 = vector.broadcast %38 : vector<4x8x1xf32> to vector<4x8x16xf32>
    %40 = arith.mulf %35, %39 : vector<4x8x16xf32>
    "tpu.trace_start"() <{level = 10 : i32, message = "bqk,bkd->bqd"}> : () -> ()
    %cst_25 = arith.constant dense<0.000000e+00> : vector<4x8x32xf32>
    %41 = tpu.matmul %40, %29, %cst_25 {dimension_numbers = #tpu.dot_dimension_numbers<[2], [1], [1], [2], [0, 0, 0, 1, 1, 2], [0], [0]>} : vector<4x8x16xf32>, vector<4x16x32xf32>, vector<4x8x32xf32> -> vector<4x8x32xf32>
    "tpu.trace_stop"() : () -> ()
    %42 = vector.extract_strided_slice %11 {offsets = [0, 32], sizes = [32, 32], strides = [1, 1]} : vector<32x128xf32> to vector<32x32xf32>
    %43 = vector.shape_cast %42 : vector<32x32xf32> to vector<4x8x32xf32>
    %44 = vector.extract_strided_slice %17 {offsets = [0, 32], sizes = [64, 32], strides = [1, 1]} : vector<64x128xf32> to vector<64x32xf32>
    %45 = vector.shape_cast %44 : vector<64x32xf32> to vector<4x16x32xf32>
    %46 = vector.extract_strided_slice %23 {offsets = [0, 32], sizes = [64, 32], strides = [1, 1]} : vector<64x128xf32> to vector<64x32xf32>
    %47 = vector.shape_cast %46 : vector<64x32xf32> to vector<4x16x32xf32>
    "tpu.trace_start"() <{level = 10 : i32, message = "bqd,bkd->bqk"}> : () -> ()
    %cst_26 = arith.constant dense<0.000000e+00> : vector<4x8x16xf32>
    %48 = tpu.matmul %43, %45, %cst_26 {dimension_numbers = #tpu.dot_dimension_numbers<[2], [2], [1], [1], [0, 0, 0, 1, 1, 1], [0], [0]>} : vector<4x8x32xf32>, vector<4x16x32xf32>, vector<4x8x16xf32> -> vector<4x8x16xf32>
    "tpu.trace_stop"() : () -> ()
    %cst_27 = arith.constant dense<0xFF800000> : vector<4x8xf32>
    %49 = vector.multi_reduction <maximumf>, %48, %cst_27 [2] : vector<4x8x16xf32> to vector<4x8xf32>
    %50 = vector.shape_cast %49 : vector<4x8xf32> to vector<4x8x1xf32>
    %51 = vector.broadcast %50 : vector<4x8x1xf32> to vector<4x8x16xf32>
    %52 = arith.subf %48, %51 : vector<4x8x16xf32>
    %53 = math.exp %52 : vector<4x8x16xf32>
    %cst_28 = arith.constant dense<0.000000e+00> : vector<4x8xf32>
    %54 = vector.multi_reduction <add>, %53, %cst_28 [2] : vector<4x8x16xf32> to vector<4x8xf32>
    %55 = vector.shape_cast %54 : vector<4x8xf32> to vector<4x8x1xf32>
    %56 = tpu.reciprocal %55 {approx = true} : vector<4x8x1xf32> -> vector<4x8x1xf32>
    %57 = vector.broadcast %56 : vector<4x8x1xf32> to vector<4x8x16xf32>
    %58 = arith.mulf %53, %57 : vector<4x8x16xf32>
    %59 = arith.addf %40, %58 : vector<4x8x16xf32>
    "tpu.trace_start"() <{level = 10 : i32, message = "bqk,bkd->bqd"}> : () -> ()
    %cst_29 = arith.constant dense<0.000000e+00> : vector<4x8x32xf32>
    %60 = tpu.matmul %58, %47, %cst_29 {dimension_numbers = #tpu.dot_dimension_numbers<[2], [1], [1], [2], [0, 0, 0, 1, 1, 2], [0], [0]>} : vector<4x8x16xf32>, vector<4x16x32xf32>, vector<4x8x32xf32> -> vector<4x8x32xf32>
    "tpu.trace_stop"() : () -> ()
    %61 = vector.extract_strided_slice %11 {offsets = [0, 64], sizes = [32, 32], strides = [1, 1]} : vector<32x128xf32> to vector<32x32xf32>
    %62 = vector.shape_cast %61 : vector<32x32xf32> to vector<4x8x32xf32>
    %63 = vector.extract_strided_slice %17 {offsets = [0, 64], sizes = [64, 32], strides = [1, 1]} : vector<64x128xf32> to vector<64x32xf32>
    %64 = vector.shape_cast %63 : vector<64x32xf32> to vector<4x16x32xf32>
    %65 = vector.extract_strided_slice %23 {offsets = [0, 64], sizes = [64, 32], strides = [1, 1]} : vector<64x128xf32> to vector<64x32xf32>
    %66 = vector.shape_cast %65 : vector<64x32xf32> to vector<4x16x32xf32>
    "tpu.trace_start"() <{level = 10 : i32, message = "bqd,bkd->bqk"}> : () -> ()
    %cst_30 = arith.constant dense<0.000000e+00> : vector<4x8x16xf32>
    %67 = tpu.matmul %62, %64, %cst_30 {dimension_numbers = #tpu.dot_dimension_numbers<[2], [2], [1], [1], [0, 0, 0, 1, 1, 1], [0], [0]>} : vector<4x8x32xf32>, vector<4x16x32xf32>, vector<4x8x16xf32> -> vector<4x8x16xf32>
    "tpu.trace_stop"() : () -> ()
    %cst_31 = arith.constant dense<0xFF800000> : vector<4x8xf32>
    %68 = vector.multi_reduction <maximumf>, %67, %cst_31 [2] : vector<4x8x16xf32> to vector<4x8xf32>
    %69 = vector.shape_cast %68 : vector<4x8xf32> to vector<4x8x1xf32>
    %70 = vector.broadcast %69 : vector<4x8x1xf32> to vector<4x8x16xf32>
    %71 = arith.subf %67, %70 : vector<4x8x16xf32>
    %72 = math.exp %71 : vector<4x8x16xf32>
    %cst_32 = arith.constant dense<0.000000e+00> : vector<4x8xf32>
    %73 = vector.multi_reduction <add>, %72, %cst_32 [2] : vector<4x8x16xf32> to vector<4x8xf32>
    %74 = vector.shape_cast %73 : vector<4x8xf32> to vector<4x8x1xf32>
    %75 = tpu.reciprocal %74 {approx = true} : vector<4x8x1xf32> -> vector<4x8x1xf32>
    %76 = vector.broadcast %75 : vector<4x8x1xf32> to vector<4x8x16xf32>
    %77 = arith.mulf %72, %76 : vector<4x8x16xf32>
    %78 = arith.addf %59, %77 : vector<4x8x16xf32>
    "tpu.trace_start"() <{level = 10 : i32, message = "bqk,bkd->bqd"}> : () -> ()
    %cst_33 = arith.constant dense<0.000000e+00> : vector<4x8x32xf32>
    %79 = tpu.matmul %77, %66, %cst_33 {dimension_numbers = #tpu.dot_dimension_numbers<[2], [1], [1], [2], [0, 0, 0, 1, 1, 2], [0], [0]>} : vector<4x8x16xf32>, vector<4x16x32xf32>, vector<4x8x32xf32> -> vector<4x8x32xf32>
    "tpu.trace_stop"() : () -> ()
    %80 = vector.extract_strided_slice %11 {offsets = [0, 96], sizes = [32, 32], strides = [1, 1]} : vector<32x128xf32> to vector<32x32xf32>
    %81 = vector.shape_cast %80 : vector<32x32xf32> to vector<4x8x32xf32>
    %82 = vector.extract_strided_slice %17 {offsets = [0, 96], sizes = [64, 32], strides = [1, 1]} : vector<64x128xf32> to vector<64x32xf32>
    %83 = vector.shape_cast %82 : vector<64x32xf32> to vector<4x16x32xf32>
    %84 = vector.extract_strided_slice %23 {offsets = [0, 96], sizes = [64, 32], strides = [1, 1]} : vector<64x128xf32> to vector<64x32xf32>
    %85 = vector.shape_cast %84 : vector<64x32xf32> to vector<4x16x32xf32>
    "tpu.trace_start"() <{level = 10 : i32, message = "bqd,bkd->bqk"}> : () -> ()
    %cst_34 = arith.constant dense<0.000000e+00> : vector<4x8x16xf32>
    %86 = tpu.matmul %81, %83, %cst_34 {dimension_numbers = #tpu.dot_dimension_numbers<[2], [2], [1], [1], [0, 0, 0, 1, 1, 1], [0], [0]>} : vector<4x8x32xf32>, vector<4x16x32xf32>, vector<4x8x16xf32> -> vector<4x8x16xf32>
    "tpu.trace_stop"() : () -> ()
    %cst_35 = arith.constant dense<0xFF800000> : vector<4x8xf32>
    %87 = vector.multi_reduction <maximumf>, %86, %cst_35 [2] : vector<4x8x16xf32> to vector<4x8xf32>
    %88 = vector.shape_cast %87 : vector<4x8xf32> to vector<4x8x1xf32>
    %89 = vector.broadcast %88 : vector<4x8x1xf32> to vector<4x8x16xf32>
    %90 = arith.subf %86, %89 : vector<4x8x16xf32>
    %91 = math.exp %90 : vector<4x8x16xf32>
    %cst_36 = arith.constant dense<0.000000e+00> : vector<4x8xf32>
    %92 = vector.multi_reduction <add>, %91, %cst_36 [2] : vector<4x8x16xf32> to vector<4x8xf32>
    %93 = vector.shape_cast %92 : vector<4x8xf32> to vector<4x8x1xf32>
    %94 = tpu.reciprocal %93 {approx = true} : vector<4x8x1xf32> -> vector<4x8x1xf32>
    %95 = vector.broadcast %94 : vector<4x8x1xf32> to vector<4x8x16xf32>
    %96 = arith.mulf %91, %95 : vector<4x8x16xf32>
    %97 = arith.addf %78, %96 : vector<4x8x16xf32>
    "tpu.trace_start"() <{level = 10 : i32, message = "bqk,bkd->bqd"}> : () -> ()
    %cst_37 = arith.constant dense<0.000000e+00> : vector<4x8x32xf32>
    %98 = tpu.matmul %96, %85, %cst_37 {dimension_numbers = #tpu.dot_dimension_numbers<[2], [1], [1], [2], [0, 0, 0, 1, 1, 2], [0], [0]>} : vector<4x8x16xf32>, vector<4x16x32xf32>, vector<4x8x32xf32> -> vector<4x8x32xf32>
    "tpu.trace_stop"() : () -> ()
    %cst_38 = arith.constant 2.500000e-01 : f32
    %99 = vector.broadcast %cst_38 : f32 to vector<4x8x16xf32>
    %100 = arith.mulf %97, %99 : vector<4x8x16xf32>
    %101 = vector.shape_cast %100 : vector<4x8x16xf32> to vector<32x16xf32>
    %c0_39 = arith.constant 0 : index
    %c0_40 = arith.constant 0 : index
    %102 = vector.load %arg21[%c0_39, %c0_40] : memref<32x16xf32, #tpu.memory_space<vmem>>, vector<32x16xf32>
    tpu.vector_store %arg21[%c0_39, %c0_40], %101 {strides = array<i32>} : memref<32x16xf32, #tpu.memory_space<vmem>>, vector<32x16xf32>,
    %103 = tpu.concatenate %41, %60, %79, %98 in 2 : vector<4x8x32xf32>, vector<4x8x32xf32>, vector<4x8x32xf32>, vector<4x8x32xf32> -> vector<4x8x128xf32>
    %104 = vector.shape_cast %103 : vector<4x8x128xf32> to vector<32x128xf32>
    %105 = arith.truncf %104 : vector<32x128xf32> to vector<32x128xbf16>
    %c0_41 = arith.constant 0 : index
    %c0_42 = arith.constant 0 : index
    %106 = vector.load %arg10[%c0_41, %c0_42] : memref<128x128xbf16, #tpu.memory_space<vmem>>, vector<128x128xbf16>
    %cst_43 = arith.constant dense<0.000000e+00> : vector<32x128xf32>
    %107 = tpu.matmul %105, %106, %cst_43 {dimension_numbers = #tpu.dot_dimension_numbers<[1], [0], [0], [1], [0, 0, 1, 1], [], []>} : vector<32x128xbf16>, vector<128x128xbf16>, vector<32x128xf32> -> vector<32x128xf32>
    %c0_44 = arith.constant 0 : index
    %c0_45 = arith.constant 0 : index
    %108 = vector.load %arg11[%c0_44, %c0_45] : memref<1x128xf32, #tpu.memory_space<vmem>>, vector<1x128xf32>
    %109 = vector.broadcast %108 : vector<1x128xf32> to vector<32x128xf32>
    %110 = arith.addf %107, %109 : vector<32x128xf32>
    %111 = arith.addf %1, %110 : vector<32x128xf32>
    %c0_46 = arith.constant 0 : index
    %c0_47 = arith.constant 0 : index
    %112 = vector.load %arg12[%c0_46, %c0_47] : memref<1x128xf32, #tpu.memory_space<vmem>>, vector<1x128xf32>
    %c0_48 = arith.constant 0 : index
    %c0_49 = arith.constant 0 : index
    %113 = vector.load %arg13[%c0_48, %c0_49] : memref<1x128xf32, #tpu.memory_space<vmem>>, vector<1x128xf32>
    %cst_50 = arith.constant dense<0.000000e+00> : vector<32xf32>
    %114 = vector.multi_reduction <add>, %111, %cst_50 [1] : vector<32x128xf32> to vector<32xf32>
    %115 = vector.shape_cast %114 : vector<32xf32> to vector<32x1xf32>
    %cst_51 = arith.constant 1.280000e+02 : f32
    %116 = vector.broadcast %cst_51 : f32 to vector<32x1xf32>
    %117 = arith.divf %115, %116 : vector<32x1xf32>
    %118 = vector.broadcast %117 : vector<32x1xf32> to vector<32x128xf32>
    %119 = arith.subf %111, %118 : vector<32x128xf32>
    %120 = vector.broadcast %117 : vector<32x1xf32> to vector<32x128xf32>
    %121 = arith.subf %111, %120 : vector<32x128xf32>
    %122 = arith.mulf %119, %121 : vector<32x128xf32>
    %cst_52 = arith.constant dense<0.000000e+00> : vector<32xf32>
    %123 = vector.multi_reduction <add>, %122, %cst_52 [1] : vector<32x128xf32> to vector<32xf32>
    %124 = vector.shape_cast %123 : vector<32xf32> to vector<32x1xf32>
    %cst_53 = arith.constant 1.280000e+02 : f32
    %125 = vector.broadcast %cst_53 : f32 to vector<32x1xf32>
    %126 = arith.divf %124, %125 : vector<32x1xf32>
    %127 = vector.broadcast %117 : vector<32x1xf32> to vector<32x128xf32>
    %128 = arith.subf %111, %127 : vector<32x128xf32>
    %cst_54 = arith.constant 9.99999974E-6 : f32
    %129 = vector.broadcast %cst_54 : f32 to vector<32x1xf32>
    %130 = arith.addf %126, %129 : vector<32x1xf32>
    %131 = math.rsqrt %130 : vector<32x1xf32>
    %132 = vector.broadcast %131 : vector<32x1xf32> to vector<32x128xf32>
    %133 = arith.mulf %128, %132 : vector<32x128xf32>
    %134 = vector.broadcast %112 : vector<1x128xf32> to vector<32x128xf32>
    %135 = arith.mulf %133, %134 : vector<32x128xf32>
    %136 = vector.broadcast %113 : vector<1x128xf32> to vector<32x128xf32>
    %137 = arith.addf %135, %136 : vector<32x128xf32>
    %138 = arith.truncf %137 : vector<32x128xf32> to vector<32x128xbf16>
    %c0_55 = arith.constant 0 : index
    %c0_56 = arith.constant 0 : index
    %139 = vector.load %arg14[%c0_55, %c0_56] : memref<128x512xbf16, #tpu.memory_space<vmem>>, vector<128x512xbf16>
    %cst_57 = arith.constant dense<0.000000e+00> : vector<32x512xf32>
    %140 = tpu.matmul %138, %139, %cst_57 {dimension_numbers = #tpu.dot_dimension_numbers<[1], [0], [0], [1], [0, 0, 1, 1], [], []>} : vector<32x128xbf16>, vector<128x512xbf16>, vector<32x512xf32> -> vector<32x512xf32>
    %c0_58 = arith.constant 0 : index
    %c0_59 = arith.constant 0 : index
    %141 = vector.load %arg15[%c0_58, %c0_59] : memref<1x512xf32, #tpu.memory_space<vmem>>, vector<1x512xf32>
    %142 = vector.broadcast %141 : vector<1x512xf32> to vector<32x512xf32>
    %143 = arith.addf %140, %142 : vector<32x512xf32>
    %cst_60 = arith.constant 0.000000e+00 : f32
    %144 = vector.broadcast %cst_60 : f32 to vector<32x512xf32>
    %145 = arith.maximumf %143, %144 : vector<32x512xf32>
    %146 = arith.truncf %145 : vector<32x512xf32> to vector<32x512xbf16>
    %c0_61 = arith.constant 0 : index
    %c0_62 = arith.constant 0 : index
    %147 = vector.load %arg16[%c0_61, %c0_62] : memref<512x128xbf16, #tpu.memory_space<vmem>>, vector<512x128xbf16>
    %cst_63 = arith.constant dense<0.000000e+00> : vector<32x128xf32>
    %148 = tpu.matmul %146, %147, %cst_63 {dimension_numbers = #tpu.dot_dimension_numbers<[1], [0], [0], [1], [0, 0, 1, 1], [], []>} : vector<32x512xbf16>, vector<512x128xbf16>, vector<32x128xf32> -> vector<32x128xf32>
    %c0_64 = arith.constant 0 : index
    %c0_65 = arith.constant 0 : index
    %149 = vector.load %arg17[%c0_64, %c0_65] : memref<1x128xf32, #tpu.memory_space<vmem>>, vector<1x128xf32>
    %150 = vector.broadcast %149 : vector<1x128xf32> to vector<32x128xf32>
    %151 = arith.addf %148, %150 : vector<32x128xf32>
    %152 = arith.addf %137, %151 : vector<32x128xf32>
    %c0_66 = arith.constant 0 : index
    %c0_67 = arith.constant 0 : index
    %153 = vector.load %arg18[%c0_66, %c0_67] : memref<1x128xf32, #tpu.memory_space<vmem>>, vector<1x128xf32>
    %c0_68 = arith.constant 0 : index
    %c0_69 = arith.constant 0 : index
    %154 = vector.load %arg19[%c0_68, %c0_69] : memref<1x128xf32, #tpu.memory_space<vmem>>, vector<1x128xf32>
    %cst_70 = arith.constant dense<0.000000e+00> : vector<32xf32>
    %155 = vector.multi_reduction <add>, %152, %cst_70 [1] : vector<32x128xf32> to vector<32xf32>
    %156 = vector.shape_cast %155 : vector<32xf32> to vector<32x1xf32>
    %cst_71 = arith.constant 1.280000e+02 : f32
    %157 = vector.broadcast %cst_71 : f32 to vector<32x1xf32>
    %158 = arith.divf %156, %157 : vector<32x1xf32>
    %159 = vector.broadcast %158 : vector<32x1xf32> to vector<32x128xf32>
    %160 = arith.subf %152, %159 : vector<32x128xf32>
    %161 = vector.broadcast %158 : vector<32x1xf32> to vector<32x128xf32>
    %162 = arith.subf %152, %161 : vector<32x128xf32>
    %163 = arith.mulf %160, %162 : vector<32x128xf32>
    %cst_72 = arith.constant dense<0.000000e+00> : vector<32xf32>
    %164 = vector.multi_reduction <add>, %163, %cst_72 [1] : vector<32x128xf32> to vector<32xf32>
    %165 = vector.shape_cast %164 : vector<32xf32> to vector<32x1xf32>
    %cst_73 = arith.constant 1.280000e+02 : f32
    %166 = vector.broadcast %cst_73 : f32 to vector<32x1xf32>
    %167 = arith.divf %165, %166 : vector<32x1xf32>
    %168 = vector.broadcast %158 : vector<32x1xf32> to vector<32x128xf32>
    %169 = arith.subf %152, %168 : vector<32x128xf32>
    %cst_74 = arith.constant 9.99999974E-6 : f32
    %170 = vector.broadcast %cst_74 : f32 to vector<32x1xf32>
    %171 = arith.addf %167, %170 : vector<32x1xf32>
    %172 = math.rsqrt %171 : vector<32x1xf32>
    %173 = vector.broadcast %172 : vector<32x1xf32> to vector<32x128xf32>
    %174 = arith.mulf %169, %173 : vector<32x128xf32>
    %175 = vector.broadcast %153 : vector<1x128xf32> to vector<32x128xf32>
    %176 = arith.mulf %174, %175 : vector<32x128xf32>
    %177 = vector.broadcast %154 : vector<1x128xf32> to vector<32x128xf32>
    %178 = arith.addf %176, %177 : vector<32x128xf32>
    %179 = vector.shape_cast %178 : vector<32x128xf32> to vector<4x8x128xf32>
    %c0_75 = arith.constant 0 : index
    %c0_76 = arith.constant 0 : index
    %c0_77 = arith.constant 0 : index
    %180 = vector.load %arg20[%c0_75, %c0_76, %c0_77] : memref<4x8x128xf32, #tpu.memory_space<vmem>>, vector<4x8x128xf32>
    tpu.vector_store %arg20[%c0_75, %c0_76, %c0_77], %179 {strides = array<i32>} : memref<4x8x128xf32, #tpu.memory_space<vmem>>, vector<4x8x128xf32>,
    return
  }
  func.func @transform_0(%arg0: i32) -> (i32, i32, i32) {
    %c0_i32 = arith.constant 0 : i32
    %c0_i32_0 = arith.constant 0 : i32
    %c0_i32_1 = arith.constant 0 : i32
    return %arg0, %c0_i32, %c0_i32_0 : i32, i32, i32
  }
  func.func @transform_1(%arg0: i32) -> (i32, i32, i32) {
    %c0_i32 = arith.constant 0 : i32
    %c0_i32_0 = arith.constant 0 : i32
    %c0_i32_1 = arith.constant 0 : i32
    return %arg0, %c0_i32, %c0_i32_0 : i32, i32, i32
  }
  func.func @transform_2(%arg0: i32) -> (i32, i32, i32) {
    %c0_i32 = arith.constant 0 : i32
    %c0_i32_0 = arith.constant 0 : i32
    %c0_i32_1 = arith.constant 0 : i32
    return %arg0, %c0_i32, %c0_i32_0 : i32, i32, i32
  }
  func.func @transform_3(%arg0: i32) -> (i32, i32) {
    %c0_i32 = arith.constant 0 : i32
    %c0_i32_0 = arith.constant 0 : i32
    %c0_i32_1 = arith.constant 0 : i32
    return %c0_i32, %c0_i32_0 : i32, i32
  }
  func.func @transform_4(%arg0: i32) -> (i32, i32) {
    %c0_i32 = arith.constant 0 : i32
    %c0_i32_0 = arith.constant 0 : i32
    %c0_i32_1 = arith.constant 0 : i32
    return %c0_i32, %c0_i32_0 : i32, i32
  }
  func.func @transform_5(%arg0: i32) -> (i32, i32) {
    %c0_i32 = arith.constant 0 : i32
    %c0_i32_0 = arith.constant 0 : i32
    %c0_i32_1 = arith.constant 0 : i32
    return %c0_i32, %c0_i32_0 : i32, i32
  }
  func.func @transform_6(%arg0: i32) -> (i32, i32) {
    %c0_i32 = arith.constant 0 : i32
    %c0_i32_0 = arith.constant 0 : i32
    %c0_i32_1 = arith.constant 0 : i32
    return %c0_i32, %c0_i32_0 : i32, i32
  }
  func.func @transform_7(%arg0: i32) -> (i32, i32) {
    %c0_i32 = arith.constant 0 : i32
    %c0_i32_0 = arith.constant 0 : i32
    %c0_i32_1 = arith.constant 0 : i32
    return %c0_i32, %c0_i32_0 : i32, i32
  }
  func.func @transform_8(%arg0: i32) -> (i32, i32) {
    %c0_i32 = arith.constant 0 : i32
    %c0_i32_0 = arith.constant 0 : i32
    %c0_i32_1 = arith.constant 0 : i32
    return %c0_i32, %c0_i32_0 : i32, i32
  }
  func.func @transform_9(%arg0: i32) -> (i32, i32) {
    %c0_i32 = arith.constant 0 : i32
    %c0_i32_0 = arith.constant 0 : i32
    %c0_i32_1 = arith.constant 0 : i32
    return %c0_i32, %c0_i32_0 : i32, i32
  }
  func.func @transform_10(%arg0: i32) -> (i32, i32) {
    %c0_i32 = arith.constant 0 : i32
    %c0_i32_0 = arith.constant 0 : i32
    %c0_i32_1 = arith.constant 0 : i32
    return %c0_i32, %c0_i32_0 : i32, i32
  }
  func.func @transform_11(%arg0: i32) -> (i32, i32) {
    %c0_i32 = arith.constant 0 : i32
    %c0_i32_0 = arith.constant 0 : i32
    %c0_i32_1 = arith.constant 0 : i32
    return %c0_i32, %c0_i32_0 : i32, i32
  }
  func.func @transform_12(%arg0: i32) -> (i32, i32) {
    %c0_i32 = arith.constant 0 : i32
    %c0_i32_0 = arith.constant 0 : i32
    %c0_i32_1 = arith.constant 0 : i32
    return %c0_i32, %c0_i32_0 : i32, i32
  }
  func.func @transform_13(%arg0: i32) -> (i32, i32) {
    %c0_i32 = arith.constant 0 : i32
    %c0_i32_0 = arith.constant 0 : i32
    %c0_i32_1 = arith.constant 0 : i32
    return %c0_i32, %c0_i32_0 : i32, i32
  }
  func.func @transform_14(%arg0: i32) -> (i32, i32) {
    %c0_i32 = arith.constant 0 : i32
    %c0_i32_0 = arith.constant 0 : i32
    %c0_i32_1 = arith.constant 0 : i32
    return %c0_i32, %c0_i32_0 : i32, i32
  }
  func.func @transform_15(%arg0: i32) -> (i32, i32) {
    %c0_i32 = arith.constant 0 : i32
    %c0_i32_0 = arith.constant 0 : i32
    %c0_i32_1 = arith.constant 0 : i32
    return %c0_i32, %c0_i32_0 : i32, i32
  }
  func.func @transform_16(%arg0: i32) -> (i32, i32) {
    %c0_i32 = arith.constant 0 : i32
    %c0_i32_0 = arith.constant 0 : i32
    %c0_i32_1 = arith.constant 0 : i32
    return %c0_i32, %c0_i32_0 : i32, i32
  }
  func.func @transform_17(%arg0: i32) -> (i32, i32) {
    %c0_i32 = arith.constant 0 : i32
    %c0_i32_0 = arith.constant 0 : i32
    %c0_i32_1 = arith.constant 0 : i32
    return %c0_i32, %c0_i32_0 : i32, i32
  }
  func.func @transform_18(%arg0: i32) -> (i32, i32) {
    %c0_i32 = arith.constant 0 : i32
    %c0_i32_0 = arith.constant 0 : i32
    %c0_i32_1 = arith.constant 0 : i32
    return %c0_i32, %c0_i32_0 : i32, i32
  }
  func.func @transform_19(%arg0: i32) -> (i32, i32, i32) {
    %c0_i32 = arith.constant 0 : i32
    %c0_i32_0 = arith.constant 0 : i32
    %c0_i32_1 = arith.constant 0 : i32
    return %arg0, %c0_i32, %c0_i32_0 : i32, i32, i32
  }
  func.func @transform_20(%arg0: i32) -> (i32, i32) {
    %c0_i32 = arith.constant 0 : i32
    %c0_i32_0 = arith.constant 0 : i32
    return %arg0, %c0_i32 : i32, i32
  }
}

</mosaic_0001>

<bundles_post_ra>
// kernel: tpu_custom_call.1
= control target key start
LH: loop header
LB: loop body
LE: loop exit
PB: predicated region body
PF: predicated region fallthrough
CT: control target
= control target key end

     0   :  { %s6340_s0 = inlined_call_operand.hbm [shape: f32[4,8,128], index: 0, kind: input, shape index: {}]   ;;  %s6341_s1 = inlined_call_operand.hbm [shape: f32[4,16,128], index: 1, kind: input, shape index: {}]   ;;  %s6342_s2 = inlined_call_operand.hbm [shape: f32[4,16,128], index: 2, kind: input, shape index: {}]   ;;  %s6343_s3 = inlined_call_operand.hbm [shape: bf16[128,128], index: 3, kind: input, shape index: {}]   ;;  %s6344_s4 = inlined_call_operand.hbm [shape: bf16[128,128], index: 4, kind: input, shape index: {}]   ;;  %s6345_s5 = inlined_call_operand.hbm [shape: bf16[128,128], index: 5, kind: input, shape index: {}]   ;;  %s6346_s6 = inlined_call_operand.vmem [shape: f32[1,128], index: 6, kind: input, shape index: {}]   ;;  %s6347_s7 = inlined_call_operand.vmem [shape: f32[1,128], index: 7, kind: input, shape index: {}]   ;;  %s6348_s8 = inlined_call_operand.vmem [shape: f32[1,128], index: 8, kind: input, shape index: {}]   ;;  %s6349_s9 = inlined_call_operand.hbm [shape: bf16[128,128], index: 9, kind: input, shape index: {}]   ;;  %s6350_s10 = inlined_call_operand.vmem [shape: f32[1,128], index: 10, kind: input, shape index: {}]   ;;  %s6351_s11 = inlined_call_operand.vmem [shape: f32[1,128], index: 11, kind: input, shape index: {}]   ;;  %s6352_s12 = inlined_call_operand.vmem [shape: f32[1,128], index: 12, kind: input, shape index: {}]   ;;  %s6353_s13 = inlined_call_operand.hbm [shape: bf16[128,512], index: 13, kind: input, shape index: {}]   ;;  %s6354_s14 = inlined_call_operand.vmem [shape: f32[1,512], index: 14, kind: input, shape index: {}]   ;;  %s6355_s15 = inlined_call_operand.hbm [shape: bf16[512,128], index: 15, kind: input, shape index: {}]   ;;  %s6356_s16 = inlined_call_operand.vmem [shape: f32[1,128], index: 16, kind: input, shape index: {}]   ;;  %s6357_s17 = inlined_call_operand.vmem [shape: f32[1,128], index: 17, kind: input, shape index: {}]   ;;  %s6358_s18 = inlined_call_operand.vmem [shape: f32[1,128], index: 18, kind: input, shape index: {}]   ;;  %s6359_s19 = inlined_call_operand.hbm [shape: f32[4,8,128], index: 19, kind: output, shape index: {0}]   ;;  %s6360_s20 = inlined_call_operand.vmem [shape: f32[32,16], index: 20, kind: output, shape index: {1}]  }
   0x1   :  { %6365 = sst [smem:[#allocation24_spill]] %s6340_s0 }
   0x2   :  { %6366 = sst [smem:[#allocation25_spill]] %s6341_s1 }
   0x3   :  { %6367 = sst [smem:[#allocation26_spill]] %s6342_s2 }
   0x4   :  { %6368 = sst [smem:[#allocation27_spill]] %s6343_s3 }
   0x5   :  { %6369 = sst [smem:[#allocation28_spill]] %s6344_s4 }
   0x6   :  { %26 = vsyncpa [#allocation3], 0 }
   0x7   :  { %27 = vsyncpa [#allocation6], 0 }
   0x8   :  { %28 = vsyncpa [#allocation9], 0 }
   0x9   :  { %29 = vsyncpa [#allocation12], 0 }
   0xa   :  { %30 = vsyncpa [#allocation15], 0 }
   0xb   :  { %31 = vsyncpa [#allocation4], 0  ;;  %s5553_s1 = smov [#allocation5]   ;;  %s5554_s23 = smov [#allocation8]  }
   0xc   :  { %s49_s22 = sshll.u32 %s5553_s1, 4  ;;  %s73_s24 = sshll.u32 %s5554_s23, 4  ;;  %s50_s22 = int_to_ptr.vmem [resolvable:$true] %s49_s22  ;;  %s74_s24 = int_to_ptr.vmem [resolvable:$true] %s73_s24 }
   0xd   :  { %s5349_s2 = scalar_lea.vmem %s50_s22, 1024  ;;  %p5354_p1 = scmp.lt.s32.totalorder %s50_s22, %s50_s22 }
   0xe   :  { %p5350_p0 = scmp.ne.s32.totalorder %s50_s22, %s5349_s2  ;;  %p5355_p2 = scmp.lt.s32.totalorder %s5349_s2, %s5349_s2 }
  0x10   :  { %p5356_p3 = por %p5355_p2, %p5354_p1 }
  0x12   :  { %p5357_p4 = pnand %p5356_p3, %p5350_p0 }
  0x14   :  { %5360 = shalt.err (!%p5357_p4)
}
  0x15   :  { %s6361_s25 = smov 128   ;;  %s6363_s3 = smov 8  }
  0x16   :  { %s6370_s28 = sld [smem:[#allocation25_spill]]  ;;  %s5369_s4 = scalar_lea.vmem %s74_s24, 1024 }
  0x17   :  { %p5370_p5 = scmp.ne.s32.totalorder %s74_s24, %s5369_s4  ;;  %p5374_p6 = scmp.lt.s32.totalorder %s74_s24, %s74_s24 }
  0x18   :  { %p5375_p7 = scmp.lt.s32.totalorder %s5369_s4, %s5369_s4 }
  0x1a   :  { %p5376_p8 = por %p5375_p7, %p5374_p6 }
  0x1c   :  { %55 = dma.hbm_to_vmem [thread:$0]  %s6370_s28, 1024, %s50_s22, [#allocation6], %s6361_s25, %s6361_s25, %s6363_s3  }
  0x1d   :  { %p5377_p9 = pnand %p5376_p8, %p5370_p5 }
  0x1f   :  { %5380 = shalt.err (!%p5377_p9)
}
  0x20   :  { %s5557_s29 = smov 64   ;;  %s5558_s30 = smov 4  }
  0x21   :  { %s6371_s1 = sld [smem:[#allocation27_spill]]  ;;  %s5559_s23 = smov [#allocation11]  }
  0x22   :  { %s97_s2 = sshll.u32 %s5559_s23, 4  ;;  %s5560_s26 = smov [#allocation14]   ;;  %s98_s2 = int_to_ptr.vmem [resolvable:$true] %s97_s2 }
  0x23   :  { %s133_s22 = sshll.u32 %s5560_s26, 4  ;;  %s5389_s27 = scalar_lea.vmem %s98_s2, 1024  ;;  %s134_s22 = int_to_ptr.vmem [resolvable:$true] %s133_s22 }
  0x24   :  { %p5390_p10 = scmp.ne.s32.totalorder %s98_s2, %s5389_s27  ;;  %p5394_p11 = scmp.lt.s32.totalorder %s98_s2, %s98_s2 }
  0x25   :  { %p5395_p12 = scmp.lt.s32.totalorder %s5389_s27, %s5389_s27 }
  0x27   :  { %79 = dma.hbm_to_vmem [thread:$0]  %s6371_s1, 1024, %s74_s24, [#allocation9], %s5557_s29, %s5557_s29, %s5558_s30  }
  0x28   :  { %p5396_p13 = por %p5395_p12, %p5394_p11 }
  0x2a   :  { %p5397_p0 = pnand %p5396_p13, %p5390_p10 }
  0x2c   :  { %5400 = shalt.err (!%p5397_p0)
}
  0x2d   :  { %103 = dma.hbm_to_vmem [thread:$0]  %s6345_s5, 1024, %s98_s2, [#allocation12], %s5557_s29, %s5557_s29, %s5558_s30  }
  0x2e   :  { %s5409_s24 = scalar_lea.vmem %s134_s22, 4096  ;;  %p5414_p2 = scmp.lt.s32.totalorder %s134_s22, %s134_s22 }
  0x2f   :  { %p5410_p1 = scmp.ne.s32.totalorder %s134_s22, %s5409_s24  ;;  %p5415_p3 = scmp.lt.s32.totalorder %s5409_s24, %s5409_s24 }
  0x31   :  { %p5416_p4 = por %p5415_p3, %p5414_p2 }
  0x33   :  { %p5417_p5 = pnand %p5416_p4, %p5410_p1 }
  0x35   :  { %5420 = shalt.err (!%p5417_p5)
}
  0x36   :  { %s5561_s0 = smov 256   ;;  %s5562_s21 = smov 16  }
  0x37   :  { %139 = dma.hbm_to_vmem [thread:$0]  %s6353_s13, 4096, %s134_s22, [#allocation15], %s5561_s0, %s5561_s0, %s5562_s21  }
  0x38   :  { %s5563_s26 = smov [#allocation2]   ;;  %s5564_s25 = smov [#allocation7]  }
  0x39   :  { %s37_s27 = sshll.u32 %s5563_s26, 4  ;;  %s61_s3 = sshll.u32 %s5564_s25, 4  ;;  %s38_s27 = int_to_ptr.vmem [resolvable:$true] %s37_s27  ;;  %s62_s3 = int_to_ptr.vmem [resolvable:$true] %s61_s3 }
  0x3a   :  { %s5429_s5 = scalar_lea.vmem %s38_s27, 512  ;;  %p5434_p7 = scmp.lt.s32.totalorder %s38_s27, %s38_s27 }
  0x3b   :  { %p5430_p6 = scmp.ne.s32.totalorder %s38_s27, %s5429_s5  ;;  %p5435_p8 = scmp.lt.s32.totalorder %s5429_s5, %s5429_s5 }
  0x3d   :  { %p5436_p9 = por %p5435_p8, %p5434_p7 }
  0x3f   :  { %p5437_p10 = pnand %p5436_p9, %p5430_p6 }
  0x41   :  { %5440 = shalt.err (!%p5437_p10)
}
  0x42   :  { %s6372_s2 = smov 8   ;;  %s6373_s28 = smov 128  }
  0x43   :  { %s6374_s1 = sld [smem:[#allocation24_spill]]  ;;  %s5449_s13 = scalar_lea.vmem %s62_s3, 1024 }
  0x44   :  { %p5450_p11 = scmp.ne.s32.totalorder %s62_s3, %s5449_s13  ;;  %p5454_p12 = scmp.lt.s32.totalorder %s62_s3, %s62_s3 }
  0x45   :  { %p5455_p13 = scmp.lt.s32.totalorder %s5449_s13, %s5449_s13 }
  0x47   :  { %p5456_p0 = por %p5455_p13, %p5454_p12 }
  0x49   :  { %43 = dma.hbm_to_vmem [thread:$0]  %s6374_s1, 512, %s38_s27, [#allocation3], %s6373_s28, %s6373_s28, %s6372_s2  }
  0x4a   :  { %p5457_p1 = pnand %p5456_p0, %p5450_p11 }
  0x4c   :  { %5460 = shalt.err (!%p5457_p1)
}
  0x4d   :  { %s6375_s0 = sld [smem:[#allocation26_spill]]  ;;  %s5565_s21 = smov [#allocation10]  }
  0x4e   :  { %s85_s23 = sshll.u32 %s5565_s21, 4  ;;  %s5566_s26 = smov [#allocation13]   ;;  %s86_s23 = int_to_ptr.vmem [resolvable:$true] %s85_s23 }
  0x4f   :  { %s115_s5 = sshll.u32 %s5566_s26, 4  ;;  %s5469_s27 = scalar_lea.vmem %s86_s23, 1024  ;;  %s116_s5 = int_to_ptr.vmem [resolvable:$true] %s115_s5 }
  0x50   :  { %p5470_p2 = scmp.ne.s32.totalorder %s86_s23, %s5469_s27  ;;  %p5474_p3 = scmp.lt.s32.totalorder %s86_s23, %s86_s23 }
  0x51   :  { %p5475_p4 = scmp.lt.s32.totalorder %s5469_s27, %s5469_s27 }
  0x53   :  { %67 = dma.hbm_to_vmem [thread:$0]  %s6375_s0, 1024, %s62_s3, [#allocation6], %s6373_s28, %s6373_s28, %s6372_s2  }
  0x54   :  { %p5476_p5 = por %p5475_p4, %p5474_p3 }
  0x56   :  { %p5477_p6 = pnand %p5476_p5, %p5470_p2 }
  0x58   :  { %5480 = shalt.err (!%p5477_p6)
}
  0x59   :  { %s6376_s1 = sld [smem:[#allocation28_spill]]  ;;  %s5489_s3 = scalar_lea.vmem %s116_s5, 1024 }
  0x5a   :  { %p5490_p7 = scmp.ne.s32.totalorder %s116_s5, %s5489_s3  ;;  %p5494_p8 = scmp.lt.s32.totalorder %s116_s5, %s116_s5 }
  0x5b   :  { %p5495_p9 = scmp.lt.s32.totalorder %s5489_s3, %s5489_s3 }
  0x5d   :  { %p5496_p10 = por %p5495_p9, %p5494_p8 }
  0x5f   :  { %91 = dma.hbm_to_vmem [thread:$0]  %s6376_s1, 1024, %s86_s23, [#allocation9], %s5557_s29, %s5557_s29, %s5558_s30  }
  0x60   :  { %p5497_p11 = pnand %p5496_p10, %p5490_p7 }
  0x62   :  { %5500 = shalt.err (!%p5497_p11)
}
  0x63   :  { %121 = dma.hbm_to_vmem [thread:$0]  %s6349_s9, 1024, %s116_s5, [#allocation12], %s5557_s29, %s5557_s29, %s5558_s30  }
  0x64   :  { %s5567_s22 = smov [#allocation16]  }
  0x65   :  { %s147_s0 = sshll.u32 %s5567_s22, 4  ;;  %s148_s0 = int_to_ptr.vmem [resolvable:$true] %s147_s0 }
  0x66   :  { %s5509_s21 = scalar_lea.vmem %s148_s0, 4096  ;;  %p5514_p13 = scmp.lt.s32.totalorder %s148_s0, %s148_s0 }
  0x67   :  { %p5510_p12 = scmp.ne.s32.totalorder %s148_s0, %s5509_s21  ;;  %p5515_p0 = scmp.lt.s32.totalorder %s5509_s21, %s5509_s21 }
  0x69   :  { %p5516_p1 = por %p5515_p0, %p5514_p13 }
  0x6b   :  { %p5517_p2 = pnand %p5516_p1, %p5510_p12 }
  0x6d   :  { %5520 = shalt.err (!%p5517_p2)
}
  0x6e   :  { %153 = dma.hbm_to_vmem [thread:$0]  %s6355_s15, 4096, %s148_s0, [#allocation15], %s5557_s29, %s5557_s29, %s5558_s30  }
  0x6f   :  { %5541 = dma.done.wait [#allocation3], 512  }
  0x70   :  { %5542 = vsyncadd [#allocation3], 4294966784 }
  0x71   :  { %5543 = dma.done.wait [#allocation6], 2048  }
  0x72   :  { %5544 = vsyncadd [#allocation6], 4294965248 }
  0x73   :  { %5545 = dma.done.wait [#allocation9], 2048  }
  0x74   :  { %5546 = vsyncadd [#allocation9], 4294965248 }
  0x75   :  { %5547 = dma.done.wait [#allocation12], 2048  }
  0x76   :  { %5548 = vsyncadd [#allocation12], 4294965248 }
  0x77   :  { %5549 = dma.done.wait [#allocation15], 8192  }
  0x78   :  { %5550 = vsyncadd [#allocation15], 4294959104  ;;  %v5145_v0 = vld [vmem:[#allocation10 + $0x38] sm:$0xff]   ;;  %v5146_v1 = vld [vmem:[#allocation10 + $0x30] sm:$0xff]   ;;  %v5568_v54 = vmov 0.0   ;;  %vm5569_vm0 = vmmov 0  }
  0x79   :  { %4802 = vmatprep.subr.bf16.mxu1 %v5145_v0  ;;  %v5148_v2 = vld [vmem:[#allocation8 + $0x38] sm:$0xff]   ;;  %v5147_v3 = vld [vmem:[#allocation10 + $0x28] sm:$0xff]   ;;  %v5150_v4 = vld [vmem:[#allocation8 + $0x30] sm:$0xff]   ;;  %vm610_vm1 = vcmask 261120   ;;  %s5570_s30 = smov 96   ;;  %vm927_vm2 = vcmask 130048  }
  0x7a   :  { %4803 = vmatpush3.bf16.msra.mxu1 %v5145_v0  ;;  %4782 = vmatprep.subr.bf16.mxu0 %v5148_v2  ;;  %v5152_v5 = vld [vmem:[#allocation8 + $0x28] sm:$0xff]   ;;  %v5149_v6 = vld [vmem:[#allocation10 + $0x20] sm:$0xff]   ;;  %v5151_v8 = vld [vmem:[#allocation10 + $0x18] sm:$0xff]   ;;  %vm3408_vm3 = vcmask 523264   ;;  %vm3413_vm4 = vcmask 785408  }
  0x7b   :  { %4804 = vmatprep.subr.bf16.mxu1 %v5146_v1  ;;  %4783 = vmatpush3.bf16.msra.mxu0 %v5148_v2  ;;  %v5154_v7 = vld [vmem:[#allocation8 + $0x20] sm:$0xff]   ;;  %v193_v10 = vld [vmem:[#allocation5 + $0x8] sm:$0xff]  ;;  %v5156_v11 = vld [vmem:[#allocation8 + $0x18] sm:$0xff]  }
  0x7c   :  { %4784 = vmatprep.subr.bf16.mxu0 %v5150_v4  ;;  %v192_v9 = vld [vmem:[#allocation5] sm:$0xff]  ;;  %v5153_v13 = vld [vmem:[#allocation10 + $0x10] sm:$0xff]   ;;  %v189_v16 = vld [vmem:[#allocation2 + $0x8] sm:$0xff] }
  0x7d   :  { %v330_v12 = vpack.c.bf16 %v193_v10, %v192_v9  ;;  %v188_v14 = vld [vmem:[#allocation2] sm:$0xff]  ;;  %v5158_v15 = vld [vmem:[#allocation8 + $0x10] sm:$0xff]   ;;  %v5155_v17 = vld [vmem:[#allocation10 + $0x8] sm:$0xff]  }
  0x7e   :  { %4805 = vmatpush3.bf16.msra.mxu1 %v5146_v1  ;;  %v208_v18 = vpack.c.bf16 %v189_v16, %v188_v14  ;;  %v5159_v19 = vld [vmem:[#allocation8 + $0x8] sm:$0xff]   ;;  %v5157_v20 = vld [vmem:[#allocation10] sm:$0xff]   ;;  %v194_v21 = vld [vmem:[#allocation5 + $0x10] sm:$0xff] }
  0x7f   :  { %4806 = vmatprep.subr.bf16.mxu1 %v5147_v3  ;;  %4785 = vmatpush3.bf16.msra.mxu0 %v5150_v4  ;;  %v195_v22 = vld [vmem:[#allocation5 + $0x18] sm:$0xff]  ;;  %v5160_v23 = vld [vmem:[#allocation8] sm:$0xff]   ;;  %v197_v25 = vld [vmem:[#allocation5 + $0x28] sm:$0xff] }
  0x80   :  { %4786 = vmatprep.subr.bf16.mxu0 %v5152_v5  ;;  %4818 = vmatprep.mubr.bf16.mxu1 %v330_v12  ;;  %v196_v24 = vld [vmem:[#allocation5 + $0x20] sm:$0xff]  ;;  %v190_v26 = vld [vmem:[#allocation2 + $0x10] sm:$0xff]  ;;  %v191_v27 = vld [vmem:[#allocation2 + $0x18] sm:$0xff]  ;;  %v331_v31 = vpack.c.bf16 %v195_v22, %v194_v21 }
  0x81   :  { %4798 = vmatprep.mubr.bf16.mxu0 %v208_v18  ;;  %v5161_v28 = vld [vmem:[#allocation11 + $0x38] sm:$0xff]   ;;  %v200_v29 = vld [vmem:[#allocation7] sm:$0xff]  ;;  %v201_v30 = vld [vmem:[#allocation7 + $0x8] sm:$0xff]  ;;  %v332_v32 = vpack.c.bf16 %v197_v25, %v196_v24  ;;  %v209_v35 = vpack.c.bf16 %v191_v27, %v190_v26 }
  0x82   :  { %4807 = vmatpush3.bf16.msra.mxu1 %v5147_v3  ;;  %v198_v33 = vld [vmem:[#allocation5 + $0x30] sm:$0xff]  ;;  %v199_v34 = vld [vmem:[#allocation5 + $0x38] sm:$0xff]  ;;  %v470_v37 = vpack.c.bf16 %v201_v30, %v200_v29  ;;  %v5163_v38 = vld [vmem:[#allocation11 + $0x28] sm:$0xff]  }
  0x83   :  { %4808 = vmatprep.subr.bf16.mxu1 %v5149_v6  ;;  %4787 = vmatpush3.bf16.msra.mxu0 %v5152_v5  ;;  %v5162_v36 = vld [vmem:[#allocation11 + $0x30] sm:$0xff]   ;;  %v333_v39 = vpack.c.bf16 %v199_v34, %v198_v33  ;;  %v5164_v40 = vld [vmem:[#allocation11 + $0x20] sm:$0xff]   ;;  %v5165_v41 = vld [vmem:[#allocation11 + $0x18] sm:$0xff]  }
  0x84   :  { %4788 = vmatprep.subr.bf16.mxu0 %v5154_v7  ;;  %v5166_v42 = vld [vmem:[#allocation11 + $0x10] sm:$0xff]   ;;  %v5167_v43 = vld [vmem:[#allocation11 + $0x8] sm:$0xff]   ;;  %v5168_v44 = vld [vmem:[#allocation11] sm:$0xff]  }
  0x85   :  { %v202_v45 = vld [vmem:[#allocation7 + $0x10] sm:$0xff]  ;;  %v203_v46 = vld [vmem:[#allocation7 + $0x18] sm:$0xff]  ;;  %v204_v48 = vld [vmem:[#allocation7 + $0x20] sm:$0xff] }
  0x86   :  { %4809 = vmatpush3.bf16.msra.mxu1 %v5149_v6  ;;  %v471_v47 = vpack.c.bf16 %v203_v46, %v202_v45  ;;  %v205_v49 = vld [vmem:[#allocation7 + $0x28] sm:$0xff]  ;;  %v206_v51 = vld [vmem:[#allocation7 + $0x30] sm:$0xff]  ;;  %v207_v52 = vld [vmem:[#allocation7 + $0x38] sm:$0xff] }
  0x87   :  { %4810 = vmatprep.subr.bf16.mxu1 %v5151_v8  ;;  %4789 = vmatpush3.bf16.msra.mxu0 %v5154_v7  ;;  %v472_v50 = vpack.c.bf16 %v205_v49, %v204_v48  ;;  %v473_v53 = vpack.c.bf16 %v207_v52, %v206_v51  ;;  %v4426_v57 = vld [vmem:[%s6347_s7] ss:$0 sm:$0xff] }
  0x88   :  { %4790 = vmatprep.subr.bf16.mxu0 %v5156_v11  ;;  %v4417_v1 = vld [vmem:[%s6346_s6] ss:$0 sm:$0xff] }
  0x89   :  { %v5813_v18 = vld [vmem:[%s6348_s8] ss:$0 sm:$0xff]  ;;  %s5571_s8 = smov 32  }
  0x8a   :  { %4811 = vmatpush3.bf16.msra.mxu1 %v5151_v8 }
  0x8b   :  { %4812 = vmatprep.subr.bf16.mxu1 %v5153_v13  ;;  %4791 = vmatpush3.bf16.msra.mxu0 %v5156_v11 }
  0x8c   :  { %4792 = vmatprep.subr.bf16.mxu0 %v5158_v15 }
  0x8e   :  { %4813 = vmatpush3.bf16.msra.mxu1 %v5153_v13 }
  0x8f   :  { %4814 = vmatprep.subr.bf16.mxu1 %v5155_v17  ;;  %4793 = vmatpush3.bf16.msra.mxu0 %v5158_v15 }
  0x90   :  { %4794 = vmatprep.subr.bf16.mxu0 %v5159_v19 }
  0x92   :  { %4815 = vmatpush3.bf16.msra.mxu1 %v5155_v17 }
  0x93   :  { %4816 = vmatprep.subr.bf16.mxu1 %v5157_v20  ;;  %4795 = vmatpush3.bf16.msra.mxu0 %v5159_v19 }
  0x94   :  { %4796 = vmatprep.subr.bf16.mxu0 %v5160_v23 }
  0x96   :  { %4817 = vmatpush3.bf16.msra.mxu1 %v5157_v20 }
  0x97   :  { %4797 = vmatpush3.bf16.msra.mxu0 %v5160_v23  ;;  %4864 = vmatprep.subr.mxu1 %v5568_v54 }
  0x98   :  { %4826 = vmatprep.subr.bf16.mxu0 %v5161_v28 }
  0x99   :  { %4819 = vmatmul.mubr.bf16.vlgmr.msra.gmra.mxu1 %v331_v31 }
  0x9a   :  { %4822 = vmatprep.mubr.bf16.mxu1 %v332_v32  ;;  %4799 = vmatmul.mubr.bf16.vlgmr.msra.gmra.mxu0 %v209_v35 }
  0x9b   :  { %4827 = vmatpush3.bf16.msra.mxu0 %v5161_v28  ;;  %4842 = vmatprep.mubr.bf16.mxu0 %v470_v37 }
  0x9c   :  { %4828 = vmatprep.subr.bf16.mxu0 %v5162_v36 }
  0x9f   :  { %4829 = vmatpush3.bf16.msra.mxu0 %v5162_v36 }
  0xa0   :  { %4830 = vmatprep.subr.bf16.mxu0 %v5163_v38 }
  0xa1   :  { %4823 = vmatmul.mubr.bf16.gmra.mxu1 %v333_v39 }
  0xa2   :  { %4868 = vmatprep.mubr.msk.f32.mxu1 %vm5569_vm0, %v5568_v54 }
  0xa3   :  { %4831 = vmatpush3.bf16.msra.mxu0 %v5163_v38 }
  0xa4   :  { %4832 = vmatprep.subr.bf16.mxu0 %v5164_v40 }
  0xa7   :  { %4833 = vmatpush3.bf16.msra.mxu0 %v5164_v40 }
  0xa8   :  { %4834 = vmatprep.subr.bf16.mxu0 %v5165_v41 }
  0xab   :  { %4835 = vmatpush3.bf16.msra.mxu0 %v5165_v41 }
  0xac   :  { %4836 = vmatprep.subr.bf16.mxu0 %v5166_v42 }
  0xaf   :  { %4837 = vmatpush3.bf16.msra.mxu0 %v5166_v42 }
  0xb0   :  { %4838 = vmatprep.subr.bf16.mxu0 %v5167_v43 }
  0xb3   :  { %4839 = vmatpush3.bf16.msra.mxu0 %v5167_v43 }
  0xb4   :  { %4840 = vmatprep.subr.bf16.mxu0 %v5168_v44 }
  0xb7   :  { %4841 = vmatpush3.bf16.msra.mxu0 %v5168_v44 }
  0xb8   :  { %4850 = vmatprep.subr.mxu0 %v5568_v54 }
  0xba   :  { %4843 = vmatmul.mubr.bf16.vlgmr.msra.gmra.mxu0 %v471_v47 }
  0xbb   :  { %4846 = vmatprep.mubr.bf16.mxu0 %v472_v50 }
  0xc2   :  { %4847 = vmatmul.mubr.bf16.gmra.mxu0 %v473_v53 }
  0xc3   :  { %4854 = vmatprep.mubr.msk.f32.mxu0 %vm5569_vm0, %v5568_v54 }
 0x159   :  { %v4820_v55 = vpop.f32.mrf.mxu1 }
 0x15a   :  { %v4800_v62 = vpop.f32.mrf.mxu0  ;;  %v5772_v10 = vadd.f32 %v4820_v55, %v4426_v57 }
 0x15b   :  { %v439_v56 = vpop.f32.mrf.mxu1  ;;  %v5782_v13 = vadd.f32 %v4800_v62, %v4417_v1 }
 0x15c   :  { %v5745_v0 = vadd.f32 %v4426_v57, %v439_v56  ;;  %v315_v3 = vpop.f32.mrf.mxu0 }
 0x15d   :  { %v4821_v58 = vpop.f32.mrf.mxu1  ;;  %v5755_v5 = vadd.f32 %v4417_v1, %v315_v3 }
 0x15e   :  { %v5739_v59 = vadd.f32 %v4821_v58, %v4426_v57  ;;  %v4801_v8 = vpop.f32.mrf.mxu0 }
 0x15f   :  { %v442_v60 = vpop.f32.mrf.mxu1  ;;  %v5803_v16 = vadd.f32 %v4801_v8, %v4417_v1 }
 0x160   :  { %v5741_v61 = vadd.f32 %v4426_v57, %v442_v60  ;;  %1350 = vrot.lane.b32.xlu1 %v5739_v59, %s5570_s30  ;;  %v318_v11 = vpop.f32.mrf.mxu0 }
 0x161   :  { %v4824_v63 = vpop.f32.mrf.mxu1  ;;  %v5784_v14 = vadd.f32 %v4417_v1, %v318_v11 }
 0x162   :  { %4851 = vmatpush3.xpose.msk.msra.mxu0 %vm610_vm1, %v5741_v61  ;;  %v5792_v15 = vadd.f32 %v4824_v63, %v4426_v57 }
 0x163   :  { %v455_v2 = vpop.f32.mrf.mxu1  ;;  %4852 = vmatprep.subr.mxu0 %v5568_v54 }
 0x164   :  { %1266 = vrot.lane.b32.xlu1 %v5745_v0, %s5570_s30  ;;  %v5764_v9 = vadd.f32 %v4426_v57, %v455_v2 }
 0x165   :  { %v4825_v4 = vpop.f32.mrf.mxu1 }
 0x166   :  { %4853 = vmatpush3.xpose.msk.msra.mxu0 %vm610_vm1, %v5745_v0  ;;  %v5776_v12 = vadd.f32 %v4825_v4, %v4426_v57 }
 0x167   :  { %v458_v6 = vpop.f32.mrf.mxu1  ;;  %4857 = vmatprep.subr.mxu0 %v5568_v54 }
 0x168   :  { %v5760_v7 = vadd.f32 %v4426_v57, %v458_v6 }
 0x169   :  { %4855 = vmatmul.mubr.msk.f32.vlgmr.msra.gmra.mxu0 %vm610_vm1, %v5755_v5 }
 0x16a   :  { %4858 = vmatpush3.xpose.msk.msra.mxu0 %vm610_vm1, %v5739_v59  ;;  %4865 = vmatpush3.xpose.msk.msra.mxu1 %vm610_vm1, %v5760_v7 }
 0x16b   :  { %4859 = vmatprep.subr.mxu0 %v5568_v54  ;;  %4866 = vmatprep.subr.mxu1 %v5568_v54 }
 0x16c   :  { %4861 = vmatprep.mubr.msk.f32.mxu0 %vm5569_vm0, %v5568_v54 }
 0x16e   :  { %4860 = vmatpush3.xpose.msk.msra.mxu0 %vm610_vm1, %v5772_v10  ;;  %4867 = vmatpush3.xpose.msk.msra.mxu1 %vm610_vm1, %v5764_v9 }
 0x16f   :  { %4871 = vmatprep.subr.mxu1 %v5568_v54  ;;  %4885 = vmatprep.subr.mxu0 %v5568_v54 }
 0x171   :  { %4862 = vmatmul.mubr.msk.f32.vlgmr.msra.gmra.mxu0 %vm610_vm1, %v5784_v14  ;;  %4869 = vmatmul.mubr.msk.f32.vlgmr.msra.gmra.mxu1 %vm610_vm1, %v5782_v13 }
 0x172   :  { %4872 = vmatpush3.xpose.msk.msra.mxu1 %vm610_vm1, %v5776_v12  ;;  %4875 = vmatprep.mubr.msk.f32.mxu1 %vm5569_vm0, %v5568_v54 }
 0x173   :  { %4873 = vmatprep.subr.mxu1 %v5568_v54  ;;  %4889 = vmatprep.mubr.msk.f32.mxu0 %vm5569_vm0, %v5568_v54 }
 0x176   :  { %4874 = vmatpush3.xpose.msk.msra.mxu1 %vm610_vm1, %v5792_v15 }
 0x177   :  { %4878 = vmatprep.subr.mxu1 %v5568_v54 }
 0x179   :  { %4876 = vmatmul.mubr.msk.f32.vlgmr.msra.gmra.mxu1 %vm610_vm1, %v5803_v16 }
 0x17a   :  { %4882 = vmatprep.mubr.msk.f32.mxu1 %vm5569_vm0, %v5568_v54  ;;  %v4844_v17 = vpop.f32.mrf.mxu0 }
 0x17b   :  { %v5816_v21 = vadd.f32 %v4844_v17, %v5813_v18 }
 0x17c   :  { %v579_v19 = vpop.f32.mrf.mxu0 }
 0x17d   :  { %v5822_v24 = vadd.f32 %v5813_v18, %v579_v19 }
 0x17e   :  { %v4845_v20 = vpop.f32.mrf.mxu0 }
 0x17f   :  { %v5819_v22 = vadd.f32 %v4845_v20, %v5813_v18 }
 0x180   :  { %v582_v23 = vpop.f32.mrf.mxu0 }
 0x181   :  { %v5825_v25 = vadd.f32 %v5813_v18, %v582_v23  ;;  %4886 = vmatpush3.msra.mxu0 %v5819_v22 }
 0x182   :  { %4887 = vmatprep.subr.mxu0 %v5568_v54  ;;  %v4848_v26 = vpop.f32.mrf.mxu0 }
 0x183   :  { %4879 = vmatpush3.msra.mxu1 %v5825_v25  ;;  %4888 = vmatpush3.msra.mxu0 %v5816_v21  ;;  %v5834_v27 = vadd.f32 %v4848_v26, %v5813_v18 }
 0x184   :  { %4880 = vmatprep.subr.mxu1 %v5568_v54  ;;  %4899 = vmatprep.subr.mxu0 %v5568_v54  ;;  %v595_v28 = vpop.f32.mrf.mxu0 }
 0x185   :  { %4881 = vmatpush3.msra.mxu1 %v5822_v24  ;;  %v5839_v29 = vadd.f32 %v5813_v18, %v595_v28 }
 0x186   :  { %4892 = vmatprep.subr.mxu1 %v5568_v54  ;;  %v4849_v30 = vpop.f32.mrf.mxu0 }
 0x187   :  { %v5842_v31 = vadd.f32 %v4849_v30, %v5813_v18 }
 0x188   :  { %v5844_v32 = vpop.f32.mrf.mxu0 }
 0x189   :  { %v5882_v30 = vadd.f32 %v5813_v18, %v5844_v32 }
 0x1d2   :  { %v5854_v45 = vpop.permute.xlu1 %1350 }
 0x1d6   :  { %v5856_v49 = vpop.permute.xlu1 %1266 }
 0x229   :  { %v686_v33 = vpop.f32.mrf.mxu0 }
 0x22a   :  { %v928_v34 = vsel %vm927_vm2, %v686_v33, -inf }
 0x22b   :  { %929 = vmax.xlane.f32.xlu0 %v928_v34  ;;  %v4856_v35 = vpop.f32.mrf.mxu0 }
 0x231   :  { %v765_v36 = vpop.f32.mrf.mxu0  ;;  %v844_v37 = vpop.f32.mrf.mxu1 }
 0x232   :  { %v934_v38 = vsel %vm927_vm2, %v844_v37, -inf  ;;  %v931_v39 = vsel %vm927_vm2, %v765_v36, -inf }
 0x233   :  { %935 = vmax.xlane.f32.xlu1 %v934_v38  ;;  %v4870_v40 = vpop.f32.mrf.mxu1  ;;  %932 = vmax.xlane.f32.xlu0 %v931_v39  ;;  %v4863_v41 = vpop.f32.mrf.mxu0 }
 0x239   :  { %v923_v42 = vpop.f32.mrf.mxu1 }
 0x23a   :  { %v937_v43 = vsel %vm927_vm2, %v923_v42, -inf }
 0x23b   :  { %938 = vmax.xlane.f32.xlu1 %v937_v43  ;;  %v4877_v44 = vpop.f32.mrf.mxu1 }
 0x249   :  { %1268 = vrot.lane.b32.xlu0 %v5741_v61, %s5570_s30 }
 0x24c   :  { %1348 = vrot.lane.b32.xlu1 %v5772_v10, %s5570_s30 }
 0x2b4   :  { %v930_v46 = vpop.xlane.xlu0 %929 }
 0x2b5   :  { %v940_v47 = vsub.f32 %v686_v33, %v930_v46 }
 0x2b7   :  { %v944_v48 = vmul.f32 1.442695, %v940_v47 }
 0x2b9   :  { %5257 = vpow2.f32 %v944_v48 }
 0x2bc   :  { %v936_v50 = vpop.xlane.xlu1 %935  ;;  %v933_v51 = vpop.xlane.xlu0 %932 }
 0x2bd   :  { %v942_v52 = vsub.f32 %v844_v37, %v936_v50  ;;  %v941_v53 = vsub.f32 %v765_v36, %v933_v51 }
 0x2bf   :  { %v948_v55 = vmul.f32 1.442695, %v942_v52  ;;  %v946_v56 = vmul.f32 1.442695, %v941_v53 }
 0x2c0   :  { %v1269_v11 = vpop.permute.xlu0 %1268 }
 0x2c1   :  { %5259 = vpow2.f32 %v948_v55 }
 0x2c2   :  { %5261 = vpow2.f32 %v946_v56 }
 0x2c4   :  { %v939_v2 = vpop.xlane.xlu1 %938 }
 0x2c5   :  { %v943_v3 = vsub.f32 %v923_v42, %v939_v2 }
 0x2c6   :  { %v5258_v57 = vpop.eup %5257 }
 0x2c7   :  { %v952_v58 = vsel %vm927_vm2, %v5258_v57, 0.0  ;;  %v950_v4 = vmul.f32 1.442695, %v943_v3 }
 0x2c8   :  { %953 = vadd.xlane.f32.xlu0 %v952_v58  ;;  %v1349_v19 = vpop.permute.xlu1 %1348 }
 0x2c9   :  { %5263 = vpow2.f32 %v950_v4 }
 0x2ce   :  { %v5260_v60 = vpop.eup %5259 }
 0x2cf   :  { %v5262_v62 = vpop.eup %5261  ;;  %v958_v63 = vsel %vm927_vm2, %v5260_v60, 0.0 }
 0x2d0   :  { %959 = vadd.xlane.f32.xlu0 %v958_v63  ;;  %v955_v1 = vsel %vm927_vm2, %v5262_v62, 0.0 }
 0x2d1   :  { %956 = vadd.xlane.f32.xlu1 %v955_v1 }
 0x2d6   :  { %v5264_v6 = vpop.eup %5263 }
 0x2d7   :  { %v961_v8 = vsel %vm927_vm2, %v5264_v6, 0.0 }
 0x2e2   :  { %1346 = vrot.lane.b32.xlu1 %v5784_v14, %s5570_s30 }
 0x2e6   :  { %1264 = vrot.lane.b32.xlu0 %v5755_v5, %s5570_s30 }
 0x2ea   :  { %1432 = vrot.lane.b32.xlu0 %v5760_v7, %s5570_s30 }
 0x2ee   :  { %1430 = vrot.lane.b32.xlu0 %v5764_v9, %s5570_s30 }
 0x2f2   :  { %1428 = vrot.lane.b32.xlu0 %v5782_v13, %s5570_s30 }
 0x306   :  { %962 = vadd.xlane.f32.xlu1 %v961_v8 }
 0x317   :  { %1514 = vrot.lane.b32.xlu1 %v5776_v12, %s5570_s30 }
 0x31b   :  { %1512 = vrot.lane.b32.xlu1 %v5792_v15, %s5570_s30 }
 0x31f   :  { %1510 = vrot.lane.b32.xlu1 %v5803_v16, %s5570_s30 }
 0x351   :  { %v954_v17 = vpop.xlane.xlu0 %953 }
 0x352   :  { %5265 = vrcp.f32 %v954_v17 }
 0x359   :  { %v960_v20 = vpop.xlane.xlu0 %959 }
 0x35a   :  { %v957_v23 = vpop.xlane.xlu1 %956  ;;  %5267 = vrcp.f32 %v960_v20 }
 0x35b   :  { %5269 = vrcp.f32 %v957_v23 }
 0x35d   :  { %v1265_v34 = vpop.permute.xlu0 %1264 }
 0x35e   :  { %v1347_v39 = vpop.permute.xlu1 %1346 }
 0x35f   :  { %v5266_v26 = vpop.eup %5265 }
 0x360   :  { %v5878_v28 = vmul.f32 %v5266_v26, %v5258_v57 }
 0x361   :  { %v1433_v32 = vpop.permute.xlu0 %1432 }
 0x362   :  { %4883 = vmatmul.mubr.msk.f32.vlgmr.msra.gmra.mxu1 %vm927_vm2, %v5878_v28 }
 0x363   :  { %4893 = vmatpush3.msra.mxu1 %v5882_v30  ;;  %4896 = vmatprep.mubr.msk.f32.mxu1 %vm5569_vm0, %v5568_v54 }
 0x364   :  { %4894 = vmatprep.subr.mxu1 %v5568_v54 }
 0x365   :  { %4895 = vmatpush3.msra.mxu1 %v5839_v29  ;;  %v1431_v37 = vpop.permute.xlu0 %1430 }
 0x366   :  { %4906 = vmatprep.subr.mxu1 %v5568_v54 }
 0x367   :  { %v5268_v33 = vpop.eup %5267 }
 0x368   :  { %v5270_v35 = vpop.eup %5269  ;;  %v5892_v36 = vmul.f32 %v5268_v33, %v5260_v60 }
 0x369   :  { %v5894_v18 = vmul.f32 %v5270_v35, %v5262_v62  ;;  %v1429_v38 = vpop.permute.xlu0 %1428 }
 0x36a   :  { %4897 = vmatmul.mubr.msk.f32.vlgmr.msra.gmra.mxu1 %vm927_vm2, %v5892_v36 }
 0x36b   :  { %4890 = vmatmul.mubr.msk.f32.vlgmr.msra.gmra.mxu0 %vm927_vm2, %v5894_v18  ;;  %4907 = vmatpush3.xpose.msk.msra.mxu1 %vm610_vm1, %v1269_v11 }
 0x36c   :  { %4900 = vmatpush3.msra.mxu0 %v5842_v31  ;;  %4908 = vmatprep.subr.mxu1 %v5568_v54 }
 0x36d   :  { %4901 = vmatprep.subr.mxu0 %v5568_v54  ;;  %4910 = vmatprep.mubr.msk.f32.mxu1 %vm5569_vm0, %v5568_v54 }
 0x36e   :  { %4902 = vmatpush3.msra.mxu0 %v5834_v27  ;;  %4903 = vmatprep.mubr.msk.f32.mxu0 %vm5569_vm0, %v5568_v54 }
 0x36f   :  { %4909 = vmatpush3.xpose.msk.msra.mxu1 %vm610_vm1, %v5856_v49  ;;  %4913 = vmatprep.subr.mxu0 %v5568_v54 }
 0x370   :  { %4920 = vmatprep.subr.mxu1 %v5568_v54 }
 0x372   :  { %4911 = vmatmul.mubr.msk.f32.vlgmr.msra.gmra.mxu1 %vm610_vm1, %v1265_v34 }
 0x373   :  { %4921 = vmatpush3.xpose.msk.msra.mxu1 %vm610_vm1, %v1433_v32  ;;  %4924 = vmatprep.mubr.msk.f32.mxu1 %vm5569_vm0, %v5568_v54 }
 0x374   :  { %4922 = vmatprep.subr.mxu1 %v5568_v54 }
 0x377   :  { %4923 = vmatpush3.xpose.msk.msra.mxu1 %vm610_vm1, %v1431_v37 }
 0x378   :  { %4934 = vmatprep.subr.mxu1 %v5568_v54 }
 0x37a   :  { %4925 = vmatmul.mubr.msk.f32.vlgmr.msra.gmra.mxu1 %vm610_vm1, %v1429_v38 }
 0x37b   :  { %4938 = vmatprep.mubr.msk.f32.mxu1 %vm5569_vm0, %v5568_v54 }
 0x38f   :  { %v963_v40 = vpop.xlane.xlu1 %962 }
 0x390   :  { %5271 = vrcp.f32 %v963_v40 }
 0x393   :  { %v1515_v43 = vpop.permute.xlu1 %1514 }
 0x397   :  { %v1513_v44 = vpop.permute.xlu1 %1512 }
 0x39d   :  { %v5272_v41 = vpop.eup %5271 }
 0x39e   :  { %v5923_v42 = vmul.f32 %v5272_v41, %v5264_v6 }
 0x3a0   :  { %4904 = vmatmul.mubr.msk.f32.vlgmr.msra.gmra.mxu0 %vm927_vm2, %v5923_v42 }
 0x3a1   :  { %4914 = vmatpush3.xpose.msk.msra.mxu0 %vm610_vm1, %v5854_v45  ;;  %4917 = vmatprep.mubr.msk.f32.mxu0 %vm5569_vm0, %v5568_v54  ;;  %v1511_v45 = vpop.permute.xlu1 %1510 }
 0x3a2   :  { %4915 = vmatprep.subr.mxu0 %v5568_v54 }
 0x3a5   :  { %4916 = vmatpush3.xpose.msk.msra.mxu0 %vm610_vm1, %v1349_v19 }
 0x3a6   :  { %4927 = vmatprep.subr.mxu0 %v5568_v54 }
 0x3a8   :  { %4918 = vmatmul.mubr.msk.f32.vlgmr.msra.gmra.mxu0 %vm610_vm1, %v1347_v39 }
 0x3a9   :  { %4928 = vmatpush3.xpose.msk.msra.mxu0 %vm610_vm1, %v1515_v43  ;;  %4931 = vmatprep.mubr.msk.f32.mxu0 %vm5569_vm0, %v5568_v54 }
 0x3aa   :  { %4929 = vmatprep.subr.mxu0 %v5568_v54 }
 0x3ad   :  { %4930 = vmatpush3.xpose.msk.msra.mxu0 %vm610_vm1, %v1513_v44 }
 0x3ae   :  { %4941 = vmatprep.subr.mxu0 %v5568_v54 }
 0x3b0   :  { %4932 = vmatmul.mubr.msk.f32.vlgmr.msra.gmra.mxu0 %vm610_vm1, %v1511_v45 }
 0x3b1   :  { %4945 = vmatprep.mubr.msk.f32.mxu0 %vm5569_vm0, %v5568_v54 }
 0x422   :  { %v5944_v46 = vpop.f32.mrf.mxu1 }
 0x424   :  { %v4884_v47 = vpop.f32.mrf.mxu1 }
 0x42a   :  { %v5946_v48 = vpop.f32.mrf.mxu1 }
 0x42b   :  { %v5948_v49 = vpop.f32.mrf.mxu0 }
 0x42c   :  { %v4898_v50 = vpop.f32.mrf.mxu1 }
 0x42d   :  { %v4891_v51 = vpop.f32.mrf.mxu0 }
 0x432   :  { %v1342_v52 = vpop.f32.mrf.mxu1 }
 0x433   :  { %v1592_v53 = vsel %vm927_vm2, %v1342_v52, -inf }
 0x434   :  { %1593 = vmax.xlane.f32.xlu0 %v1592_v53  ;;  %v4912_v55 = vpop.f32.mrf.mxu1 }
 0x43a   :  { %v1506_v56 = vpop.f32.mrf.mxu1 }
 0x43b   :  { %v1598_v57 = vsel %vm927_vm2, %v1506_v56, -inf }
 0x43c   :  { %1599 = vmax.xlane.f32.xlu0 %v1598_v57  ;;  %v4926_v58 = vpop.f32.mrf.mxu1 }
 0x460   :  { %v5952_v60 = vpop.f32.mrf.mxu0 }
 0x462   :  { %v4905_v62 = vpop.f32.mrf.mxu0 }
 0x468   :  { %v1424_v63 = vpop.f32.mrf.mxu0 }
 0x469   :  { %v1595_v1 = vsel %vm927_vm2, %v1424_v63, -inf }
 0x46a   :  { %1596 = vmax.xlane.f32.xlu1 %v1595_v1  ;;  %v4919_v2 = vpop.f32.mrf.mxu0 }
 0x470   :  { %v1588_v3 = vpop.f32.mrf.mxu0 }
 0x471   :  { %v1601_v4 = vsel %vm927_vm2, %v1588_v3, -inf }
 0x472   :  { %1602 = vmax.xlane.f32.xlu0 %v1601_v4  ;;  %v4933_v6 = vpop.f32.mrf.mxu0 }
 0x47b   :  { %1725 = vrot.lane.b32.xlu1 %v5819_v22, %s5570_s30 }
 0x47f   :  { %1642 = vrot.lane.b32.xlu1 %v5822_v24, %s5570_s30 }
 0x483   :  { %1723 = vrot.lane.b32.xlu1 %v5816_v21, %s5570_s30 }
 0x487   :  { %1887 = vrot.lane.b32.xlu1 %v5842_v31, %s5570_s30 }
 0x488   :  { %1644 = vrot.lane.b32.xlu0 %v5825_v25, %s5570_s30 }
 0x48b   :  { %1885 = vrot.lane.b32.xlu1 %v5834_v27, %s5570_s30 }
 0x48c   :  { %1806 = vrot.lane.b32.xlu0 %v5882_v30, %s5570_s30 }
 0x48f   :  { %2050 = vrot.lane.b32.xlu1 %v5739_v59, %s5557_s29 }
 0x490   :  { %1804 = vrot.lane.b32.xlu0 %v5839_v29, %s5570_s30 }
 0x493   :  { %2048 = vrot.lane.b32.xlu1 %v5772_v10, %s5557_s29 }
 0x494   :  { %1968 = vrot.lane.b32.xlu0 %v5741_v61, %s5557_s29 }
 0x498   :  { %1966 = vrot.lane.b32.xlu0 %v5745_v0, %s5557_s29 }
 0x4bd   :  { %v1594_v8 = vpop.xlane.xlu0 %1593 }
 0x4be   :  { %v1604_v11 = vsub.f32 %v1342_v52, %v1594_v8 }
 0x4c0   :  { %v1608_v17 = vmul.f32 1.442695, %v1604_v11 }
 0x4c2   :  { %5273 = vpow2.f32 %v1608_v17 }
 0x4c5   :  { %v1600_v19 = vpop.xlane.xlu0 %1599 }
 0x4c6   :  { %v1606_v20 = vsub.f32 %v1506_v56, %v1600_v19 }
 0x4c8   :  { %v1612_v23 = vmul.f32 1.442695, %v1606_v20 }
 0x4ca   :  { %5275 = vpow2.f32 %v1612_v23 }
 0x4cf   :  { %v5274_v26 = vpop.eup %5273 }
 0x4d0   :  { %v1616_v33 = vsel %vm927_vm2, %v5274_v26, 0.0 }
 0x4d1   :  { %1617 = vadd.xlane.f32.xlu0 %v1616_v33 }
 0x4d7   :  { %v5276_v34 = vpop.eup %5275 }
 0x4d8   :  { %v1622_v35 = vsel %vm927_vm2, %v5276_v34, 0.0 }
 0x4d9   :  { %1623 = vadd.xlane.f32.xlu0 %v1622_v35 }
 0x4ef   :  { %1964 = vrot.lane.b32.xlu0 %v5755_v5, %s5557_s29 }
 0x4f3   :  { %v1597_v32 = vpop.xlane.xlu1 %1596  ;;  %2132 = vrot.lane.b32.xlu0 %v5760_v7, %s5557_s29 }
 0x4f4   :  { %v1605_v37 = vsub.f32 %v1424_v63, %v1597_v32 }
 0x4f6   :  { %v1610_v38 = vmul.f32 1.442695, %v1605_v37 }
 0x4f7   :  { %v1726_v39 = vpop.permute.xlu1 %1725  ;;  %2130 = vrot.lane.b32.xlu0 %v5764_v9, %s5557_s29 }
 0x4f8   :  { %5277 = vpow2.f32 %v1610_v38  ;;  %4942 = vmatpush3.msra.mxu0 %v1726_v39 }
 0x4f9   :  { %4943 = vmatprep.subr.mxu0 %v5568_v54 }
 0x4fb   :  { %v1643_v40 = vpop.permute.xlu1 %1642  ;;  %v1603_v41 = vpop.xlane.xlu0 %1602  ;;  %2128 = vrot.lane.b32.xlu0 %v5782_v13, %s5557_s29 }
 0x4fc   :  { %v1607_v50 = vsub.f32 %v1588_v3, %v1603_v41 }
 0x4fe   :  { %v1614_v51 = vmul.f32 1.442695, %v1607_v50 }
 0x4ff   :  { %v1724_v43 = vpop.permute.xlu1 %1723  ;;  %v1645_v44 = vpop.permute.xlu0 %1644 }
 0x500   :  { %4935 = vmatpush3.msra.mxu1 %v1645_v44  ;;  %4944 = vmatpush3.msra.mxu0 %v1724_v43  ;;  %5279 = vpow2.f32 %v1614_v51 }
 0x501   :  { %4936 = vmatprep.subr.mxu1 %v5568_v54  ;;  %4955 = vmatprep.subr.mxu0 %v5568_v54 }
 0x502   :  { %4937 = vmatpush3.msra.mxu1 %v1643_v40 }
 0x503   :  { %4948 = vmatprep.subr.mxu1 %v5568_v54  ;;  %v1807_v55 = vpop.permute.xlu0 %1806  ;;  %v1888_v11 = vpop.permute.xlu1 %1887 }
 0x505   :  { %v5278_v45 = vpop.eup %5277 }
 0x506   :  { %v1619_v47 = vsel %vm927_vm2, %v5278_v45, 0.0 }
 0x507   :  { %1620 = vadd.xlane.f32.xlu1 %v1619_v47  ;;  %v1805_v56 = vpop.permute.xlu0 %1804  ;;  %v1886_v19 = vpop.permute.xlu1 %1885 }
 0x50b   :  { %v1969_v57 = vpop.permute.xlu0 %1968  ;;  %v2051_v23 = vpop.permute.xlu1 %2050 }
 0x50d   :  { %v5280_v52 = vpop.eup %5279 }
 0x50e   :  { %v1625_v53 = vsel %vm927_vm2, %v5280_v52, 0.0 }
 0x50f   :  { %v1967_v58 = vpop.permute.xlu0 %1966 }
 0x518   :  { %2046 = vrot.lane.b32.xlu1 %v5784_v14, %s5557_s29 }
 0x53c   :  { %1626 = vadd.xlane.f32.xlu1 %v1625_v53 }
 0x54d   :  { %2214 = vrot.lane.b32.xlu1 %v5776_v12, %s5557_s29 }
 0x551   :  { %2212 = vrot.lane.b32.xlu1 %v5792_v15, %s5557_s29 }
 0x555   :  { %2210 = vrot.lane.b32.xlu1 %v5803_v16, %s5557_s29 }
 0x55a   :  { %v1618_v62 = vpop.xlane.xlu0 %1617 }
 0x55b   :  { %5281 = vrcp.f32 %v1618_v62 }
 0x562   :  { %v1624_v63 = vpop.xlane.xlu0 %1623 }
 0x563   :  { %5283 = vrcp.f32 %v1624_v63 }
 0x566   :  { %v1965_v4 = vpop.permute.xlu0 %1964 }
 0x568   :  { %v5282_v1 = vpop.eup %5281 }
 0x569   :  { %v6004_v2 = vmul.f32 %v5282_v1, %v5274_v26  ;;  %v2049_v26 = vpop.permute.xlu1 %2048 }
 0x56a   :  { %v2133_v8 = vpop.permute.xlu0 %2132 }
 0x56b   :  { %4939 = vmatmul.mubr.msk.f32.vlgmr.msra.gmra.mxu1 %vm927_vm2, %v6004_v2 }
 0x56c   :  { %4949 = vmatpush3.msra.mxu1 %v1807_v55  ;;  %4952 = vmatprep.mubr.msk.f32.mxu1 %vm5569_vm0, %v5568_v54 }
 0x56d   :  { %4950 = vmatprep.subr.mxu1 %v5568_v54 }
 0x56e   :  { %4951 = vmatpush3.msra.mxu1 %v1805_v56  ;;  %v2131_v17 = vpop.permute.xlu0 %2130 }
 0x56f   :  { %4962 = vmatprep.subr.mxu1 %v5568_v54 }
 0x570   :  { %v5284_v3 = vpop.eup %5283 }
 0x571   :  { %v6012_v6 = vmul.f32 %v5284_v3, %v5276_v34 }
 0x572   :  { %v2129_v20 = vpop.permute.xlu0 %2128 }
 0x573   :  { %4953 = vmatmul.mubr.msk.f32.vlgmr.msra.gmra.mxu1 %vm927_vm2, %v6012_v6 }
 0x574   :  { %4963 = vmatpush3.xpose.msk.msra.mxu1 %vm610_vm1, %v1969_v57  ;;  %4966 = vmatprep.mubr.msk.f32.mxu1 %vm5569_vm0, %v5568_v54 }
 0x575   :  { %4964 = vmatprep.subr.mxu1 %v5568_v54 }
 0x578   :  { %4965 = vmatpush3.xpose.msk.msra.mxu1 %vm610_vm1, %v1967_v58 }
 0x579   :  { %4976 = vmatprep.subr.mxu1 %v5568_v54 }
 0x57b   :  { %4967 = vmatmul.mubr.msk.f32.vlgmr.msra.gmra.mxu1 %vm610_vm1, %v1965_v4 }
 0x57c   :  { %4977 = vmatpush3.xpose.msk.msra.mxu1 %vm610_vm1, %v2133_v8  ;;  %4980 = vmatprep.mubr.msk.f32.mxu1 %vm5569_vm0, %v5568_v54 }
 0x57d   :  { %4978 = vmatprep.subr.mxu1 %v5568_v54 }
 0x580   :  { %4979 = vmatpush3.xpose.msk.msra.mxu1 %vm610_vm1, %v2131_v17 }
 0x581   :  { %4990 = vmatprep.subr.mxu1 %v5568_v54 }
 0x583   :  { %4981 = vmatmul.mubr.msk.f32.vlgmr.msra.gmra.mxu1 %vm610_vm1, %v2129_v20 }
 0x584   :  { %4994 = vmatprep.mubr.msk.f32.mxu1 %vm5569_vm0, %v5568_v54 }
 0x590   :  { %v1621_v33 = vpop.xlane.xlu1 %1620 }
 0x591   :  { %5285 = vrcp.f32 %v1621_v33 }
 0x594   :  { %v2047_v32 = vpop.permute.xlu1 %2046 }
 0x59e   :  { %v5286_v34 = vpop.eup %5285 }
 0x59f   :  { %v6032_v35 = vmul.f32 %v5286_v34, %v5278_v45 }
 0x5a1   :  { %4946 = vmatmul.mubr.msk.f32.vlgmr.msra.gmra.mxu0 %vm927_vm2, %v6032_v35 }
 0x5a2   :  { %4956 = vmatpush3.msra.mxu0 %v1888_v11  ;;  %4959 = vmatprep.mubr.msk.f32.mxu0 %vm5569_vm0, %v5568_v54 }
 0x5a3   :  { %4957 = vmatprep.subr.mxu0 %v5568_v54 }
 0x5a4   :  { %4958 = vmatpush3.msra.mxu0 %v1886_v19 }
 0x5a5   :  { %4969 = vmatprep.subr.mxu0 %v5568_v54 }
 0x5c5   :  { %v1627_v37 = vpop.xlane.xlu1 %1626 }
 0x5c6   :  { %5287 = vrcp.f32 %v1627_v37 }
 0x5c9   :  { %v2215_v40 = vpop.permute.xlu1 %2214 }
 0x5cd   :  { %v2213_v41 = vpop.permute.xlu1 %2212 }
 0x5d1   :  { %v2211_v43 = vpop.permute.xlu1 %2210 }
 0x5d3   :  { %v5288_v38 = vpop.eup %5287 }
 0x5d4   :  { %v6040_v39 = vmul.f32 %v5288_v38, %v5280_v52 }
 0x5d6   :  { %4960 = vmatmul.mubr.msk.f32.vlgmr.msra.gmra.mxu0 %vm927_vm2, %v6040_v39 }
 0x5d7   :  { %4970 = vmatpush3.xpose.msk.msra.mxu0 %vm610_vm1, %v2051_v23  ;;  %4973 = vmatprep.mubr.msk.f32.mxu0 %vm5569_vm0, %v5568_v54 }
 0x5d8   :  { %4971 = vmatprep.subr.mxu0 %v5568_v54 }
 0x5db   :  { %4972 = vmatpush3.xpose.msk.msra.mxu0 %vm610_vm1, %v2049_v26 }
 0x5dc   :  { %4983 = vmatprep.subr.mxu0 %v5568_v54 }
 0x5de   :  { %4974 = vmatmul.mubr.msk.f32.vlgmr.msra.gmra.mxu0 %vm610_vm1, %v2047_v32 }
 0x5df   :  { %4984 = vmatpush3.xpose.msk.msra.mxu0 %vm610_vm1, %v2215_v40  ;;  %4987 = vmatprep.mubr.msk.f32.mxu0 %vm5569_vm0, %v5568_v54 }
 0x5e0   :  { %4985 = vmatprep.subr.mxu0 %v5568_v54 }
 0x5e3   :  { %4986 = vmatpush3.xpose.msk.msra.mxu0 %vm610_vm1, %v2213_v41 }
 0x5e4   :  { %4997 = vmatprep.subr.mxu0 %v5568_v54 }
 0x5e6   :  { %4988 = vmatmul.mubr.msk.f32.vlgmr.msra.gmra.mxu0 %vm610_vm1, %v2211_v43 }
 0x5e7   :  { %5001 = vmatprep.mubr.msk.f32.mxu0 %vm5569_vm0, %v5568_v54 }
 0x62b   :  { %v6060_v44 = vpop.f32.mrf.mxu1 }
 0x62d   :  { %v4940_v45 = vpop.f32.mrf.mxu1 }
 0x633   :  { %v6062_v47 = vpop.f32.mrf.mxu1 }
 0x635   :  { %v4954_v50 = vpop.f32.mrf.mxu1 }
 0x63b   :  { %v2042_v51 = vpop.f32.mrf.mxu1 }
 0x63c   :  { %v2292_v52 = vsel %vm927_vm2, %v2042_v51, -inf }
 0x63d   :  { %2293 = vmax.xlane.f32.xlu0 %v2292_v52  ;;  %v4968_v53 = vpop.f32.mrf.mxu1 }
 0x643   :  { %v2206_v55 = vpop.f32.mrf.mxu1 }
 0x644   :  { %v2298_v56 = vsel %vm927_vm2, %v2206_v55, -inf }
 0x645   :  { %2299 = vmax.xlane.f32.xlu0 %v2298_v56  ;;  %v4982_v57 = vpop.f32.mrf.mxu1 }
 0x661   :  { %v6066_v58 = vpop.f32.mrf.mxu0 }
 0x662   :  { %v5115_v62 = vpack.i.bf16 %v6066_v58, %v6060_v44 }
 0x663   :  { %v4947_v63 = vpop.f32.mrf.mxu0 }
 0x696   :  { %v6070_v1 = vpop.f32.mrf.mxu0 }
 0x698   :  { %v4961_v3 = vpop.f32.mrf.mxu0 }
 0x69e   :  { %v2124_v4 = vpop.f32.mrf.mxu0 }
 0x69f   :  { %v2295_v8 = vsel %vm927_vm2, %v2124_v4, -inf }
 0x6a0   :  { %2296 = vmax.xlane.f32.xlu1 %v2295_v8  ;;  %v4975_v11 = vpop.f32.mrf.mxu0 }
 0x6a1   :  { %v1636_v11 = vadd.f32 %v6004_v2, %v5878_v28 }
 0x6a6   :  { %v2288_v17 = vpop.f32.mrf.mxu0 }
 0x6a7   :  { %v2301_v19 = vsel %vm927_vm2, %v2288_v17, -inf }
 0x6a8   :  { %2302 = vmax.xlane.f32.xlu0 %v2301_v19  ;;  %v4989_v20 = vpop.f32.mrf.mxu0 }
 0x6b1   :  { %2421 = vrot.lane.b32.xlu1 %v5819_v22, %s5557_s29 }
 0x6b5   :  { %2340 = vrot.lane.b32.xlu1 %v5822_v24, %s5557_s29 }
 0x6b9   :  { %2419 = vrot.lane.b32.xlu1 %v5816_v21, %s5557_s29 }
 0x6bd   :  { %2579 = vrot.lane.b32.xlu1 %v5842_v31, %s5557_s29 }
 0x6be   :  { %2342 = vrot.lane.b32.xlu0 %v5825_v25, %s5557_s29 }
 0x6c1   :  { %2577 = vrot.lane.b32.xlu1 %v5834_v27, %s5557_s29 }
 0x6c2   :  { %2500 = vrot.lane.b32.xlu0 %v5882_v30, %s5557_s29 }
 0x6c5   :  { %2742 = vrot.lane.b32.xlu1 %v5739_v59, %s5571_s8 }
 0x6c6   :  { %2498 = vrot.lane.b32.xlu0 %v5839_v29, %s5557_s29  ;;  %v2294_v23 = vpop.xlane.xlu0 %2293 }
 0x6c7   :  { %v2304_v26 = vsub.f32 %v2042_v51, %v2294_v23 }
 0x6c9   :  { %2740 = vrot.lane.b32.xlu1 %v5772_v10, %s5571_s8  ;;  %v2308_v34 = vmul.f32 1.442695, %v2304_v26 }
 0x6ca   :  { %2660 = vrot.lane.b32.xlu0 %v5741_v61, %s5571_s8 }
 0x6cb   :  { %5289 = vpow2.f32 %v2308_v34 }
 0x6ce   :  { %2658 = vrot.lane.b32.xlu0 %v5745_v0, %s5571_s8  ;;  %v2300_v33 = vpop.xlane.xlu0 %2299 }
 0x6cf   :  { %v2306_v32 = vsub.f32 %v2206_v55, %v2300_v33 }
 0x6d1   :  { %v2312_v37 = vmul.f32 1.442695, %v2306_v32 }
 0x6d3   :  { %5291 = vpow2.f32 %v2312_v37 }
 0x6d8   :  { %v5290_v59 = vpop.eup %5289 }
 0x6d9   :  { %v2316_v38 = vsel %vm927_vm2, %v5290_v59, 0.0 }
 0x6e0   :  { %v5292_v40 = vpop.eup %5291 }
 0x6e1   :  { %v2322_v10 = vsel %vm927_vm2, %v5292_v40, 0.0 }
 0x6ed   :  { %2317 = vadd.xlane.f32.xlu0 %v2316_v38 }
 0x6f1   :  { %2323 = vadd.xlane.f32.xlu0 %v2322_v10 }
 0x707   :  { %2656 = vrot.lane.b32.xlu0 %v5755_v5, %s5571_s8 }
 0x70b   :  { %2824 = vrot.lane.b32.xlu0 %v5760_v7, %s5571_s8 }
 0x70f   :  { %2822 = vrot.lane.b32.xlu0 %v5764_v9, %s5571_s8 }
 0x713   :  { %2820 = vrot.lane.b32.xlu0 %v5782_v13, %s5571_s8 }
 0x729   :  { %v2297_v61 = vpop.xlane.xlu1 %2296 }
 0x72a   :  { %v2305_v0 = vsub.f32 %v2124_v4, %v2297_v61 }
 0x72c   :  { %v2310_v41 = vmul.f32 1.442695, %v2305_v0 }
 0x72d   :  { %v2422_v43 = vpop.permute.xlu1 %2421 }
 0x72e   :  { %5293 = vpow2.f32 %v2310_v41  ;;  %4998 = vmatpush3.msra.mxu0 %v2422_v43 }
 0x72f   :  { %4999 = vmatprep.subr.mxu0 %v5568_v54 }
 0x731   :  { %v2341_v45 = vpop.permute.xlu1 %2340  ;;  %v2303_v50 = vpop.xlane.xlu0 %2302 }
 0x732   :  { %v2307_v13 = vsub.f32 %v2288_v17, %v2303_v50 }
 0x734   :  { %v2314_v52 = vmul.f32 1.442695, %v2307_v13 }
 0x735   :  { %v2420_v5 = vpop.permute.xlu1 %2419  ;;  %v2343_v51 = vpop.permute.xlu0 %2342 }
 0x736   :  { %4991 = vmatpush3.msra.mxu1 %v2343_v51  ;;  %5000 = vmatpush3.msra.mxu0 %v2420_v5  ;;  %5295 = vpow2.f32 %v2314_v52 }
 0x737   :  { %4992 = vmatprep.subr.mxu1 %v5568_v54  ;;  %5011 = vmatprep.subr.mxu0 %v5568_v54 }
 0x738   :  { %4993 = vmatpush3.msra.mxu1 %v2341_v45 }
 0x739   :  { %5004 = vmatprep.subr.mxu1 %v5568_v54  ;;  %v2501_v53 = vpop.permute.xlu0 %2500 }
 0x73b   :  { %v5294_v7 = vpop.eup %5293 }
 0x73c   :  { %v2319_v9 = vsel %vm927_vm2, %v5294_v7, 0.0 }
 0x73d   :  { %2320 = vadd.xlane.f32.xlu1 %v2319_v9  ;;  %v2499_v55 = vpop.permute.xlu0 %2498 }
 0x741   :  { %v2661_v56 = vpop.permute.xlu0 %2660 }
 0x743   :  { %v6115_v57 = vpop.eup %5295 }
 0x744   :  { %v2325_v63 = vsel %vm927_vm2, %v6115_v57, 0.0 }
 0x745   :  { %v2659_v3 = vpop.permute.xlu0 %2658 }
 0x74e   :  { %2738 = vrot.lane.b32.xlu1 %v5784_v14, %s5571_s8 }
 0x772   :  { %2326 = vadd.xlane.f32.xlu1 %v2325_v63 }
 0x776   :  { %v2318_v4 = vpop.xlane.xlu0 %2317 }
 0x777   :  { %5297 = vrcp.f32 %v2318_v4 }
 0x77a   :  { %v2324_v8 = vpop.xlane.xlu0 %2323 }
 0x77b   :  { %5299 = vrcp.f32 %v2324_v8 }
 0x77e   :  { %v2657_v23 = vpop.permute.xlu0 %2656 }
 0x783   :  { %2906 = vrot.lane.b32.xlu1 %v5776_v12, %s5571_s8  ;;  %v1638_v12 = vadd.f32 %v6012_v6, %v5892_v36  ;;  %v2825_v36 = vpop.permute.xlu0 %2824  ;;  %v2580_v6 = vpop.permute.xlu1 %2579 }
 0x784   :  { %v5298_v14 = vpop.eup %5297 }
 0x785   :  { %v2332_v17 = vmul.f32 %v5298_v14, %v5290_v59  ;;  %v1637_v59 = vadd.f32 %v6032_v35, %v5894_v18  ;;  %v1639_v18 = vadd.f32 %v6040_v39, %v5923_v42 }
 0x787   :  { %2904 = vrot.lane.b32.xlu1 %v5792_v15, %s5571_s8  ;;  %v6125_v19 = vadd.f32 %v2332_v17, %v1636_v11  ;;  %4995 = vmatmul.mubr.msk.f32.vlgmr.msra.gmra.mxu1 %vm927_vm2, %v2332_v17  ;;  %v2823_v2 = vpop.permute.xlu0 %2822  ;;  %v2578_v26 = vpop.permute.xlu1 %2577 }
 0x788   :  { %v5300_v20 = vpop.eup %5299  ;;  %5005 = vmatpush3.msra.mxu1 %v2501_v53  ;;  %5008 = vmatprep.mubr.msk.f32.mxu1 %vm5569_vm0, %v5568_v54 }
 0x789   :  { %5006 = vmatprep.subr.mxu1 %v5568_v54  ;;  %v2334_v28 = vmul.f32 %v5300_v20, %v5292_v40 }
 0x78a   :  { %5007 = vmatpush3.msra.mxu1 %v2499_v55 }
 0x78b   :  { %5018 = vmatprep.subr.mxu1 %v5568_v54  ;;  %2902 = vrot.lane.b32.xlu1 %v5803_v16, %s5571_s8  ;;  %v6136_v15 = vadd.f32 %v2334_v28, %v1638_v12  ;;  %v2821_v16 = vpop.permute.xlu0 %2820  ;;  %v2743_v33 = vpop.permute.xlu1 %2742 }
 0x78c   :  { %5009 = vmatmul.mubr.msk.f32.vlgmr.msra.gmra.mxu1 %vm927_vm2, %v2334_v28 }
 0x78d   :  { %5019 = vmatpush3.xpose.msk.msra.mxu1 %vm610_vm1, %v2661_v56  ;;  %5022 = vmatprep.mubr.msk.f32.mxu1 %vm5569_vm0, %v5568_v54 }
 0x78e   :  { %5020 = vmatprep.subr.mxu1 %v5568_v54 }
 0x78f   :  { %v2741_v34 = vpop.permute.xlu1 %2740 }
 0x791   :  { %5021 = vmatpush3.xpose.msk.msra.mxu1 %vm610_vm1, %v2659_v3 }
 0x792   :  { %5032 = vmatprep.subr.mxu1 %v5568_v54 }
 0x794   :  { %5023 = vmatmul.mubr.msk.f32.vlgmr.msra.gmra.mxu1 %vm610_vm1, %v2657_v23 }
 0x795   :  { %5033 = vmatpush3.xpose.msk.msra.mxu1 %vm610_vm1, %v2825_v36  ;;  %5036 = vmatprep.mubr.msk.f32.mxu1 %vm5569_vm0, %v5568_v54 }
 0x796   :  { %5034 = vmatprep.subr.mxu1 %v5568_v54 }
 0x799   :  { %5035 = vmatpush3.xpose.msk.msra.mxu1 %vm610_vm1, %v2823_v2 }
 0x79a   :  { %5046 = vmatprep.subr.mxu1 %v5568_v54 }
 0x79c   :  { %5037 = vmatmul.mubr.msk.f32.vlgmr.msra.gmra.mxu1 %vm610_vm1, %v2821_v16 }
 0x79d   :  { %5050 = vmatprep.mubr.msk.f32.mxu1 %vm5569_vm0, %v5568_v54 }
 0x7c6   :  { %v2321_v32 = vpop.xlane.xlu1 %2320 }
 0x7c7   :  { %5301 = vrcp.f32 %v2321_v32 }
 0x7ca   :  { %v2739_v10 = vpop.permute.xlu1 %2738 }
 0x7d4   :  { %v5302_v37 = vpop.eup %5301 }
 0x7d5   :  { %v2333_v38 = vmul.f32 %v5302_v37, %v5294_v7 }
 0x7d7   :  { %v6157_v40 = vadd.f32 %v2333_v38, %v1637_v59  ;;  %5002 = vmatmul.mubr.msk.f32.vlgmr.msra.gmra.mxu0 %vm927_vm2, %v2333_v38 }
 0x7d8   :  { %5012 = vmatpush3.msra.mxu0 %v2580_v6  ;;  %5015 = vmatprep.mubr.msk.f32.mxu0 %vm5569_vm0, %v5568_v54 }
 0x7d9   :  { %5013 = vmatprep.subr.mxu0 %v5568_v54 }
 0x7da   :  { %5014 = vmatpush3.msra.mxu0 %v2578_v26 }
 0x7db   :  { %5025 = vmatprep.subr.mxu0 %v5568_v54 }
 0x7fb   :  { %v2327_v61 = vpop.xlane.xlu1 %2326 }
 0x7fc   :  { %5303 = vrcp.f32 %v2327_v61  ;;  %v5120_v61 = vpack.i.bf16 %v6070_v1, %v6062_v47 }
 0x7ff   :  { %v2907_v43 = vpop.permute.xlu1 %2906 }
 0x803   :  { %v2905_v42 = vpop.permute.xlu1 %2904 }
 0x807   :  { %v2903_v39 = vpop.permute.xlu1 %2902 }
 0x809   :  { %v5304_v0 = vpop.eup %5303 }
 0x80a   :  { %v2335_v35 = vmul.f32 %v5304_v0, %v6115_v57 }
 0x80c   :  { %v6167_v41 = vadd.f32 %v2335_v35, %v1639_v18  ;;  %5016 = vmatmul.mubr.msk.f32.vlgmr.msra.gmra.mxu0 %vm927_vm2, %v2335_v35 }
 0x80d   :  { %5026 = vmatpush3.xpose.msk.msra.mxu0 %vm610_vm1, %v2743_v33  ;;  %5029 = vmatprep.mubr.msk.f32.mxu0 %vm5569_vm0, %v5568_v54 }
 0x80e   :  { %5027 = vmatprep.subr.mxu0 %v5568_v54 }
 0x811   :  { %5028 = vmatpush3.xpose.msk.msra.mxu0 %vm610_vm1, %v2741_v34 }
 0x812   :  { %5039 = vmatprep.subr.mxu0 %v5568_v54 }
 0x814   :  { %5030 = vmatmul.mubr.msk.f32.vlgmr.msra.gmra.mxu0 %vm610_vm1, %v2739_v10 }
 0x815   :  { %5040 = vmatpush3.xpose.msk.msra.mxu0 %vm610_vm1, %v2907_v43  ;;  %5043 = vmatprep.mubr.msk.f32.mxu0 %vm5569_vm0, %v5568_v54 }
 0x816   :  { %5041 = vmatprep.subr.mxu0 %v5568_v54 }
 0x819   :  { %5042 = vmatpush3.xpose.msk.msra.mxu0 %vm610_vm1, %v2905_v42 }
 0x81a   :  { %5053 = vmatprep.subr.mxu0 %v5568_v54 }
 0x81c   :  { %5044 = vmatmul.mubr.msk.f32.vlgmr.msra.gmra.mxu0 %vm610_vm1, %v2903_v39 }
 0x81d   :  { %5057 = vmatprep.mubr.msk.f32.mxu0 %vm5569_vm0, %v5568_v54 }
 0x847   :  { %v2415_v45 = vpop.f32.mrf.mxu1 }
 0x849   :  { %v4996_v50 = vpop.f32.mrf.mxu1 }
 0x84c   :  { %v6186_v5 = vpop.f32.mrf.mxu1 }
 0x84e   :  { %v5010_v51 = vpop.f32.mrf.mxu1 }
 0x854   :  { %v2734_v7 = vpop.f32.mrf.mxu1 }
 0x855   :  { %v2984_v9 = vsel %vm927_vm2, %v2734_v7, -inf }
 0x856   :  { %2985 = vmax.xlane.f32.xlu0 %v2984_v9  ;;  %v5024_v13 = vpop.f32.mrf.mxu1 }
 0x85c   :  { %v2898_v52 = vpop.f32.mrf.mxu1 }
 0x85d   :  { %v2990_v53 = vsel %vm927_vm2, %v2898_v52, -inf }
 0x85e   :  { %2991 = vmax.xlane.f32.xlu0 %v2990_v53  ;;  %v5038_v55 = vpop.f32.mrf.mxu1 }
 0x897   :  { %v2494_v56 = vpop.f32.mrf.mxu0 }
 0x899   :  { %v5003_v57 = vpop.f32.mrf.mxu0 }
 0x8cc   :  { %v6190_v63 = vpop.f32.mrf.mxu0 }
 0x8cd   :  { %v5130_v0 = vpack.i.bf16 %v6190_v63, %v6186_v5 }
 0x8ce   :  { %v5017_v3 = vpop.f32.mrf.mxu0 }
 0x8cf   :  { %v5169_v3 = vld [vmem:[#allocation13 + $0x38] sm:$0xff]  }
 0x8d4   :  { %v2816_v4 = vpop.f32.mrf.mxu0 }
 0x8d5   :  { %v2987_v8 = vsel %vm927_vm2, %v2816_v4, -inf }
 0x8d6   :  { %2988 = vmax.xlane.f32.xlu1 %v2987_v8  ;;  %v5031_v14 = vpop.f32.mrf.mxu0  ;;  %v5172_v8 = vld [vmem:[#allocation13 + $0x20] sm:$0xff]  }
 0x8dc   :  { %v2980_v11 = vpop.f32.mrf.mxu0 }
 0x8dd   :  { %v2993_v17 = vsel %vm927_vm2, %v2980_v11, -inf }
 0x8de   :  { %2994 = vmax.xlane.f32.xlu0 %v2993_v17  ;;  %v5045_v20 = vpop.f32.mrf.mxu0 }
 0x8df   :  { %v2986_v12 = vpop.xlane.xlu0 %2985 }
 0x8e0   :  { %v2996_v23 = vsub.f32 %v2734_v7, %v2986_v12  ;;  %v5174_v12 = vld [vmem:[#allocation13 + $0x10] sm:$0xff]  }
 0x8e2   :  { %v3000_v36 = vmul.f32 1.442695, %v2996_v23  ;;  %v5175_v23 = vld [vmem:[#allocation13 + $0x8] sm:$0xff]  }
 0x8e4   :  { %5305 = vpow2.f32 %v3000_v36 }
 0x8e7   :  { %3113 = vrot.lane.b32.xlu1 %v5819_v22, %s5571_s8  ;;  %v2992_v28 = vpop.xlane.xlu0 %2991 }
 0x8e8   :  { %v2998_v22 = vsub.f32 %v2898_v52, %v2992_v28  ;;  %v5176_v28 = vld [vmem:[#allocation13] sm:$0xff]  }
 0x8ea   :  { %v3004_v2 = vmul.f32 1.442695, %v2998_v22 }
 0x8eb   :  { %3032 = vrot.lane.b32.xlu1 %v5822_v24, %s5571_s8 }
 0x8ec   :  { %5307 = vpow2.f32 %v3004_v2 }
 0x8ef   :  { %3111 = vrot.lane.b32.xlu1 %v5816_v21, %s5571_s8 }
 0x8f1   :  { %v5306_v24 = vpop.eup %5305 }
 0x8f2   :  { %v3008_v21 = vsel %vm927_vm2, %v5306_v24, 0.0 }
 0x8f3   :  { %3271 = vrot.lane.b32.xlu1 %v5842_v31, %s5571_s8 }
 0x8f4   :  { %3034 = vrot.lane.b32.xlu0 %v5825_v25, %s5571_s8  ;;  %v5125_v25 = vpack.i.bf16 %v2494_v56, %v2415_v45 }
 0x8f8   :  { %3192 = vrot.lane.b32.xlu0 %v5882_v30, %s5571_s8 }
 0x8f9   :  { %v5308_v16 = vpop.eup %5307 }
 0x8fa   :  { %v3014_v31 = vsel %vm927_vm2, %v5308_v16, 0.0 }
 0x917   :  { %3009 = vadd.xlane.f32.xlu0 %v3008_v21 }
 0x91b   :  { %3015 = vadd.xlane.f32.xlu0 %v3014_v31 }
 0x931   :  { %3190 = vrot.lane.b32.xlu0 %v5839_v29, %s5571_s8 }
 0x935   :  { %5116 = vrot.lane.b32.xlu0 %v5115_v62, %s5571_s8 }
 0x939   :  { %5126 = vrot.lane.b32.xlu0 %v5125_v25, %s5557_s29 }
 0x95f   :  { %v2989_v30 = vpop.xlane.xlu1 %2988 }
 0x960   :  { %v2997_v6 = vsub.f32 %v2816_v4, %v2989_v30  ;;  %v5171_v4 = vld [vmem:[#allocation13 + $0x28] sm:$0xff]  }
 0x962   :  { %v3002_v26 = vmul.f32 1.442695, %v2997_v6 }
 0x963   :  { %v3114_v33 = vpop.permute.xlu1 %3113 }
 0x964   :  { %5309 = vpow2.f32 %v3002_v26  ;;  %5054 = vmatpush3.msra.mxu0 %v3114_v33 }
 0x965   :  { %5055 = vmatprep.subr.mxu0 %v5568_v54 }
 0x967   :  { %v3033_v34 = vpop.permute.xlu1 %3032  ;;  %v2995_v32 = vpop.xlane.xlu0 %2994 }
 0x968   :  { %v2999_v37 = vsub.f32 %v2980_v11, %v2995_v32 }
 0x96a   :  { %v3006_v29 = vmul.f32 1.442695, %v2999_v37 }
 0x96b   :  { %v3112_v59 = vpop.permute.xlu1 %3111  ;;  %v3035_v38 = vpop.permute.xlu0 %3034 }
 0x96c   :  { %5311 = vpow2.f32 %v3006_v29  ;;  %5047 = vmatpush3.msra.mxu1 %v3035_v38  ;;  %5056 = vmatpush3.msra.mxu0 %v3112_v59 }
 0x96d   :  { %5048 = vmatprep.subr.mxu1 %v5568_v54  ;;  %5067 = vmatprep.subr.mxu0 %v5568_v54 }
 0x96e   :  { %5049 = vmatpush3.msra.mxu1 %v3033_v34 }
 0x96f   :  { %5060 = vmatprep.subr.mxu1 %v5568_v54  ;;  %v3193_v18 = vpop.permute.xlu0 %3192  ;;  %v3272_v51 = vpop.permute.xlu1 %3271 }
 0x971   :  { %v5310_v44 = vpop.eup %5309 }
 0x972   :  { %v3011_v58 = vsel %vm927_vm2, %v5310_v44, 0.0 }
 0x973   :  { %3012 = vadd.xlane.f32.xlu1 %v3011_v58 }
 0x979   :  { %v5312_v62 = vpop.eup %5311 }
 0x97a   :  { %v3017_v10 = vsel %vm927_vm2, %v5312_v62, 0.0 }
 0x97b   :  { %3018 = vadd.xlane.f32.xlu1 %v3017_v10 }
 0x98c   :  { %3269 = vrot.lane.b32.xlu1 %v5834_v27, %s5571_s8 }
 0x990   :  { %5121 = vrot.lane.b32.xlu1 %v5120_v61, %s5571_s8 }
 0x994   :  { %5131 = vrot.lane.b32.xlu1 %v5130_v0, %s5557_s29 }
 0x9a0   :  { %v3010_v35 = vpop.xlane.xlu0 %3009 }
 0x9a1   :  { %5313 = vrcp.f32 %v3010_v35 }
 0x9a4   :  { %v3016_v43 = vpop.xlane.xlu0 %3015 }
 0x9a5   :  { %5315 = vrcp.f32 %v3016_v43 }
 0x9a8   :  { %v3191_v47 = vpop.permute.xlu0 %3190 }
 0x9ac   :  { %v5117_v31 = vpop.permute.xlu0 %5116 }
 0x9ad   :  { %v5119_v30 = vunpack.i.h.bf16 %v5117_v31  ;;  %v5118_v6 = vunpack.i.l.bf16 %v5117_v31 }
 0x9ae   :  { %v5314_v42 = vpop.eup %5313 }
 0x9af   :  { %v3024_v39 = vmul.f32 %v5314_v42, %v5306_v24  ;;  %v3405_v37 = vsel %vm610_vm1, %v5948_v49, %v5119_v30  ;;  %v3404_v29 = vsel %vm610_vm1, %v5944_v46, %v5118_v6 }
 0x9b0   :  { %v5127_v25 = vpop.permute.xlu0 %5126 }
 0x9b1   :  { %v3028_v45 = vadd.f32 %v3024_v39, %v6125_v19  ;;  %5051 = vmatmul.mubr.msk.f32.vlgmr.msra.gmra.mxu1 %vm927_vm2, %v3024_v39  ;;  %v5129_v33 = vunpack.i.h.bf16 %v5127_v25  ;;  %v5128_v34 = vunpack.i.l.bf16 %v5127_v25 }
 0x9b2   :  { %v5316_v27 = vpop.eup %5315  ;;  %5061 = vmatpush3.msra.mxu1 %v3193_v18  ;;  %5064 = vmatprep.mubr.msk.f32.mxu1 %vm5569_vm0, %v5568_v54 }
 0x9b3   :  { %v3348_v1 = vmul.f32 0.25, %v3028_v45  ;;  %5062 = vmatprep.subr.mxu1 %v5568_v54  ;;  %v3026_v50 = vmul.f32 %v5316_v27, %v5308_v16  ;;  %v3410_v58 = vsel %vm3408_vm3, %v3405_v37, %v5129_v33  ;;  %v5185_v33 = vld [vmem:[#allocation14 + $0xc4] ss:$16 sps:$4 sm:$0xff]   ;;  %v5186_v37 = vld [vmem:[#allocation14 + $0xc8] ss:$16 sps:$4 sm:$0xff]  }
 0x9b4   :  { %5063 = vmatpush3.msra.mxu1 %v3191_v47 }
 0x9b5   :  { %3352 = vst.msk [vmem:[%s6360_s20] sm:$0xff] %vm927_vm2, %v3348_v1  ;;  %v3030_v19 = vadd.f32 %v3026_v50, %v6136_v15  ;;  %5065 = vmatmul.mubr.msk.f32.vlgmr.msra.gmra.mxu1 %vm927_vm2, %v3026_v50  ;;  %5074 = vmatprep.subr.bf16.mxu1 %v5169_v3 }
 0x9b6   :  { %5075 = vmatpush3.bf16.msra.mxu1 %v5169_v3 }
 0x9b7   :  { %v3350_v5 = vmul.f32 0.25, %v3030_v19 }
 0x9b9   :  { %3354 = vst.msk [vmem:[%s6360_s20 + $0x10] sm:$0xff] %vm927_vm2, %v3350_v5 }
 0x9fc   :  { %v3013_v7 = vpop.xlane.xlu1 %3012 }
 0x9fd   :  { %5317 = vrcp.f32 %v3013_v7 }
 0xa04   :  { %v3019_v9 = vpop.xlane.xlu1 %3018 }
 0xa05   :  { %5319 = vrcp.f32 %v3019_v9 }
 0xa08   :  { %v3270_v15 = vpop.permute.xlu1 %3269 }
 0xa0a   :  { %v5318_v13 = vpop.eup %5317 }
 0xa0b   :  { %v3025_v52 = vmul.f32 %v5318_v13, %v5310_v44  ;;  %v3409_v44 = vsel %vm3408_vm3, %v3404_v29, %v5128_v34  ;;  %v5188_v34 = vld [vmem:[#allocation14 + $0xcc] ss:$16 sps:$4 sm:$0xff]   ;;  %v5191_v29 = vld [vmem:[#allocation14 + $0xa4] ss:$16 sps:$4 sm:$0xff]  }
 0xa0c   :  { %v5122_v26 = vpop.permute.xlu1 %5121 }
 0xa0d   :  { %v3029_v53 = vadd.f32 %v3025_v52, %v6157_v40  ;;  %5058 = vmatmul.mubr.msk.f32.vlgmr.msra.gmra.mxu0 %vm927_vm2, %v3025_v52  ;;  %v5124_v18 = vunpack.i.h.bf16 %v5122_v26  ;;  %v5123_v35 = vunpack.i.l.bf16 %v5122_v26  ;;  %v5337_v52 = vld [vmem:[#allocation2] sm:$0xff] }
 0xa0e   :  { %5068 = vmatpush3.msra.mxu0 %v3272_v51  ;;  %5071 = vmatprep.mubr.msk.f32.mxu0 %vm5569_vm0, %v5568_v54 }
 0xa0f   :  { %v3349_v55 = vmul.f32 0.25, %v3029_v53  ;;  %5069 = vmatprep.subr.mxu0 %v5568_v54  ;;  %v5170_v54 = vld [vmem:[#allocation13 + $0x30] sm:$0xff]   ;;  %v3407_v46 = vsel %vm610_vm1, %v5952_v60, %v5124_v18  ;;  %v3406_v39 = vsel %vm610_vm1, %v5946_v48, %v5123_v35  ;;  %v4508_v60 = vld [vmem:[%s6350_s10] ss:$0 sm:$0xff]  ;;  %v5204_v35 = vld [vmem:[#allocation14 + $0x68] ss:$16 sps:$4 sm:$0xff]  }
 0xa10   :  { %5070 = vmatpush3.msra.mxu0 %v3270_v15  ;;  %5076 = vmatprep.subr.bf16.mxu1 %v5170_v54  ;;  %v5203_v18 = vld [vmem:[#allocation14 + $0x64] ss:$16 sps:$4 sm:$0xff]  }
 0xa11   :  { %3353 = vst.msk [vmem:[%s6360_s20 + $0x8] sm:$0xff] %vm927_vm2, %v3349_v55  ;;  %5077 = vmatpush3.bf16.msra.mxu1 %v5170_v54  ;;  %v5340_v54 = vld [vmem:[#allocation2 + $0x18] sm:$0xff] }
 0xa12   :  { %v5320_v56 = vpop.eup %5319  ;;  %5078 = vmatprep.subr.bf16.mxu1 %v5171_v4 }
 0xa13   :  { %v3027_v57 = vmul.f32 %v5320_v56, %v5312_v62  ;;  %v5132_v62 = vpop.permute.xlu1 %5131  ;;  %v5338_v56 = vld [vmem:[#allocation2 + $0x10] sm:$0xff] }
 0xa14   :  { %v5134_v43 = vunpack.i.h.bf16 %v5132_v62  ;;  %v5133_v42 = vunpack.i.l.bf16 %v5132_v62  ;;  %v5200_v62 = vld [vmem:[#allocation14 + $0x8c] ss:$16 sps:$4 sm:$0xff]  }
 0xa15   :  { %v3031_v40 = vadd.f32 %v3027_v57, %v6167_v41  ;;  %5072 = vmatmul.mubr.msk.f32.vlgmr.msra.gmra.mxu0 %vm927_vm2, %v3027_v57  ;;  %5079 = vmatpush3.bf16.msra.mxu1 %v5171_v4  ;;  %v5173_v41 = vld [vmem:[#allocation13 + $0x18] sm:$0xff]  }
 0xa16   :  { %5080 = vmatprep.subr.bf16.mxu1 %v5172_v8  ;;  %v3411_v47 = vsel %vm3408_vm3, %v3406_v39, %v5133_v42  ;;  %v3412_v1 = vsel %vm3408_vm3, %v3407_v46, %v5134_v43  ;;  %v5206_v43 = vld [vmem:[#allocation14 + $0x6c] ss:$16 sps:$4 sm:$0xff]   ;;  %v5209_v42 = vld [vmem:[#allocation14 + $0x44] ss:$16 sps:$4 sm:$0xff]   ;;  %v5207_v46 = vld [vmem:[#allocation14 + $0x40] ss:$16 sps:$4 sm:$0xff]  }
 0xa17   :  { %v3351_v63 = vmul.f32 0.25, %v3031_v40  ;;  %v5210_v39 = vld [vmem:[#allocation14 + $0x48] ss:$16 sps:$4 sm:$0xff]  }
 0xa19   :  { %3355 = vst.msk [vmem:[%s6360_s20 + $0x18] sm:$0xff] %vm927_vm2, %v3351_v63  ;;  %5081 = vmatpush3.bf16.msra.mxu1 %v5172_v8  ;;  %v5339_v63 = vld [vmem:[#allocation2 + $0x8] sm:$0xff]  ;;  %v5177_v8 = vld [vmem:[#allocation14 + $0xe0] ss:$16 sps:$4 sm:$0xff]  }
 0xa1a   :  { %5082 = vmatprep.subr.bf16.mxu1 %v5173_v41 }
 0xa1d   :  { %5083 = vmatpush3.bf16.msra.mxu1 %v5173_v41  ;;  %v5179_v41 = vld [vmem:[#allocation14 + $0xe4] ss:$16 sps:$4 sm:$0xff]  }
 0xa1e   :  { %5084 = vmatprep.subr.bf16.mxu1 %v5174_v12  ;;  %3827 = vmatprep.subr.bf16.mxu0 %v5179_v41  ;;  %v4517_v41 = vld [vmem:[%s6351_s11] ss:$0 sm:$0xff] }
 0xa1f   :  { %3828 = vmatpush1.bf16.msra.mxu0 %v5177_v8 }
 0xa20   :  { %3829 = vmatprep.subr.bf16.mxu0 %v5185_v33  ;;  %v5230_v33 = vld [vmem:[#allocation16 + $0xf0] sm:$0xff]  }
 0xa21   :  { %5085 = vmatpush3.bf16.msra.mxu1 %v5174_v12 }
 0xa22   :  { %5086 = vmatprep.subr.bf16.mxu1 %v5175_v23 }
 0xa25   :  { %5087 = vmatpush3.bf16.msra.mxu1 %v5175_v23 }
 0xa26   :  { %5088 = vmatprep.subr.bf16.mxu1 %v5176_v28 }
 0xa29   :  { %5089 = vmatpush3.bf16.msra.mxu1 %v5176_v28 }
 0xa71   :  { %v3107_v14 = vpop.f32.mrf.mxu1 }
 0xa73   :  { %v5052_v11 = vpop.f32.mrf.mxu1 }
 0xa74   :  { %v5182_v11 = vld [vmem:[#allocation14 + $0xec] ss:$16 sps:$4 sm:$0xff]  }
 0xa75   :  { %v3265_v17 = vpop.f32.mrf.mxu1  ;;  %3880 = vmatprep.subr.bf16.mxu1 %v5182_v11 }
 0xa77   :  { %v5066_v20 = vpop.f32.mrf.mxu1 }
 0xacd   :  { %v3186_v36 = vpop.f32.mrf.mxu0 }
 0xace   :  { %v5135_v22 = vpack.i.bf16 %v3186_v36, %v3107_v14  ;;  %v5180_v14 = vld [vmem:[#allocation14 + $0xe8] ss:$16 sps:$4 sm:$0xff]  }
 0xacf   :  { %v5059_v2 = vpop.f32.mrf.mxu0 }
 0xad0   :  { %5136 = vrot.lane.b32.xlu0 %v5135_v22, %s5570_s30 }
 0xad5   :  { %v3344_v24 = vpop.f32.mrf.mxu0 }
 0xad6   :  { %v5140_v21 = vpack.i.bf16 %v3344_v24, %v3265_v17 }
 0xad7   :  { %v5073_v16 = vpop.f32.mrf.mxu0 }
 0xad8   :  { %5141 = vrot.lane.b32.xlu1 %v5140_v21, %s5570_s30 }
 0xb42   :  { %v5137_v32 = vpop.permute.xlu0 %5136 }
 0xb43   :  { %v5139_v59 = vunpack.i.h.bf16 %v5137_v32  ;;  %v5138_v38 = vunpack.i.l.bf16 %v5137_v32  ;;  %v5183_v32 = vld [vmem:[#allocation14 + $0xc0] ss:$16 sps:$4 sm:$0xff]  }
 0xb44   :  { %3830 = vmatpush1.bf16.msra.mxu0 %v5183_v32 }
 0xb45   :  { %v3414_v10 = vsel %vm3413_vm4, %v3409_v44, %v5138_v38  ;;  %v3415_v61 = vsel %vm3413_vm4, %v3410_v58, %v5139_v59  ;;  %v5194_v59 = vld [vmem:[#allocation14 + $0xac] ss:$16 sps:$4 sm:$0xff]   ;;  %v5189_v38 = vld [vmem:[#allocation14 + $0xa0] ss:$16 sps:$4 sm:$0xff]   ;;  %v5192_v44 = vld [vmem:[#allocation14 + $0xa8] ss:$16 sps:$4 sm:$0xff]   ;;  %3831 = vmatprep.subr.bf16.mxu0 %v5191_v29 }
 0xb46   :  { %v3418_v0 = vpack.c.bf16 %v3415_v61, %v3414_v10  ;;  %v5197_v58 = vld [vmem:[#allocation14 + $0x84] ss:$16 sps:$4 sm:$0xff]   ;;  %v5195_v10 = vld [vmem:[#allocation14 + $0x80] ss:$16 sps:$4 sm:$0xff]   ;;  %v5198_v61 = vld [vmem:[#allocation14 + $0x88] ss:$16 sps:$4 sm:$0xff]  }
 0xb47   :  { %v5234_v29 = vld [vmem:[#allocation16 + $0xe8] sm:$0xff]  }
 0xb48   :  { %5090 = vmatprep.mubr.bf16.mxu1 %v3418_v0  ;;  %3832 = vmatpush1.bf16.msra.mxu0 %v5189_v38  ;;  %v5201_v0 = vld [vmem:[#allocation14 + $0x60] ss:$16 sps:$4 sm:$0xff]  }
 0xb49   :  { %3833 = vmatprep.subr.bf16.mxu0 %v5197_v58  ;;  %v5236_v58 = vld [vmem:[#allocation16 + $0xa8] sm:$0xff]  }
 0xb4a   :  { %v5142_v49 = vpop.permute.xlu1 %5141 }
 0xb4b   :  { %v5144_v45 = vunpack.i.h.bf16 %v5142_v49  ;;  %v5143_v27 = vunpack.i.l.bf16 %v5142_v49  ;;  %v5212_v49 = vld [vmem:[#allocation14 + $0x4c] ss:$16 sps:$4 sm:$0xff]  }
 0xb4c   :  { %3834 = vmatpush1.bf16.msra.mxu0 %v5195_v10  ;;  %v5238_v10 = vld [vmem:[#allocation16 + $0xe0] sm:$0xff]  }
 0xb4d   :  { %v3417_v50 = vsel %vm3413_vm4, %v3412_v1, %v5144_v45  ;;  %v3416_v19 = vsel %vm3413_vm4, %v3411_v47, %v5143_v27  ;;  %3835 = vmatprep.subr.bf16.mxu0 %v5203_v18  ;;  %v5215_v45 = vld [vmem:[#allocation14 + $0x24] ss:$16 sps:$4 sm:$0xff]   ;;  %v5218_v27 = vld [vmem:[#allocation14 + $0x2c] ss:$16 sps:$4 sm:$0xff]   ;;  %v5572_v47 = vmov 0  }
 0xb4e   :  { %v3419_v5 = vpack.c.bf16 %v3417_v50, %v3416_v19  ;;  %3859 = vmatprep.mubr.bf16.mxu0 %v5572_v47  ;;  %v5213_v1 = vld [vmem:[#allocation14 + $0x20] ss:$16 sps:$4 sm:$0xff]   ;;  %v5216_v50 = vld [vmem:[#allocation14 + $0x28] ss:$16 sps:$4 sm:$0xff]   ;;  %v5221_v19 = vld [vmem:[#allocation14 + $0x4] ss:$16 sps:$4 sm:$0xff]  }
 0xb4f   :  { %v5241_v18 = vld [vmem:[#allocation16 + $0x58] sm:$0xff]  }
 0xb50   :  { %5091 = vmatmul.mubr.bf16.vlgmr.msra.gmra.mxu1 %v3419_v5  ;;  %3836 = vmatpush1.bf16.msra.mxu0 %v5201_v0  ;;  %v5224_v5 = vld [vmem:[#allocation14 + $0xc] ss:$16 sps:$4 sm:$0xff]   ;;  %v5240_v0 = vld [vmem:[#allocation16 + $0xa0] sm:$0xff]  }
 0xb51   :  { %3881 = vmatpush1.bf16.msra.mxu1 %v5180_v14  ;;  %3837 = vmatprep.subr.bf16.mxu0 %v5209_v42  ;;  %v5244_v42 = vld [vmem:[#allocation16 + $0x98] sm:$0xff]  }
 0xb52   :  { %3882 = vmatprep.subr.bf16.mxu1 %v5188_v34  ;;  %3912 = vmatprep.mubr.bf16.mxu1 %v5572_v47 }
 0xb54   :  { %3838 = vmatpush1.bf16.msra.mxu0 %v5207_v46  ;;  %v5246_v46 = vld [vmem:[#allocation16 + $0xd0] sm:$0xff]  }
 0xb55   :  { %3883 = vmatpush1.bf16.msra.mxu1 %v5186_v37  ;;  %3839 = vmatprep.subr.bf16.mxu0 %v5215_v45  ;;  %v5232_v37 = vld [vmem:[#allocation16 + $0xb0] sm:$0xff]  }
 0xb56   :  { %3884 = vmatprep.subr.bf16.mxu1 %v5194_v59  ;;  %v5248_v45 = vld [vmem:[#allocation16 + $0x90] sm:$0xff]  }
 0xb58   :  { %3840 = vmatpush1.bf16.msra.mxu0 %v5213_v1  ;;  %v5251_v1 = vld [vmem:[#allocation16 + $0x8] sm:$0xff]  }
 0xb59   :  { %3885 = vmatpush1.bf16.msra.mxu1 %v5192_v44  ;;  %3841 = vmatprep.subr.bf16.mxu0 %v5221_v19  ;;  %v5235_v44 = vld [vmem:[#allocation16 + $0x28] sm:$0xff]   ;;  %v5253_v19 = vld [vmem:[#allocation16 + $0x40] sm:$0xff]  }
 0xb5a   :  { %3886 = vmatprep.subr.bf16.mxu1 %v5200_v62  ;;  %v5237_v62 = vld [vmem:[#allocation16 + $0x60] sm:$0xff]  }
 0xb5d   :  { %3887 = vmatpush1.bf16.msra.mxu1 %v5198_v61  ;;  %v5239_v61 = vld [vmem:[#allocation16 + $0x20] sm:$0xff]  }
 0xb5e   :  { %3888 = vmatprep.subr.bf16.mxu1 %v5206_v43  ;;  %v5243_v43 = vld [vmem:[#allocation16 + $0x18] sm:$0xff]  }
 0xb61   :  { %3889 = vmatpush1.bf16.msra.mxu1 %v5204_v35  ;;  %v5242_v35 = vld [vmem:[#allocation16 + $0xd8] sm:$0xff]  }
 0xb62   :  { %3890 = vmatprep.subr.bf16.mxu1 %v5212_v49  ;;  %v5245_v49 = vld [vmem:[#allocation16 + $0x50] sm:$0xff]  }
 0xb65   :  { %3891 = vmatpush1.bf16.msra.mxu1 %v5210_v39  ;;  %v5247_v39 = vld [vmem:[#allocation16 + $0x10] sm:$0xff]  }
 0xb66   :  { %3892 = vmatprep.subr.bf16.mxu1 %v5218_v27  ;;  %v5249_v27 = vld [vmem:[#allocation16 + $0x48] sm:$0xff]  }
 0xb69   :  { %3893 = vmatpush1.bf16.msra.mxu1 %v5216_v50  ;;  %v5252_v50 = vld [vmem:[#allocation16 + $0x88] sm:$0xff]  }
 0xb6a   :  { %3894 = vmatprep.subr.bf16.mxu1 %v5224_v5  ;;  %v5254_v5 = vld [vmem:[#allocation16 + $0xc0] sm:$0xff]  }
 0xc10   :  { %v5092_v51 = vpop.f32.mrf.mxu1 }
 0xc11   :  { %v3534_v13 = vadd.f32 %v5092_v51, %v4508_v60  ;;  %v5219_v51 = vld [vmem:[#allocation14] ss:$16 sps:$4 sm:$0xff]  }
 0xc12   :  { %v3525_v7 = vpop.f32.mrf.mxu1  ;;  %3842 = vmatpush1.bf16.msra.mxu0 %v5219_v51  ;;  %v5255_v51 = vld [vmem:[#allocation16] sm:$0xff]  }
 0xc13   :  { %v3526_v9 = vadd.f32 %v4508_v60, %v3525_v7  ;;  %v3542_v57 = vadd.f32 %v5338_v56, %v3534_v13  ;;  %v5225_v7 = vld [vmem:[#allocation16 + $0x78] sm:$0xff]  }
 0xc14   :  { %v5093_v48 = vpop.f32.mrf.mxu1  ;;  %4726 = vmatprep.subr.bf16.mxu0 %v5225_v7  ;;  %v3647_v7 = vlaneseq }
 0xc15   :  { %v3540_v53 = vadd.f32 %v5337_v52, %v3526_v9  ;;  %v3537_v40 = vadd.f32 %v5093_v48, %v4508_v60  ;;  %v5226_v9 = vld [vmem:[#allocation16 + $0xf8] sm:$0xff]  }
 0xc16   :  { %v3528_v15 = vpop.f32.mrf.mxu1 }
 0xc17   :  { %v3529_v55 = vadd.f32 %v4508_v60, %v3528_v15  ;;  %3546 = vadd.xlane.f32.xlu0 %v3540_v53  ;;  %v3543_v4 = vadd.f32 %v5340_v54, %v3537_v40  ;;  %v5222_v60 = vld [vmem:[#allocation14 + $0x8] ss:$16 sps:$4 sm:$0xff]  }
 0xc18   :  { %3895 = vmatpush1.bf16.msra.mxu1 %v5222_v60  ;;  %v5256_v60 = vld [vmem:[#allocation16 + $0x80] sm:$0xff]  }
 0xc19   :  { %v3541_v3 = vadd.f32 %v5339_v63, %v3529_v55  ;;  %4754 = vmatprep.subr.bf16.mxu1 %v5226_v9  ;;  %v3648_v9 = vshrl.u32 %v3647_v7, 7 }
 0xc1b   :  { %3548 = vadd.xlane.f32.xlu1 %v3541_v3  ;;  %3550 = vadd.xlane.f32.xlu0 %v3542_v57 }
 0xc1f   :  { %3552 = vadd.xlane.f32.xlu0 %v3543_v4 }
 0xca0   :  { %v3547_v17 = vpop.xlane.xlu0 %3546 }
 0xca1   :  { %v3555_v20 = vmul.f32 0.0078125, %v3547_v17 }
 0xca3   :  { %v6280_v12 = vsub.f32 %v3540_v53, %v3555_v20 }
 0xca4   :  { %v3549_v23 = vpop.xlane.xlu1 %3548  ;;  %v3551_v28 = vpop.xlane.xlu0 %3550 }
 0xca5   :  { %v3556_v36 = vmul.f32 0.0078125, %v3549_v23  ;;  %v3557_v22 = vmul.f32 0.0078125, %v3551_v28  ;;  %v3563_v2 = vmul.f32 %v6280_v12, %v6280_v12  ;;  %v4518_v23 = vld [vmem:[%s6352_s12] ss:$0 sm:$0xff] }
 0xca7   :  { %v6284_v24 = vsub.f32 %v3541_v3, %v3556_v36  ;;  %v6286_v21 = vsub.f32 %v3542_v57, %v3557_v22  ;;  %3567 = vadd.xlane.f32.xlu0 %v3563_v2 }
 0xca8   :  { %v3553_v16 = vpop.xlane.xlu0 %3552 }
 0xca9   :  { %v3558_v31 = vmul.f32 0.0078125, %v3553_v16  ;;  %v3564_v25 = vmul.f32 %v6284_v24, %v6284_v24  ;;  %v3565_v30 = vmul.f32 %v6286_v21, %v6286_v21 }
 0xcab   :  { %v6292_v6 = vsub.f32 %v3543_v4, %v3558_v31  ;;  %3569 = vadd.xlane.f32.xlu1 %v3564_v25  ;;  %3571 = vadd.xlane.f32.xlu0 %v3565_v30  ;;  %v5227_v25 = vld [vmem:[#allocation16 + $0x38] sm:$0xff]  }
 0xcac   :  { %v5228_v30 = vld [vmem:[#allocation16 + $0xb8] sm:$0xff]  }
 0xcad   :  { %v3566_v26 = vmul.f32 %v6292_v6, %v6292_v6 }
 0xcaf   :  { %3573 = vadd.xlane.f32.xlu1 %v3566_v26  ;;  %v5229_v26 = vld [vmem:[#allocation16 + $0x70] sm:$0xff]  }
 0xd30   :  { %v3568_v48 = vpop.xlane.xlu0 %3567 }
 0xd31   :  { %v3575_v13 = vmul.f32 0.0078125, %v3568_v48  ;;  %v3653_v48 = vsub.s32 1, %v3648_v9 }
 0xd33   :  { %v3579_v52 = vadd.f32 1e-05, %v3575_v13  ;;  %v3661_v13 = vsub.s32 3, %v3648_v9 }
 0xd34   :  { %v3570_v53 = vpop.xlane.xlu1 %3569  ;;  %v3572_v15 = vpop.xlane.xlu0 %3571 }
 0xd35   :  { %5321 = vrsqrt.f32 %v3579_v52  ;;  %v3576_v55 = vmul.f32 0.0078125, %v3570_v53  ;;  %v3577_v56 = vmul.f32 0.0078125, %v3572_v15  ;;  %v3649_v52 = vsub.s32 0, %v3648_v9  ;;  %v3645_v15 = vld [vmem:[%s6354_s14] sm:$0xf] }
 0xd36   :  { %v3657_v53 = vsub.s32 2, %v3648_v9 }
 0xd37   :  { %v3580_v57 = vadd.f32 1e-05, %v3576_v55  ;;  %v3581_v40 = vadd.f32 1e-05, %v3577_v56 }
 0xd38   :  { %v3574_v63 = vpop.xlane.xlu1 %3573 }
 0xd39   :  { %5323 = vrsqrt.f32 %v3580_v57  ;;  %v3578_v3 = vmul.f32 0.0078125, %v3574_v63  ;;  %v3654_v57 = vrot.slane %v3645_v15, %v3653_v48  ;;  %v3650_v63 = vrot.slane %v3645_v15, %v3649_v52 }
 0xd3a   :  { %5325 = vrsqrt.f32 %v3581_v40  ;;  %v3662_v40 = vrot.slane %v3645_v15, %v3661_v13 }
 0xd3b   :  { %v3582_v54 = vadd.f32 1e-05, %v3578_v3  ;;  %v3658_v3 = vrot.slane %v3645_v15, %v3657_v53 }
 0xd3d   :  { %5327 = vrsqrt.f32 %v3582_v54 }
 0xd42   :  { %v5322_v4 = vpop.eup %5321 }
 0xd43   :  { %v3587_v8 = vmul.f32 %v5322_v4, %v6280_v12 }
 0xd45   :  { %v3597_v17 = vmul.f32 %v4517_v41, %v3587_v8 }
 0xd46   :  { %v5324_v14 = vpop.eup %5323 }
 0xd47   :  { %v3588_v11 = vmul.f32 %v5324_v14, %v6284_v24  ;;  %v5326_v20 = vpop.eup %5325  ;;  %v6304_v22 = vadd.f32 %v4518_v23, %v3597_v17 }
 0xd48   :  { %v3589_v12 = vmul.f32 %v5326_v20, %v6286_v21  ;;  %v5231_v21 = vld [vmem:[#allocation16 + $0x30] sm:$0xff]  }
 0xd49   :  { %v3598_v28 = vmul.f32 %v4517_v41, %v3588_v11 }
 0xd4a   :  { %v5328_v36 = vpop.eup %5327  ;;  %v3599_v34 = vmul.f32 %v4517_v41, %v3589_v12 }
 0xd4b   :  { %v6306_v2 = vadd.f32 %v4518_v23, %v3598_v28  ;;  %v3590_v16 = vmul.f32 %v5328_v36, %v6292_v6  ;;  %v5233_v6 = vld [vmem:[#allocation16 + $0x68] sm:$0xff]  }
 0xd4c   :  { %v6314_v59 = vadd.f32 %v4518_v23, %v3599_v34 }
 0xd4d   :  { %v3611_v31 = vpack.c.bf16 %v6306_v2, %v6304_v22  ;;  %v3600_v24 = vmul.f32 %v4517_v41, %v3590_v16 }
 0xd4f   :  { %3860 = vmatmul.mubr.bf16.vlgmr.msra.gmra.mxu0 %v3611_v31  ;;  %3913 = vmatmul.mubr.bf16.vlgmr.msra.gmra.mxu1 %v3611_v31  ;;  %v6312_v32 = vadd.f32 %v4518_v23, %v3600_v24 }
 0xd50   :  { %3869 = vmatprep.mubr.bf16.mxu0 %v5572_v47  ;;  %3922 = vmatprep.mubr.bf16.mxu1 %v5572_v47  ;;  %v5250_v47 = vld [vmem:[#allocation16 + $0xc8] sm:$0xff]  }
 0xd51   :  { %4727 = vmatpush3.bf16.msra.mxu0 %v5227_v25  ;;  %4755 = vmatpush3.bf16.msra.mxu1 %v5228_v30  ;;  %v3612_v38 = vpack.c.bf16 %v6312_v32, %v6314_v59 }
 0xd52   :  { %4728 = vmatprep.subr.bf16.mxu0 %v5229_v26  ;;  %4756 = vmatprep.subr.bf16.mxu1 %v5230_v33 }
 0xd55   :  { %4729 = vmatpush3.bf16.msra.mxu0 %v5231_v21  ;;  %4757 = vmatpush3.bf16.msra.mxu1 %v5232_v37 }
 0xd56   :  { %4730 = vmatprep.subr.bf16.mxu0 %v5233_v6  ;;  %4758 = vmatprep.subr.bf16.mxu1 %v5234_v29 }
 0xd57   :  { %3870 = vmatmul.mubr.bf16.gmra.mxu0 %v3612_v38  ;;  %3923 = vmatmul.mubr.bf16.gmra.mxu1 %v3612_v38 }
 0xd59   :  { %4731 = vmatpush3.bf16.msra.mxu0 %v5235_v44  ;;  %4759 = vmatpush3.bf16.msra.mxu1 %v5236_v58 }
 0xd5a   :  { %4732 = vmatprep.subr.bf16.mxu0 %v5237_v62  ;;  %4760 = vmatprep.subr.bf16.mxu1 %v5238_v10 }
 0xd5d   :  { %4733 = vmatpush3.bf16.msra.mxu0 %v5239_v61  ;;  %4761 = vmatpush3.bf16.msra.mxu1 %v5240_v0 }
 0xd5e   :  { %4734 = vmatprep.subr.bf16.mxu0 %v5241_v18  ;;  %4762 = vmatprep.subr.bf16.mxu1 %v5242_v35 }
 0xd61   :  { %4735 = vmatpush3.bf16.msra.mxu0 %v5243_v43  ;;  %4763 = vmatpush3.bf16.msra.mxu1 %v5244_v42 }
 0xd62   :  { %4736 = vmatprep.subr.bf16.mxu0 %v5245_v49  ;;  %4764 = vmatprep.subr.bf16.mxu1 %v5246_v46 }
 0xd65   :  { %4737 = vmatpush3.bf16.msra.mxu0 %v5247_v39  ;;  %4765 = vmatpush3.bf16.msra.mxu1 %v5248_v45 }
 0xd66   :  { %4738 = vmatprep.subr.bf16.mxu0 %v5249_v27  ;;  %4766 = vmatprep.subr.bf16.mxu1 %v5250_v47 }
 0xd69   :  { %4739 = vmatpush3.bf16.msra.mxu0 %v5251_v1  ;;  %4767 = vmatpush3.bf16.msra.mxu1 %v5252_v50 }
 0xd6a   :  { %4740 = vmatprep.subr.bf16.mxu0 %v5253_v19  ;;  %4768 = vmatprep.subr.bf16.mxu1 %v5254_v5 }
 0xd6d   :  { %4741 = vmatpush3.bf16.msra.mxu0 %v5255_v51  ;;  %4769 = vmatpush3.bf16.msra.mxu1 %v5256_v60 }
 0xe0f   :  { %v3861_v55 = vpop.f32.mrf.mxu0  ;;  %v3914_v56 = vpop.f32.mrf.mxu1 }
 0xe10   :  { %v3862_v23 = vadd.f32 %v3861_v55, %v3650_v63  ;;  %v3915_v28 = vadd.f32 %v3914_v56, %v3658_v3 }
 0xe11   :  { %v3863_v54 = vpop.f32.mrf.mxu0  ;;  %v3916_v4 = vpop.f32.mrf.mxu1 }
 0xe12   :  { %v3864_v14 = vadd.f32 %v3863_v54, %v3654_v57  ;;  %v3917_v11 = vadd.f32 %v3916_v4, %v3662_v40  ;;  %v3933_v6 = vmax.f32 %v3862_v23, 0.0  ;;  %v3935_v29 = vmax.f32 %v3915_v28, 0.0 }
 0xe13   :  { %v3865_v8 = vpop.f32.mrf.mxu0  ;;  %v3918_v41 = vpop.f32.mrf.mxu1 }
 0xe14   :  { %v3866_v17 = vadd.f32 %v3865_v8, %v3650_v63  ;;  %v3919_v20 = vadd.f32 %v3918_v41, %v3658_v3  ;;  %v3934_v33 = vmax.f32 %v3864_v14, 0.0  ;;  %v3936_v34 = vmax.f32 %v3917_v11, 0.0 }
 0xe15   :  { %v3867_v36 = vpop.f32.mrf.mxu0  ;;  %v3920_v12 = vpop.f32.mrf.mxu1 }
 0xe16   :  { %v3868_v16 = vadd.f32 %v3867_v36, %v3654_v57  ;;  %v3921_v31 = vadd.f32 %v3920_v12, %v3662_v40  ;;  %v3937_v24 = vmax.f32 %v3866_v17, 0.0  ;;  %v3939_v25 = vmax.f32 %v3919_v20, 0.0 }
 0xe17   :  { %v3871_v30 = vpop.f32.mrf.mxu0  ;;  %v3924_v26 = vpop.f32.mrf.mxu1 }
 0xe18   :  { %v3938_v21 = vmax.f32 %v3868_v16, 0.0  ;;  %v3940_v37 = vmax.f32 %v3921_v31, 0.0  ;;  %v3949_v10 = vpack.c.bf16 %v3937_v24, %v3933_v6  ;;  %v3951_v61 = vpack.c.bf16 %v3939_v25, %v3935_v29 }
 0xe19   :  { %v3873_v38 = vpop.f32.mrf.mxu0  ;;  %v3926_v44 = vpop.f32.mrf.mxu1  ;;  %v3872_v46 = vadd.f32 %v3871_v30, %v3650_v63  ;;  %v3925_v39 = vadd.f32 %v3924_v26, %v3658_v3 }
 0xe1a   :  { %v3950_v58 = vpack.c.bf16 %v3938_v21, %v3934_v33  ;;  %v3952_v62 = vpack.c.bf16 %v3940_v37, %v3936_v34  ;;  %v3874_v0 = vadd.f32 %v3873_v38, %v3654_v57  ;;  %v3927_v43 = vadd.f32 %v3926_v44, %v3662_v40 }
 0xe1b   :  { %v3875_v18 = vpop.f32.mrf.mxu0  ;;  %v3928_v35 = vpop.f32.mrf.mxu1  ;;  %v3941_v9 = vmax.f32 %v3872_v46, 0.0  ;;  %v3943_v48 = vmax.f32 %v3925_v39, 0.0 }
 0xe1c   :  { %v3876_v42 = vadd.f32 %v3875_v18, %v3650_v63  ;;  %v3929_v49 = vadd.f32 %v3928_v35, %v3658_v3  ;;  %4252 = vmatprep.mubr.bf16.mxu0 %v3950_v58  ;;  %4301 = vmatprep.mubr.bf16.mxu1 %v3952_v62  ;;  %v3942_v5 = vmax.f32 %v3874_v0, 0.0  ;;  %v3944_v51 = vmax.f32 %v3927_v43, 0.0 }
 0xe1d   :  { %v3877_v45 = vpop.f32.mrf.mxu0  ;;  %v3930_v27 = vpop.f32.mrf.mxu1  ;;  %4253 = vmatmul.mubr.bf16.vlgmr.msra.gmra.mxu0 %v3949_v10  ;;  %4302 = vmatmul.mubr.bf16.vlgmr.msra.gmra.mxu1 %v3951_v61 }
 0xe1e   :  { %v3878_v47 = vadd.f32 %v3877_v45, %v3654_v57  ;;  %v3931_v1 = vadd.f32 %v3930_v27, %v3662_v40  ;;  %v3945_v50 = vmax.f32 %v3876_v42, 0.0  ;;  %v3947_v19 = vmax.f32 %v3929_v49, 0.0  ;;  %v4551_v57 = vld [vmem:[%s6356_s16] ss:$0 sm:$0xff] }
 0xe20   :  { %v3946_v60 = vmax.f32 %v3878_v47, 0.0  ;;  %v3948_v7 = vmax.f32 %v3931_v1, 0.0  ;;  %v3953_v53 = vpack.c.bf16 %v3945_v50, %v3941_v9  ;;  %v3955_v15 = vpack.c.bf16 %v3947_v19, %v3943_v48 }
 0xe22   :  { %v3954_v13 = vpack.c.bf16 %v3946_v60, %v3942_v5  ;;  %v3956_v52 = vpack.c.bf16 %v3948_v7, %v3944_v51 }
 0xe24   :  { %4260 = vmatprep.mubr.bf16.mxu0 %v3954_v13  ;;  %4309 = vmatprep.mubr.bf16.mxu1 %v3956_v52 }
 0xe25   :  { %4261 = vmatmul.mubr.bf16.gmra.mxu0 %v3953_v53  ;;  %4310 = vmatmul.mubr.bf16.gmra.mxu1 %v3955_v15 }
 0xedd   :  { %v4742_v55 = vpop.f32.mrf.mxu0  ;;  %v4770_v56 = vpop.f32.mrf.mxu1 }
 0xedf   :  { %v4743_v40 = vpop.f32.mrf.mxu0  ;;  %v4771_v63 = vpop.f32.mrf.mxu1 }
 0xee0   :  { %v4744_v3 = vadd.f32 %v4743_v40, %v4742_v55  ;;  %v4772_v41 = vadd.f32 %v4771_v63, %v4770_v56  ;;  %v4585_v63 = vld [vmem:[%s6358_s18] ss:$0 sm:$0xff] }
 0xee1   :  { %v4745_v54 = vpop.f32.mrf.mxu0  ;;  %v4773_v4 = vpop.f32.mrf.mxu1 }
 0xee2   :  { %v4255_v8 = vadd.f32 %v4744_v3, %v4551_v57 }
 0xee3   :  { %v4746_v14 = vpop.f32.mrf.mxu0  ;;  %v4774_v11 = vpop.f32.mrf.mxu1 }
 0xee4   :  { %v4304_v17 = vadd.f32 %v4772_v41, %v4255_v8  ;;  %v4747_v20 = vadd.f32 %v4746_v14, %v4745_v54  ;;  %v4775_v12 = vadd.f32 %v4774_v11, %v4773_v4 }
 0xee5   :  { %v4748_v23 = vpop.f32.mrf.mxu0  ;;  %v4776_v28 = vpop.f32.mrf.mxu1 }
 0xee6   :  { %v4258_v36 = vadd.f32 %v4747_v20, %v4551_v57  ;;  %v4318_v16 = vadd.f32 %v4304_v17, %v6304_v22 }
 0xee7   :  { %v4749_v31 = vpop.f32.mrf.mxu0  ;;  %v4777_v24 = vpop.f32.mrf.mxu1 }
 0xee8   :  { %v4307_v25 = vadd.f32 %v4775_v12, %v4258_v36  ;;  %v4750_v30 = vadd.f32 %v4749_v31, %v4748_v23  ;;  %4324 = vadd.xlane.f32.xlu0 %v4318_v16  ;;  %v4778_v21 = vadd.f32 %v4777_v24, %v4776_v28 }
 0xee9   :  { %v4751_v26 = vpop.f32.mrf.mxu0  ;;  %v4779_v33 = vpop.f32.mrf.mxu1 }
 0xeea   :  { %v4263_v34 = vadd.f32 %v4750_v30, %v4551_v57  ;;  %v4319_v37 = vadd.f32 %v4307_v25, %v6306_v2 }
 0xeeb   :  { %v4752_v6 = vpop.f32.mrf.mxu0  ;;  %v4780_v29 = vpop.f32.mrf.mxu1 }
 0xeec   :  { %v4312_v38 = vadd.f32 %v4778_v21, %v4263_v34  ;;  %v4753_v44 = vadd.f32 %v4752_v6, %v4751_v26  ;;  %4326 = vadd.xlane.f32.xlu1 %v4319_v37  ;;  %v4781_v62 = vadd.f32 %v4780_v29, %v4779_v33 }
 0xeee   :  { %v4266_v58 = vadd.f32 %v4753_v44, %v4551_v57  ;;  %v4320_v22 = vadd.f32 %v4312_v38, %v6314_v59  ;;  %v4584_v57 = vld [vmem:[%s6357_s17] ss:$0 sm:$0xff]  ;;  %s5573_s17 = smov [#allocation17]  }
 0xeef   :  { %s4397_s7 = sshll.u32 %s5573_s17, 4  ;;  %s4398_s7 = int_to_ptr.vmem [resolvable:$true] %s4397_s7 }
 0xef0   :  { %v4315_v10 = vadd.f32 %v4781_v62, %v4266_v58  ;;  %4328 = vadd.xlane.f32.xlu0 %v4320_v22  ;;  %s5521_s18 = scalar_lea.vmem %s4398_s7, 512  ;;  %p5526_p4 = scmp.lt.s32.totalorder %s4398_s7, %s4398_s7 }
 0xef1   :  { %p5522_p3 = scmp.ne.s32.totalorder %s4398_s7, %s5521_s18  ;;  %p5527_p5 = scmp.lt.s32.totalorder %s5521_s18, %s5521_s18 }
 0xef2   :  { %v4321_v61 = vadd.f32 %v4315_v10, %v6312_v32 }
 0xef3   :  { %p5528_p6 = por %p5527_p5, %p5526_p4 }
 0xef4   :  { %4330 = vadd.xlane.f32.xlu1 %v4321_v61 }
 0xef5   :  { %p5529_p7 = pnand %p5528_p6, %p5522_p3 }
 0xf71   :  { %v4325_v0 = vpop.xlane.xlu0 %4324 }
 0xf72   :  { %v4332_v18 = vmul.f32 0.0078125, %v4325_v0 }
 0xf74   :  { %v4336_v35 = vsub.f32 %v4318_v16, %v4332_v18 }
 0xf75   :  { %v4327_v43 = vpop.xlane.xlu1 %4326 }
 0xf76   :  { %v4333_v42 = vmul.f32 0.0078125, %v4327_v43  ;;  %v4340_v2 = vmul.f32 %v4336_v35, %v4336_v35 }
 0xf78   :  { %v4337_v49 = vsub.f32 %v4319_v37, %v4333_v42  ;;  %4344 = vadd.xlane.f32.xlu0 %v4340_v2 }
 0xf79   :  { %v4329_v46 = vpop.xlane.xlu0 %4328 }
 0xf7a   :  { %v4334_v39 = vmul.f32 0.0078125, %v4329_v46  ;;  %v4341_v45 = vmul.f32 %v4337_v49, %v4337_v49 }
 0xf7c   :  { %v4338_v27 = vsub.f32 %v4320_v22, %v4334_v39  ;;  %4346 = vadd.xlane.f32.xlu1 %v4341_v45 }
 0xf7d   :  { %v4331_v47 = vpop.xlane.xlu1 %4330 }
 0xf7e   :  { %v4335_v59 = vmul.f32 0.0078125, %v4331_v47  ;;  %v4342_v1 = vmul.f32 %v4338_v27, %v4338_v27 }
 0xf80   :  { %v4339_v50 = vsub.f32 %v4321_v61, %v4335_v59  ;;  %4348 = vadd.xlane.f32.xlu0 %v4342_v1 }
 0xf82   :  { %v4343_v32 = vmul.f32 %v4339_v50, %v4339_v50 }
 0xf84   :  { %4350 = vadd.xlane.f32.xlu1 %v4343_v32 }
0x1001   :  { %v4345_v19 = vpop.xlane.xlu0 %4344 }
0x1002   :  { %v4352_v5 = vmul.f32 0.0078125, %v4345_v19 }
0x1004   :  { %v4356_v51 = vadd.f32 1e-05, %v4352_v5 }
0x1005   :  { %v4347_v60 = vpop.xlane.xlu1 %4346 }
0x1006   :  { %5329 = vrsqrt.f32 %v4356_v51  ;;  %v4353_v7 = vmul.f32 0.0078125, %v4347_v60 }
0x1008   :  { %v4357_v9 = vadd.f32 1e-05, %v4353_v7 }
0x1009   :  { %v4349_v48 = vpop.xlane.xlu0 %4348 }
0x100a   :  { %5331 = vrsqrt.f32 %v4357_v9  ;;  %v4354_v13 = vmul.f32 0.0078125, %v4349_v48 }
0x100c   :  { %v4358_v52 = vadd.f32 1e-05, %v4354_v13 }
0x100d   :  { %v4351_v53 = vpop.xlane.xlu1 %4350 }
0x100e   :  { %5333 = vrsqrt.f32 %v4358_v52  ;;  %v4355_v15 = vmul.f32 0.0078125, %v4351_v53 }
0x1010   :  { %v4359_v55 = vadd.f32 1e-05, %v4355_v15 }
0x1012   :  { %5335 = vrsqrt.f32 %v4359_v55 }
0x1013   :  { %v5330_v56 = vpop.eup %5329 }
0x1014   :  { %v4364_v40 = vmul.f32 %v5330_v56, %v4336_v35 }
0x1016   :  { %v4374_v3 = vmul.f32 %v4584_v57, %v4364_v40 }
0x1017   :  { %v5332_v54 = vpop.eup %5331 }
0x1018   :  { %v4365_v4 = vmul.f32 %v5332_v54, %v4337_v49  ;;  %v4384_v8 = vadd.f32 %v4585_v63, %v4374_v3 }
0x101a   :  { %v4375_v41 = vmul.f32 %v4584_v57, %v4365_v4  ;;  %4388 = vst [vmem:[#allocation17] sm:$0xff] %v4384_v8 }
0x101b   :  { %v5334_v14 = vpop.eup %5333 }
0x101c   :  { %v4366_v11 = vmul.f32 %v5334_v14, %v4338_v27  ;;  %v4385_v17 = vadd.f32 %v4585_v63, %v4375_v41 }
0x101e   :  { %v4376_v20 = vmul.f32 %v4584_v57, %v4366_v11  ;;  %4389 = vst [vmem:[#allocation17 + $0x8] sm:$0xff] %v4385_v17 }
0x101f   :  { %v5336_v23 = vpop.eup %5335 }
0x1020   :  { %v4367_v28 = vmul.f32 %v5336_v23, %v4339_v50  ;;  %v4386_v36 = vadd.f32 %v4585_v63, %v4376_v20 }
0x1022   :  { %v4377_v12 = vmul.f32 %v4584_v57, %v4367_v28  ;;  %4390 = vst [vmem:[#allocation17 + $0x10] sm:$0xff] %v4386_v36 }
0x1024   :  { %v4387_v16 = vadd.f32 %v4585_v63, %v4377_v12 }
0x1026   :  { %4391 = vst [vmem:[#allocation17 + $0x18] sm:$0xff] %v4387_v16 }
0x1027   :  { %5532 = shalt.err (!%p5529_p7)
}
0x1028   :  { %4403 = dma.vmem_to_hbm [thread:$0]  %s4398_s7, 512, %s6359_s19, [#allocation4], %s6373_s28, %s6373_s28, %s6372_s2  }
0x1029   :  { %5551 = dma.done.wait [#allocation4], 512  }
0x102a   :  { %5552 = vsyncadd [#allocation4], 4294966784 }
0x102b   :  { %4411 = vsyncpa [#allocation3], 1 }
0x102c   :  { %4412 = vsyncpa [#allocation6], 1 }
0x102d   :  { %4413 = vsyncpa [#allocation9], 1 }
0x102e   :  { %4414 = vsyncpa [#allocation12], 1 }
0x102f   :  { %4415 = vsyncpa [#allocation15], 1 }
0x1030   :  { %4416 = vsyncpa [#allocation4], 1 }

// kernel: tpu_custom_call.1
= control target key start
LH: loop header
LB: loop body
LE: loop exit
PB: predicated region body
PF: predicated region fallthrough
CT: control target
= control target key end

     0   :  { %s6340_s0 = inlined_call_operand.hbm [shape: f32[4,8,128], index: 0, kind: input, shape index: {}]   ;;  %s6341_s1 = inlined_call_operand.hbm [shape: f32[4,16,128], index: 1, kind: input, shape index: {}]   ;;  %s6342_s2 = inlined_call_operand.hbm [shape: f32[4,16,128], index: 2, kind: input, shape index: {}]   ;;  %s6343_s3 = inlined_call_operand.hbm [shape: bf16[128,128], index: 3, kind: input, shape index: {}]   ;;  %s6344_s4 = inlined_call_operand.hbm [shape: bf16[128,128], index: 4, kind: input, shape index: {}]   ;;  %s6345_s5 = inlined_call_operand.hbm [shape: bf16[128,128], index: 5, kind: input, shape index: {}]   ;;  %s6346_s6 = inlined_call_operand.vmem [shape: f32[1,128], index: 6, kind: input, shape index: {}]   ;;  %s6347_s7 = inlined_call_operand.vmem [shape: f32[1,128], index: 7, kind: input, shape index: {}]   ;;  %s6348_s8 = inlined_call_operand.vmem [shape: f32[1,128], index: 8, kind: input, shape index: {}]   ;;  %s6349_s9 = inlined_call_operand.hbm [shape: bf16[128,128], index: 9, kind: input, shape index: {}]   ;;  %s6350_s10 = inlined_call_operand.vmem [shape: f32[1,128], index: 10, kind: input, shape index: {}]   ;;  %s6351_s11 = inlined_call_operand.vmem [shape: f32[1,128], index: 11, kind: input, shape index: {}]   ;;  %s6352_s12 = inlined_call_operand.vmem [shape: f32[1,128], index: 12, kind: input, shape index: {}]   ;;  %s6353_s13 = inlined_call_operand.hbm [shape: bf16[128,512], index: 13, kind: input, shape index: {}]   ;;  %s6354_s14 = inlined_call_operand.vmem [shape: f32[1,512], index: 14, kind: input, shape index: {}]   ;;  %s6355_s15 = inlined_call_operand.hbm [shape: bf16[512,128], index: 15, kind: input, shape index: {}]   ;;  %s6356_s16 = inlined_call_operand.vmem [shape: f32[1,128], index: 16, kind: input, shape index: {}]   ;;  %s6357_s17 = inlined_call_operand.vmem [shape: f32[1,128], index: 17, kind: input, shape index: {}]   ;;  %s6358_s18 = inlined_call_operand.vmem [shape: f32[1,128], index: 18, kind: input, shape index: {}]   ;;  %s6359_s19 = inlined_call_operand.hbm [shape: f32[4,8,128], index: 19, kind: output, shape index: {0}]   ;;  %s6360_s20 = inlined_call_operand.vmem [shape: f32[32,16], index: 20, kind: output, shape index: {1}]  }
   0x1   :  { %6365 = sst [smem:[#allocation24_spill]] %s6340_s0 }
   0x2   :  { %6366 = sst [smem:[#allocation25_spill]] %s6341_s1 }
   0x3   :  { %6367 = sst [smem:[#allocation26_spill]] %s6342_s2 }
   0x4   :  { %6368 = sst [smem:[#allocation27_spill]] %s6343_s3 }
   0x5   :  { %6369 = sst [smem:[#allocation28_spill]] %s6344_s4 }
   0x6   :  { %26 = vsyncpa [#allocation3], 0 }
   0x7   :  { %27 = vsyncpa [#allocation6], 0 }
   0x8   :  { %28 = vsyncpa [#allocation9], 0 }
   0x9   :  { %29 = vsyncpa [#allocation12], 0 }
   0xa   :  { %30 = vsyncpa [#allocation15], 0 }
   0xb   :  { %31 = vsyncpa [#allocation4], 0  ;;  %s5553_s1 = smov [#allocation5]   ;;  %s5554_s23 = smov [#allocation8]  }
   0xc   :  { %s49_s22 = sshll.u32 %s5553_s1, 4  ;;  %s73_s24 = sshll.u32 %s5554_s23, 4  ;;  %s50_s22 = int_to_ptr.vmem [resolvable:$true] %s49_s22  ;;  %s74_s24 = int_to_ptr.vmem [resolvable:$true] %s73_s24 }
   0xd   :  { %s5349_s2 = scalar_lea.vmem %s50_s22, 1024  ;;  %p5354_p1 = scmp.lt.s32.totalorder %s50_s22, %s50_s22 }
   0xe   :  { %p5350_p0 = scmp.ne.s32.totalorder %s50_s22, %s5349_s2  ;;  %p5355_p2 = scmp.lt.s32.totalorder %s5349_s2, %s5349_s2 }
  0x10   :  { %p5356_p3 = por %p5355_p2, %p5354_p1 }
  0x12   :  { %p5357_p4 = pnand %p5356_p3, %p5350_p0 }
  0x14   :  { %5360 = shalt.err (!%p5357_p4)
}
  0x15   :  { %s6361_s25 = smov 128   ;;  %s6363_s3 = smov 8  }
  0x16   :  { %s6370_s28 = sld [smem:[#allocation25_spill]]  ;;  %s5369_s4 = scalar_lea.vmem %s74_s24, 1024 }
  0x17   :  { %p5370_p5 = scmp.ne.s32.totalorder %s74_s24, %s5369_s4  ;;  %p5374_p6 = scmp.lt.s32.totalorder %s74_s24, %s74_s24 }
  0x18   :  { %p5375_p7 = scmp.lt.s32.totalorder %s5369_s4, %s5369_s4 }
  0x1a   :  { %p5376_p8 = por %p5375_p7, %p5374_p6 }
  0x1c   :  { %55 = dma.hbm_to_vmem [thread:$0]  %s6370_s28, 1024, %s50_s22, [#allocation6], %s6361_s25, %s6361_s25, %s6363_s3  }
  0x1d   :  { %p5377_p9 = pnand %p5376_p8, %p5370_p5 }
  0x1f   :  { %5380 = shalt.err (!%p5377_p9)
}
  0x20   :  { %s5557_s29 = smov 64   ;;  %s5558_s30 = smov 4  }
  0x21   :  { %s6371_s1 = sld [smem:[#allocation27_spill]]  ;;  %s5559_s23 = smov [#allocation11]  }
  0x22   :  { %s97_s2 = sshll.u32 %s5559_s23, 4  ;;  %s5560_s26 = smov [#allocation14]   ;;  %s98_s2 = int_to_ptr.vmem [resolvable:$true] %s97_s2 }
  0x23   :  { %s133_s22 = sshll.u32 %s5560_s26, 4  ;;  %s5389_s27 = scalar_lea.vmem %s98_s2, 1024  ;;  %s134_s22 = int_to_ptr.vmem [resolvable:$true] %s133_s22 }
  0x24   :  { %p5390_p10 = scmp.ne.s32.totalorder %s98_s2, %s5389_s27  ;;  %p5394_p11 = scmp.lt.s32.totalorder %s98_s2, %s98_s2 }
  0x25   :  { %p5395_p12 = scmp.lt.s32.totalorder %s5389_s27, %s5389_s27 }
  0x27   :  { %79 = dma.hbm_to_vmem [thread:$0]  %s6371_s1, 1024, %s74_s24, [#allocation9], %s5557_s29, %s5557_s29, %s5558_s30  }
  0x28   :  { %p5396_p13 = por %p5395_p12, %p5394_p11 }
  0x2a   :  { %p5397_p0 = pnand %p5396_p13, %p5390_p10 }
  0x2c   :  { %5400 = shalt.err (!%p5397_p0)
}
  0x2d   :  { %103 = dma.hbm_to_vmem [thread:$0]  %s6345_s5, 1024, %s98_s2, [#allocation12], %s5557_s29, %s5557_s29, %s5558_s30  }
  0x2e   :  { %s5409_s24 = scalar_lea.vmem %s134_s22, 4096  ;;  %p5414_p2 = scmp.lt.s32.totalorder %s134_s22, %s134_s22 }
  0x2f   :  { %p5410_p1 = scmp.ne.s32.totalorder %s134_s22, %s5409_s24  ;;  %p5415_p3 = scmp.lt.s32.totalorder %s5409_s24, %s5409_s24 }
  0x31   :  { %p5416_p4 = por %p5415_p3, %p5414_p2 }
  0x33   :  { %p5417_p5 = pnand %p5416_p4, %p5410_p1 }
  0x35   :  { %5420 = shalt.err (!%p5417_p5)
}
  0x36   :  { %s5561_s0 = smov 256   ;;  %s5562_s21 = smov 16  }
  0x37   :  { %139 = dma.hbm_to_vmem [thread:$0]  %s6353_s13, 4096, %s134_s22, [#allocation15], %s5561_s0, %s5561_s0, %s5562_s21  }
  0x38   :  { %s5563_s26 = smov [#allocation2]   ;;  %s5564_s25 = smov [#allocation7]  }
  0x39   :  { %s37_s27 = sshll.u32 %s5563_s26, 4  ;;  %s61_s3 = sshll.u32 %s5564_s25, 4  ;;  %s38_s27 = int_to_ptr.vmem [resolvable:$true] %s37_s27  ;;  %s62_s3 = int_to_ptr.vmem [resolvable:$true] %s61_s3 }
  0x3a   :  { %s5429_s5 = scalar_lea.vmem %s38_s27, 512  ;;  %p5434_p7 = scmp.lt.s32.totalorder %s38_s27, %s38_s27 }
  0x3b   :  { %p5430_p6 = scmp.ne.s32.totalorder %s38_s27, %s5429_s5  ;;  %p5435_p8 = scmp.lt.s32.totalorder %s5429_s5, %s5429_s5 }
  0x3d   :  { %p5436_p9 = por %p5435_p8, %p5434_p7 }
  0x3f   :  { %p5437_p10 = pnand %p5436_p9, %p5430_p6 }
  0x41   :  { %5440 = shalt.err (!%p5437_p10)
}
  0x42   :  { %s6372_s2 = smov 8   ;;  %s6373_s28 = smov 128  }
  0x43   :  { %s6374_s1 = sld [smem:[#allocation24_spill]]  ;;  %s5449_s13 = scalar_lea.vmem %s62_s3, 1024 }
  0x44   :  { %p5450_p11 = scmp.ne.s32.totalorder %s62_s3, %s5449_s13  ;;  %p5454_p12 = scmp.lt.s32.totalorder %s62_s3, %s62_s3 }
  0x45   :  { %p5455_p13 = scmp.lt.s32.totalorder %s5449_s13, %s5449_s13 }
  0x47   :  { %p5456_p0 = por %p5455_p13, %p5454_p12 }
  0x49   :  { %43 = dma.hbm_to_vmem [thread:$0]  %s6374_s1, 512, %s38_s27, [#allocation3], %s6373_s28, %s6373_s28, %s6372_s2  }
  0x4a   :  { %p5457_p1 = pnand %p5456_p0, %p5450_p11 }
  0x4c   :  { %5460 = shalt.err (!%p5457_p1)
}
  0x4d   :  { %s6375_s0 = sld [smem:[#allocation26_spill]]  ;;  %s5565_s21 = smov [#allocation10]  }
  0x4e   :  { %s85_s23 = sshll.u32 %s5565_s21, 4  ;;  %s5566_s26 = smov [#allocation13]   ;;  %s86_s23 = int_to_ptr.vmem [resolvable:$true] %s85_s23 }
  0x4f   :  { %s115_s5 = sshll.u32 %s5566_s26, 4  ;;  %s5469_s27 = scalar_lea.vmem %s86_s23, 1024  ;;  %s116_s5 = int_to_ptr.vmem [resolvable:$true] %s115_s5 }
  0x50   :  { %p5470_p2 = scmp.ne.s32.totalorder %s86_s23, %s5469_s27  ;;  %p5474_p3 = scmp.lt.s32.totalorder %s86_s23, %s86_s23 }
  0x51   :  { %p5475_p4 = scmp.lt.s32.totalorder %s5469_s27, %s5469_s27 }
  0x53   :  { %67 = dma.hbm_to_vmem [thread:$0]  %s6375_s0, 1024, %s62_s3, [#allocation6], %s6373_s28, %s6373_s28, %s6372_s2  }
  0x54   :  { %p5476_p5 = por %p5475_p4, %p5474_p3 }
  0x56   :  { %p5477_p6 = pnand %p5476_p5, %p5470_p2 }
  0x58   :  { %5480 = shalt.err (!%p5477_p6)
}
  0x59   :  { %s6376_s1 = sld [smem:[#allocation28_spill]]  ;;  %s5489_s3 = scalar_lea.vmem %s116_s5, 1024 }
  0x5a   :  { %p5490_p7 = scmp.ne.s32.totalorder %s116_s5, %s5489_s3  ;;  %p5494_p8 = scmp.lt.s32.totalorder %s116_s5, %s116_s5 }
  0x5b   :  { %p5495_p9 = scmp.lt.s32.totalorder %s5489_s3, %s5489_s3 }
  0x5d   :  { %p5496_p10 = por %p5495_p9, %p5494_p8 }
  0x5f   :  { %91 = dma.hbm_to_vmem [thread:$0]  %s6376_s1, 1024, %s86_s23, [#allocation9], %s5557_s29, %s5557_s29, %s5558_s30  }
  0x60   :  { %p5497_p11 = pnand %p5496_p10, %p5490_p7 }
  0x62   :  { %5500 = shalt.err (!%p5497_p11)
}
  0x63   :  { %121 = dma.hbm_to_vmem [thread:$0]  %s6349_s9, 1024, %s116_s5, [#allocation12], %s5557_s29, %s5557_s29, %s5558_s30  }
  0x64   :  { %s5567_s22 = smov [#allocation16]  }
  0x65   :  { %s147_s0 = sshll.u32 %s5567_s22, 4  ;;  %s148_s0 = int_to_ptr.vmem [resolvable:$true] %s147_s0 }
  0x66   :  { %s5509_s21 = scalar_lea.vmem %s148_s0, 4096  ;;  %p5514_p13 = scmp.lt.s32.totalorder %s148_s0, %s148_s0 }
  0x67   :  { %p5510_p12 = scmp.ne.s32.totalorder %s148_s0, %s5509_s21  ;;  %p5515_p0 = scmp.lt.s32.totalorder %s5509_s21, %s5509_s21 }
  0x69   :  { %p5516_p1 = por %p5515_p0, %p5514_p13 }
  0x6b   :  { %p5517_p2 = pnand %p5516_p1, %p5510_p12 }
  0x6d   :  { %5520 = shalt.err (!%p5517_p2)
}
  0x6e   :  { %153 = dma.hbm_to_vmem [thread:$0]  %s6355_s15, 4096, %s148_s0, [#allocation15], %s5557_s29, %s5557_s29, %s5558_s30  }
  0x6f   :  { %5541 = dma.done.wait [#allocation3], 512  }
  0x70   :  { %5542 = vsyncadd [#allocation3], 4294966784 }
  0x71   :  { %5543 = dma.done.wait [#allocation6], 2048  }
  0x72   :  { %5544 = vsyncadd [#allocation6], 4294965248 }
  0x73   :  { %5545 = dma.done.wait [#allocation9], 2048  }
  0x74   :  { %5546 = vsyncadd [#allocation9], 4294965248 }
  0x75   :  { %5547 = dma.done.wait [#allocation12], 2048  }
  0x76   :  { %5548 = vsyncadd [#allocation12], 4294965248 }
  0x77   :  { %5549 = dma.done.wait [#allocation15], 8192  }
  0x78   :  { %5550 = vsyncadd [#allocation15], 4294959104  ;;  %v5145_v0 = vld [vmem:[#allocation10 + $0x38] sm:$0xff]   ;;  %v5146_v1 = vld [vmem:[#allocation10 + $0x30] sm:$0xff]   ;;  %v5568_v54 = vmov 0.0   ;;  %vm5569_vm0 = vmmov 0  }
  0x79   :  { %4802 = vmatprep.subr.bf16.mxu1 %v5145_v0  ;;  %v5148_v2 = vld [vmem:[#allocation8 + $0x38] sm:$0xff]   ;;  %v5147_v3 = vld [vmem:[#allocation10 + $0x28] sm:$0xff]   ;;  %v5150_v4 = vld [vmem:[#allocation8 + $0x30] sm:$0xff]   ;;  %vm610_vm1 = vcmask 261120   ;;  %s5570_s30 = smov 96   ;;  %vm927_vm2 = vcmask 130048  }
  0x7a   :  { %4803 = vmatpush3.bf16.msra.mxu1 %v5145_v0  ;;  %4782 = vmatprep.subr.bf16.mxu0 %v5148_v2  ;;  %v5152_v5 = vld [vmem:[#allocation8 + $0x28] sm:$0xff]   ;;  %v5149_v6 = vld [vmem:[#allocation10 + $0x20] sm:$0xff]   ;;  %v5151_v8 = vld [vmem:[#allocation10 + $0x18] sm:$0xff]   ;;  %vm3408_vm3 = vcmask 523264   ;;  %vm3413_vm4 = vcmask 785408  }
  0x7b   :  { %4804 = vmatprep.subr.bf16.mxu1 %v5146_v1  ;;  %4783 = vmatpush3.bf16.msra.mxu0 %v5148_v2  ;;  %v5154_v7 = vld [vmem:[#allocation8 + $0x20] sm:$0xff]   ;;  %v193_v10 = vld [vmem:[#allocation5 + $0x8] sm:$0xff]  ;;  %v5156_v11 = vld [vmem:[#allocation8 + $0x18] sm:$0xff]  }
  0x7c   :  { %4784 = vmatprep.subr.bf16.mxu0 %v5150_v4  ;;  %v192_v9 = vld [vmem:[#allocation5] sm:$0xff]  ;;  %v5153_v13 = vld [vmem:[#allocation10 + $0x10] sm:$0xff]   ;;  %v189_v16 = vld [vmem:[#allocation2 + $0x8] sm:$0xff] }
  0x7d   :  { %v330_v12 = vpack.c.bf16 %v193_v10, %v192_v9  ;;  %v188_v14 = vld [vmem:[#allocation2] sm:$0xff]  ;;  %v5158_v15 = vld [vmem:[#allocation8 + $0x10] sm:$0xff]   ;;  %v5155_v17 = vld [vmem:[#allocation10 + $0x8] sm:$0xff]  }
  0x7e   :  { %4805 = vmatpush3.bf16.msra.mxu1 %v5146_v1  ;;  %v208_v18 = vpack.c.bf16 %v189_v16, %v188_v14  ;;  %v5159_v19 = vld [vmem:[#allocation8 + $0x8] sm:$0xff]   ;;  %v5157_v20 = vld [vmem:[#allocation10] sm:$0xff]   ;;  %v194_v21 = vld [vmem:[#allocation5 + $0x10] sm:$0xff] }
  0x7f   :  { %4806 = vmatprep.subr.bf16.mxu1 %v5147_v3  ;;  %4785 = vmatpush3.bf16.msra.mxu0 %v5150_v4  ;;  %v195_v22 = vld [vmem:[#allocation5 + $0x18] sm:$0xff]  ;;  %v5160_v23 = vld [vmem:[#allocation8] sm:$0xff]   ;;  %v197_v25 = vld [vmem:[#allocation5 + $0x28] sm:$0xff] }
  0x80   :  { %4786 = vmatprep.subr.bf16.mxu0 %v5152_v5  ;;  %4818 = vmatprep.mubr.bf16.mxu1 %v330_v12  ;;  %v196_v24 = vld [vmem:[#allocation5 + $0x20] sm:$0xff]  ;;  %v190_v26 = vld [vmem:[#allocation2 + $0x10] sm:$0xff]  ;;  %v191_v27 = vld [vmem:[#allocation2 + $0x18] sm:$0xff]  ;;  %v331_v31 = vpack.c.bf16 %v195_v22, %v194_v21 }
  0x81   :  { %4798 = vmatprep.mubr.bf16.mxu0 %v208_v18  ;;  %v5161_v28 = vld [vmem:[#allocation11 + $0x38] sm:$0xff]   ;;  %v200_v29 = vld [vmem:[#allocation7] sm:$0xff]  ;;  %v201_v30 = vld [vmem:[#allocation7 + $0x8] sm:$0xff]  ;;  %v332_v32 = vpack.c.bf16 %v197_v25, %v196_v24  ;;  %v209_v35 = vpack.c.bf16 %v191_v27, %v190_v26 }
  0x82   :  { %4807 = vmatpush3.bf16.msra.mxu1 %v5147_v3  ;;  %v198_v33 = vld [vmem:[#allocation5 + $0x30] sm:$0xff]  ;;  %v199_v34 = vld [vmem:[#allocation5 + $0x38] sm:$0xff]  ;;  %v470_v37 = vpack.c.bf16 %v201_v30, %v200_v29  ;;  %v5163_v38 = vld [vmem:[#allocation11 + $0x28] sm:$0xff]  }
  0x83   :  { %4808 = vmatprep.subr.bf16.mxu1 %v5149_v6  ;;  %4787 = vmatpush3.bf16.msra.mxu0 %v5152_v5  ;;  %v5162_v36 = vld [vmem:[#allocation11 + $0x30] sm:$0xff]   ;;  %v333_v39 = vpack.c.bf16 %v199_v34, %v198_v33  ;;  %v5164_v40 = vld [vmem:[#allocation11 + $0x20] sm:$0xff]   ;;  %v5165_v41 = vld [vmem:[#allocation11 + $0x18] sm:$0xff]  }
  0x84   :  { %4788 = vmatprep.subr.bf16.mxu0 %v5154_v7  ;;  %v5166_v42 = vld [vmem:[#allocation11 + $0x10] sm:$0xff]   ;;  %v5167_v43 = vld [vmem:[#allocation11 + $0x8] sm:$0xff]   ;;  %v5168_v44 = vld [vmem:[#allocation11] sm:$0xff]  }
  0x85   :  { %v202_v45 = vld [vmem:[#allocation7 + $0x10] sm:$0xff]  ;;  %v203_v46 = vld [vmem:[#allocation7 + $0x18] sm:$0xff]  ;;  %v204_v48 = vld [vmem:[#allocation7 + $0x20] sm:$0xff] }
  0x86   :  { %4809 = vmatpush3.bf16.msra.mxu1 %v5149_v6  ;;  %v471_v47 = vpack.c.bf16 %v203_v46, %v202_v45  ;;  %v205_v49 = vld [vmem:[#allocation7 + $0x28] sm:$0xff]  ;;  %v206_v51 = vld [vmem:[#allocation7 + $0x30] sm:$0xff]  ;;  %v207_v52 = vld [vmem:[#allocation7 + $0x38] sm:$0xff] }
  0x87   :  { %4810 = vmatprep.subr.bf16.mxu1 %v5151_v8  ;;  %4789 = vmatpush3.bf16.msra.mxu0 %v5154_v7  ;;  %v472_v50 = vpack.c.bf16 %v205_v49, %v204_v48  ;;  %v473_v53 = vpack.c.bf16 %v207_v52, %v206_v51  ;;  %v4426_v57 = vld [vmem:[%s6347_s7] ss:$0 sm:$0xff] }
  0x88   :  { %4790 = vmatprep.subr.bf16.mxu0 %v5156_v11  ;;  %v4417_v1 = vld [vmem:[%s6346_s6] ss:$0 sm:$0xff] }
  0x89   :  { %v5813_v18 = vld [vmem:[%s6348_s8] ss:$0 sm:$0xff]  ;;  %s5571_s8 = smov 32  }
  0x8a   :  { %4811 = vmatpush3.bf16.msra.mxu1 %v5151_v8 }
  0x8b   :  { %4812 = vmatprep.subr.bf16.mxu1 %v5153_v13  ;;  %4791 = vmatpush3.bf16.msra.mxu0 %v5156_v11 }
  0x8c   :  { %4792 = vmatprep.subr.bf16.mxu0 %v5158_v15 }
  0x8e   :  { %4813 = vmatpush3.bf16.msra.mxu1 %v5153_v13 }
  0x8f   :  { %4814 = vmatprep.subr.bf16.mxu1 %v5155_v17  ;;  %4793 = vmatpush3.bf16.msra.mxu0 %v5158_v15 }
  0x90   :  { %4794 = vmatprep.subr.bf16.mxu0 %v5159_v19 }
  0x92   :  { %4815 = vmatpush3.bf16.msra.mxu1 %v5155_v17 }
  0x93   :  { %4816 = vmatprep.subr.bf16.mxu1 %v5157_v20  ;;  %4795 = vmatpush3.bf16.msra.mxu0 %v5159_v19 }
  0x94   :  { %4796 = vmatprep.subr.bf16.mxu0 %v5160_v23 }
  0x96   :  { %4817 = vmatpush3.bf16.msra.mxu1 %v5157_v20 }
  0x97   :  { %4797 = vmatpush3.bf16.msra.mxu0 %v5160_v23  ;;  %4864 = vmatprep.subr.mxu1 %v5568_v54 }
  0x98   :  { %4826 = vmatprep.subr.bf16.mxu0 %v5161_v28 }
  0x99   :  { %4819 = vmatmul.mubr.bf16.vlgmr.msra.gmra.mxu1 %v331_v31 }
  0x9a   :  { %4822 = vmatprep.mubr.bf16.mxu1 %v332_v32  ;;  %4799 = vmatmul.mubr.bf16.vlgmr.msra.gmra.mxu0 %v209_v35 }
  0x9b   :  { %4827 = vmatpush3.bf16.msra.mxu0 %v5161_v28  ;;  %4842 = vmatprep.mubr.bf16.mxu0 %v470_v37 }
  0x9c   :  { %4828 = vmatprep.subr.bf16.mxu0 %v5162_v36 }
  0x9f   :  { %4829 = vmatpush3.bf16.msra.mxu0 %v5162_v36 }
  0xa0   :  { %4830 = vmatprep.subr.bf16.mxu0 %v5163_v38 }
  0xa1   :  { %4823 = vmatmul.mubr.bf16.gmra.mxu1 %v333_v39 }
  0xa2   :  { %4868 = vmatprep.mubr.msk.f32.mxu1 %vm5569_vm0, %v5568_v54 }
  0xa3   :  { %4831 = vmatpush3.bf16.msra.mxu0 %v5163_v38 }
  0xa4   :  { %4832 = vmatprep.subr.bf16.mxu0 %v5164_v40 }
  0xa7   :  { %4833 = vmatpush3.bf16.msra.mxu0 %v5164_v40 }
  0xa8   :  { %4834 = vmatprep.subr.bf16.mxu0 %v5165_v41 }
  0xab   :  { %4835 = vmatpush3.bf16.msra.mxu0 %v5165_v41 }
  0xac   :  { %4836 = vmatprep.subr.bf16.mxu0 %v5166_v42 }
  0xaf   :  { %4837 = vmatpush3.bf16.msra.mxu0 %v5166_v42 }
  0xb0   :  { %4838 = vmatprep.subr.bf16.mxu0 %v5167_v43 }
  0xb3   :  { %4839 = vmatpush3.bf16.msra.mxu0 %v5167_v43 }
  0xb4   :  { %4840 = vmatprep.subr.bf16.mxu0 %v5168_v44 }
  0xb7   :  { %4841 = vmatpush3.bf16.msra.mxu0 %v5168_v44 }
  0xb8   :  { %4850 = vmatprep.subr.mxu0 %v5568_v54 }
  0xba   :  { %4843 = vmatmul.mubr.bf16.vlgmr.msra.gmra.mxu0 %v471_v47 }
  0xbb   :  { %4846 = vmatprep.mubr.bf16.mxu0 %v472_v50 }
  0xc2   :  { %4847 = vmatmul.mubr.bf16.gmra.mxu0 %v473_v53 }
  0xc3   :  { %4854 = vmatprep.mubr.msk.f32.mxu0 %vm5569_vm0, %v5568_v54 }
 0x159   :  { %v4820_v55 = vpop.f32.mrf.mxu1 }
 0x15a   :  { %v4800_v62 = vpop.f32.mrf.mxu0  ;;  %v5772_v10 = vadd.f32 %v4820_v55, %v4426_v57 }
 0x15b   :  { %v439_v56 = vpop.f32.mrf.mxu1  ;;  %v5782_v13 = vadd.f32 %v4800_v62, %v4417_v1 }
 0x15c   :  { %v5745_v0 = vadd.f32 %v4426_v57, %v439_v56  ;;  %v315_v3 = vpop.f32.mrf.mxu0 }
 0x15d   :  { %v4821_v58 = vpop.f32.mrf.mxu1  ;;  %v5755_v5 = vadd.f32 %v4417_v1, %v315_v3 }
 0x15e   :  { %v5739_v59 = vadd.f32 %v4821_v58, %v4426_v57  ;;  %v4801_v8 = vpop.f32.mrf.mxu0 }
 0x15f   :  { %v442_v60 = vpop.f32.mrf.mxu1  ;;  %v5803_v16 = vadd.f32 %v4801_v8, %v4417_v1 }
 0x160   :  { %v5741_v61 = vadd.f32 %v4426_v57, %v442_v60  ;;  %1350 = vrot.lane.b32.xlu1 %v5739_v59, %s5570_s30  ;;  %v318_v11 = vpop.f32.mrf.mxu0 }
 0x161   :  { %v4824_v63 = vpop.f32.mrf.mxu1  ;;  %v5784_v14 = vadd.f32 %v4417_v1, %v318_v11 }
 0x162   :  { %4851 = vmatpush3.xpose.msk.msra.mxu0 %vm610_vm1, %v5741_v61  ;;  %v5792_v15 = vadd.f32 %v4824_v63, %v4426_v57 }
 0x163   :  { %v455_v2 = vpop.f32.mrf.mxu1  ;;  %4852 = vmatprep.subr.mxu0 %v5568_v54 }
 0x164   :  { %1266 = vrot.lane.b32.xlu1 %v5745_v0, %s5570_s30  ;;  %v5764_v9 = vadd.f32 %v4426_v57, %v455_v2 }
 0x165   :  { %v4825_v4 = vpop.f32.mrf.mxu1 }
 0x166   :  { %4853 = vmatpush3.xpose.msk.msra.mxu0 %vm610_vm1, %v5745_v0  ;;  %v5776_v12 = vadd.f32 %v4825_v4, %v4426_v57 }
 0x167   :  { %v458_v6 = vpop.f32.mrf.mxu1  ;;  %4857 = vmatprep.subr.mxu0 %v5568_v54 }
 0x168   :  { %v5760_v7 = vadd.f32 %v4426_v57, %v458_v6 }
 0x169   :  { %4855 = vmatmul.mubr.msk.f32.vlgmr.msra.gmra.mxu0 %vm610_vm1, %v5755_v5 }
 0x16a   :  { %4858 = vmatpush3.xpose.msk.msra.mxu0 %vm610_vm1, %v5739_v59  ;;  %4865 = vmatpush3.xpose.msk.msra.mxu1 %vm610_vm1, %v5760_v7 }
 0x16b   :  { %4859 = vmatprep.subr.mxu0 %v5568_v54  ;;  %4866 = vmatprep.subr.mxu1 %v5568_v54 }
 0x16c   :  { %4861 = vmatprep.mubr.msk.f32.mxu0 %vm5569_vm0, %v5568_v54 }
 0x16e   :  { %4860 = vmatpush3.xpose.msk.msra.mxu0 %vm610_vm1, %v5772_v10  ;;  %4867 = vmatpush3.xpose.msk.msra.mxu1 %vm610_vm1, %v5764_v9 }
 0x16f   :  { %4871 = vmatprep.subr.mxu1 %v5568_v54  ;;  %4885 = vmatprep.subr.mxu0 %v5568_v54 }
 0x171   :  { %4862 = vmatmul.mubr.msk.f32.vlgmr.msra.gmra.mxu0 %vm610_vm1, %v5784_v14  ;;  %4869 = vmatmul.mubr.msk.f32.vlgmr.msra.gmra.mxu1 %vm610_vm1, %v5782_v13 }
 0x172   :  { %4872 = vmatpush3.xpose.msk.msra.mxu1 %vm610_vm1, %v5776_v12  ;;  %4875 = vmatprep.mubr.msk.f32.mxu1 %vm5569_vm0, %v5568_v54 }
 0x173   :  { %4873 = vmatprep.subr.mxu1 %v5568_v54  ;;  %4889 = vmatprep.mubr.msk.f32.mxu0 %vm5569_vm0, %v5568_v54 }
 0x176   :  { %4874 = vmatpush3.xpose.msk.msra.mxu1 %vm610_vm1, %v5792_v15 }
 0x177   :  { %4878 = vmatprep.subr.mxu1 %v5568_v54 }
 0x179   :  { %4876 = vmatmul.mubr.msk.f32.vlgmr.msra.gmra.mxu1 %vm610_vm1, %v5803_v16 }
 0x17a   :  { %4882 = vmatprep.mubr.msk.f32.mxu1 %vm5569_vm0, %v5568_v54  ;;  %v4844_v17 = vpop.f32.mrf.mxu0 }
 0x17b   :  { %v5816_v21 = vadd.f32 %v4844_v17, %v5813_v18 }
 0x17c   :  { %v579_v19 = vpop.f32.mrf.mxu0 }
 0x17d   :  { %v5822_v24 = vadd.f32 %v5813_v18, %v579_v19 }
 0x17e   :  { %v4845_v20 = vpop.f32.mrf.mxu0 }
 0x17f   :  { %v5819_v22 = vadd.f32 %v4845_v20, %v5813_v18 }
 0x180   :  { %v582_v23 = vpop.f32.mrf.mxu0 }
 0x181   :  { %v5825_v25 = vadd.f32 %v5813_v18, %v582_v23  ;;  %4886 = vmatpush3.msra.mxu0 %v5819_v22 }
 0x182   :  { %4887 = vmatprep.subr.mxu0 %v5568_v54  ;;  %v4848_v26 = vpop.f32.mrf.mxu0 }
 0x183   :  { %4879 = vmatpush3.msra.mxu1 %v5825_v25  ;;  %4888 = vmatpush3.msra.mxu0 %v5816_v21  ;;  %v5834_v27 = vadd.f32 %v4848_v26, %v5813_v18 }
 0x184   :  { %4880 = vmatprep.subr.mxu1 %v5568_v54  ;;  %4899 = vmatprep.subr.mxu0 %v5568_v54  ;;  %v595_v28 = vpop.f32.mrf.mxu0 }
 0x185   :  { %4881 = vmatpush3.msra.mxu1 %v5822_v24  ;;  %v5839_v29 = vadd.f32 %v5813_v18, %v595_v28 }
 0x186   :  { %4892 = vmatprep.subr.mxu1 %v5568_v54  ;;  %v4849_v30 = vpop.f32.mrf.mxu0 }
 0x187   :  { %v5842_v31 = vadd.f32 %v4849_v30, %v5813_v18 }
 0x188   :  { %v5844_v32 = vpop.f32.mrf.mxu0 }
 0x189   :  { %v5882_v30 = vadd.f32 %v5813_v18, %v5844_v32 }
 0x1d2   :  { %v5854_v45 = vpop.permute.xlu1 %1350 }
 0x1d6   :  { %v5856_v49 = vpop.permute.xlu1 %1266 }
 0x229   :  { %v686_v33 = vpop.f32.mrf.mxu0 }
 0x22a   :  { %v928_v34 = vsel %vm927_vm2, %v686_v33, -inf }
 0x22b   :  { %929 = vmax.xlane.f32.xlu0 %v928_v34  ;;  %v4856_v35 = vpop.f32.mrf.mxu0 }
 0x231   :  { %v765_v36 = vpop.f32.mrf.mxu0  ;;  %v844_v37 = vpop.f32.mrf.mxu1 }
 0x232   :  { %v934_v38 = vsel %vm927_vm2, %v844_v37, -inf  ;;  %v931_v39 = vsel %vm927_vm2, %v765_v36, -inf }
 0x233   :  { %935 = vmax.xlane.f32.xlu1 %v934_v38  ;;  %v4870_v40 = vpop.f32.mrf.mxu1  ;;  %932 = vmax.xlane.f32.xlu0 %v931_v39  ;;  %v4863_v41 = vpop.f32.mrf.mxu0 }
 0x239   :  { %v923_v42 = vpop.f32.mrf.mxu1 }
 0x23a   :  { %v937_v43 = vsel %vm927_vm2, %v923_v42, -inf }
 0x23b   :  { %938 = vmax.xlane.f32.xlu1 %v937_v43  ;;  %v4877_v44 = vpop.f32.mrf.mxu1 }
 0x249   :  { %1268 = vrot.lane.b32.xlu0 %v5741_v61, %s5570_s30 }
 0x24c   :  { %1348 = vrot.lane.b32.xlu1 %v5772_v10, %s5570_s30 }
 0x2b4   :  { %v930_v46 = vpop.xlane.xlu0 %929 }
 0x2b5   :  { %v940_v47 = vsub.f32 %v686_v33, %v930_v46 }
 0x2b7   :  { %v944_v48 = vmul.f32 1.442695, %v940_v47 }
 0x2b9   :  { %5257 = vpow2.f32 %v944_v48 }
 0x2bc   :  { %v936_v50 = vpop.xlane.xlu1 %935  ;;  %v933_v51 = vpop.xlane.xlu0 %932 }
 0x2bd   :  { %v942_v52 = vsub.f32 %v844_v37, %v936_v50  ;;  %v941_v53 = vsub.f32 %v765_v36, %v933_v51 }
 0x2bf   :  { %v948_v55 = vmul.f32 1.442695, %v942_v52  ;;  %v946_v56 = vmul.f32 1.442695, %v941_v53 }
 0x2c0   :  { %v1269_v11 = vpop.permute.xlu0 %1268 }
 0x2c1   :  { %5259 = vpow2.f32 %v948_v55 }
 0x2c2   :  { %5261 = vpow2.f32 %v946_v56 }
 0x2c4   :  { %v939_v2 = vpop.xlane.xlu1 %938 }
 0x2c5   :  { %v943_v3 = vsub.f32 %v923_v42, %v939_v2 }
 0x2c6   :  { %v5258_v57 = vpop.eup %5257 }
 0x2c7   :  { %v952_v58 = vsel %vm927_vm2, %v5258_v57, 0.0  ;;  %v950_v4 = vmul.f32 1.442695, %v943_v3 }
 0x2c8   :  { %953 = vadd.xlane.f32.xlu0 %v952_v58  ;;  %v1349_v19 = vpop.permute.xlu1 %1348 }
 0x2c9   :  { %5263 = vpow2.f32 %v950_v4 }
 0x2ce   :  { %v5260_v60 = vpop.eup %5259 }
 0x2cf   :  { %v5262_v62 = vpop.eup %5261  ;;  %v958_v63 = vsel %vm927_vm2, %v5260_v60, 0.0 }
 0x2d0   :  { %959 = vadd.xlane.f32.xlu0 %v958_v63  ;;  %v955_v1 = vsel %vm927_vm2, %v5262_v62, 0.0 }
 0x2d1   :  { %956 = vadd.xlane.f32.xlu1 %v955_v1 }
 0x2d6   :  { %v5264_v6 = vpop.eup %5263 }
 0x2d7   :  { %v961_v8 = vsel %vm927_vm2, %v5264_v6, 0.0 }
 0x2e2   :  { %1346 = vrot.lane.b32.xlu1 %v5784_v14, %s5570_s30 }
 0x2e6   :  { %1264 = vrot.lane.b32.xlu0 %v5755_v5, %s5570_s30 }
 0x2ea   :  { %1432 = vrot.lane.b32.xlu0 %v5760_v7, %s5570_s30 }
 0x2ee   :  { %1430 = vrot.lane.b32.xlu0 %v5764_v9, %s5570_s30 }
 0x2f2   :  { %1428 = vrot.lane.b32.xlu0 %v5782_v13, %s5570_s30 }
 0x306   :  { %962 = vadd.xlane.f32.xlu1 %v961_v8 }
 0x317   :  { %1514 = vrot.lane.b32.xlu1 %v5776_v12, %s5570_s30 }
 0x31b   :  { %1512 = vrot.lane.b32.xlu1 %v5792_v15, %s5570_s30 }
 0x31f   :  { %1510 = vrot.lane.b32.xlu1 %v5803_v16, %s5570_s30 }
 0x351   :  { %v954_v17 = vpop.xlane.xlu0 %953 }
 0x352   :  { %5265 = vrcp.f32 %v954_v17 }
 0x359   :  { %v960_v20 = vpop.xlane.xlu0 %959 }
 0x35a   :  { %v957_v23 = vpop.xlane.xlu1 %956  ;;  %5267 = vrcp.f32 %v960_v20 }
 0x35b   :  { %5269 = vrcp.f32 %v957_v23 }
 0x35d   :  { %v1265_v34 = vpop.permute.xlu0 %1264 }
 0x35e   :  { %v1347_v39 = vpop.permute.xlu1 %1346 }
 0x35f   :  { %v5266_v26 = vpop.eup %5265 }
 0x360   :  { %v5878_v28 = vmul.f32 %v5266_v26, %v5258_v57 }
 0x361   :  { %v1433_v32 = vpop.permute.xlu0 %1432 }
 0x362   :  { %4883 = vmatmul.mubr.msk.f32.vlgmr.msra.gmra.mxu1 %vm927_vm2, %v5878_v28 }
 0x363   :  { %4893 = vmatpush3.msra.mxu1 %v5882_v30  ;;  %4896 = vmatprep.mubr.msk.f32.mxu1 %vm5569_vm0, %v5568_v54 }
 0x364   :  { %4894 = vmatprep.subr.mxu1 %v5568_v54 }
 0x365   :  { %4895 = vmatpush3.msra.mxu1 %v5839_v29  ;;  %v1431_v37 = vpop.permute.xlu0 %1430 }
 0x366   :  { %4906 = vmatprep.subr.mxu1 %v5568_v54 }
 0x367   :  { %v5268_v33 = vpop.eup %5267 }
 0x368   :  { %v5270_v35 = vpop.eup %5269  ;;  %v5892_v36 = vmul.f32 %v5268_v33, %v5260_v60 }
 0x369   :  { %v5894_v18 = vmul.f32 %v5270_v35, %v5262_v62  ;;  %v1429_v38 = vpop.permute.xlu0 %1428 }
 0x36a   :  { %4897 = vmatmul.mubr.msk.f32.vlgmr.msra.gmra.mxu1 %vm927_vm2, %v5892_v36 }
 0x36b   :  { %4890 = vmatmul.mubr.msk.f32.vlgmr.msra.gmra.mxu0 %vm927_vm2, %v5894_v18  ;;  %4907 = vmatpush3.xpose.msk.msra.mxu1 %vm610_vm1, %v1269_v11 }
 0x36c   :  { %4900 = vmatpush3.msra.mxu0 %v5842_v31  ;;  %4908 = vmatprep.subr.mxu1 %v5568_v54 }
 0x36d   :  { %4901 = vmatprep.subr.mxu0 %v5568_v54  ;;  %4910 = vmatprep.mubr.msk.f32.mxu1 %vm5569_vm0, %v5568_v54 }
 0x36e   :  { %4902 = vmatpush3.msra.mxu0 %v5834_v27  ;;  %4903 = vmatprep.mubr.msk.f32.mxu0 %vm5569_vm0, %v5568_v54 }
 0x36f   :  { %4909 = vmatpush3.xpose.msk.msra.mxu1 %vm610_vm1, %v5856_v49  ;;  %4913 = vmatprep.subr.mxu0 %v5568_v54 }
 0x370   :  { %4920 = vmatprep.subr.mxu1 %v5568_v54 }
 0x372   :  { %4911 = vmatmul.mubr.msk.f32.vlgmr.msra.gmra.mxu1 %vm610_vm1, %v1265_v34 }
 0x373   :  { %4921 = vmatpush3.xpose.msk.msra.mxu1 %vm610_vm1, %v1433_v32  ;;  %4924 = vmatprep.mubr.msk.f32.mxu1 %vm5569_vm0, %v5568_v54 }
 0x374   :  { %4922 = vmatprep.subr.mxu1 %v5568_v54 }
 0x377   :  { %4923 = vmatpush3.xpose.msk.msra.mxu1 %vm610_vm1, %v1431_v37 }
 0x378   :  { %4934 = vmatprep.subr.mxu1 %v5568_v54 }
 0x37a   :  { %4925 = vmatmul.mubr.msk.f32.vlgmr.msra.gmra.mxu1 %vm610_vm1, %v1429_v38 }
 0x37b   :  { %4938 = vmatprep.mubr.msk.f32.mxu1 %vm5569_vm0, %v5568_v54 }
 0x38f   :  { %v963_v40 = vpop.xlane.xlu1 %962 }
 0x390   :  { %5271 = vrcp.f32 %v963_v40 }
 0x393   :  { %v1515_v43 = vpop.permute.xlu1 %1514 }
 0x397   :  { %v1513_v44 = vpop.permute.xlu1 %1512 }
 0x39d   :  { %v5272_v41 = vpop.eup %5271 }
 0x39e   :  { %v5923_v42 = vmul.f32 %v5272_v41, %v5264_v6 }
 0x3a0   :  { %4904 = vmatmul.mubr.msk.f32.vlgmr.msra.gmra.mxu0 %vm927_vm2, %v5923_v42 }
 0x3a1   :  { %4914 = vmatpush3.xpose.msk.msra.mxu0 %vm610_vm1, %v5854_v45  ;;  %4917 = vmatprep.mubr.msk.f32.mxu0 %vm5569_vm0, %v5568_v54  ;;  %v1511_v45 = vpop.permute.xlu1 %1510 }
 0x3a2   :  { %4915 = vmatprep.subr.mxu0 %v5568_v54 }
 0x3a5   :  { %4916 = vmatpush3.xpose.msk.msra.mxu0 %vm610_vm1, %v1349_v19 }
 0x3a6   :  { %4927 = vmatprep.subr.mxu0 %v5568_v54 }
 0x3a8   :  { %4918 = vmatmul.mubr.msk.f32.vlgmr.msra.gmra.mxu0 %vm610_vm1, %v1347_v39 }
 0x3a9   :  { %4928 = vmatpush3.xpose.msk.msra.mxu0 %vm610_vm1, %v1515_v43  ;;  %4931 = vmatprep.mubr.msk.f32.mxu0 %vm5569_vm0, %v5568_v54 }
 0x3aa   :  { %4929 = vmatprep.subr.mxu0 %v5568_v54 }
 0x3ad   :  { %4930 = vmatpush3.xpose.msk.msra.mxu0 %vm610_vm1, %v1513_v44 }
 0x3ae   :  { %4941 = vmatprep.subr.mxu0 %v5568_v54 }
 0x3b0   :  { %4932 = vmatmul.mubr.msk.f32.vlgmr.msra.gmra.mxu0 %vm610_vm1, %v1511_v45 }
 0x3b1   :  { %4945 = vmatprep.mubr.msk.f32.mxu0 %vm5569_vm0, %v5568_v54 }
 0x422   :  { %v5944_v46 = vpop.f32.mrf.mxu1 }
 0x424   :  { %v4884_v47 = vpop.f32.mrf.mxu1 }
 0x42a   :  { %v5946_v48 = vpop.f32.mrf.mxu1 }
 0x42b   :  { %v5948_v49 = vpop.f32.mrf.mxu0 }
 0x42c   :  { %v4898_v50 = vpop.f32.mrf.mxu1 }
 0x42d   :  { %v4891_v51 = vpop.f32.mrf.mxu0 }
 0x432   :  { %v1342_v52 = vpop.f32.mrf.mxu1 }
 0x433   :  { %v1592_v53 = vsel %vm927_vm2, %v1342_v52, -inf }
 0x434   :  { %1593 = vmax.xlane.f32.xlu0 %v1592_v53  ;;  %v4912_v55 = vpop.f32.mrf.mxu1 }
 0x43a   :  { %v1506_v56 = vpop.f32.mrf.mxu1 }
 0x43b   :  { %v1598_v57 = vsel %vm927_vm2, %v1506_v56, -inf }
 0x43c   :  { %1599 = vmax.xlane.f32.xlu0 %v1598_v57  ;;  %v4926_v58 = vpop.f32.mrf.mxu1 }
 0x460   :  { %v5952_v60 = vpop.f32.mrf.mxu0 }
 0x462   :  { %v4905_v62 = vpop.f32.mrf.mxu0 }
 0x468   :  { %v1424_v63 = vpop.f32.mrf.mxu0 }
 0x469   :  { %v1595_v1 = vsel %vm927_vm2, %v1424_v63, -inf }
 0x46a   :  { %1596 = vmax.xlane.f32.xlu1 %v1595_v1  ;;  %v4919_v2 = vpop.f32.mrf.mxu0 }
 0x470   :  { %v1588_v3 = vpop.f32.mrf.mxu0 }
 0x471   :  { %v1601_v4 = vsel %vm927_vm2, %v1588_v3, -inf }
 0x472   :  { %1602 = vmax.xlane.f32.xlu0 %v1601_v4  ;;  %v4933_v6 = vpop.f32.mrf.mxu0 }
 0x47b   :  { %1725 = vrot.lane.b32.xlu1 %v5819_v22, %s5570_s30 }
 0x47f   :  { %1642 = vrot.lane.b32.xlu1 %v5822_v24, %s5570_s30 }
 0x483   :  { %1723 = vrot.lane.b32.xlu1 %v5816_v21, %s5570_s30 }
 0x487   :  { %1887 = vrot.lane.b32.xlu1 %v5842_v31, %s5570_s30 }
 0x488   :  { %1644 = vrot.lane.b32.xlu0 %v5825_v25, %s5570_s30 }
 0x48b   :  { %1885 = vrot.lane.b32.xlu1 %v5834_v27, %s5570_s30 }
 0x48c   :  { %1806 = vrot.lane.b32.xlu0 %v5882_v30, %s5570_s30 }
 0x48f   :  { %2050 = vrot.lane.b32.xlu1 %v5739_v59, %s5557_s29 }
 0x490   :  { %1804 = vrot.lane.b32.xlu0 %v5839_v29, %s5570_s30 }
 0x493   :  { %2048 = vrot.lane.b32.xlu1 %v5772_v10, %s5557_s29 }
 0x494   :  { %1968 = vrot.lane.b32.xlu0 %v5741_v61, %s5557_s29 }
 0x498   :  { %1966 = vrot.lane.b32.xlu0 %v5745_v0, %s5557_s29 }
 0x4bd   :  { %v1594_v8 = vpop.xlane.xlu0 %1593 }
 0x4be   :  { %v1604_v11 = vsub.f32 %v1342_v52, %v1594_v8 }
 0x4c0   :  { %v1608_v17 = vmul.f32 1.442695, %v1604_v11 }
 0x4c2   :  { %5273 = vpow2.f32 %v1608_v17 }
 0x4c5   :  { %v1600_v19 = vpop.xlane.xlu0 %1599 }
 0x4c6   :  { %v1606_v20 = vsub.f32 %v1506_v56, %v1600_v19 }
 0x4c8   :  { %v1612_v23 = vmul.f32 1.442695, %v1606_v20 }
 0x4ca   :  { %5275 = vpow2.f32 %v1612_v23 }
 0x4cf   :  { %v5274_v26 = vpop.eup %5273 }
 0x4d0   :  { %v1616_v33 = vsel %vm927_vm2, %v5274_v26, 0.0 }
 0x4d1   :  { %1617 = vadd.xlane.f32.xlu0 %v1616_v33 }
 0x4d7   :  { %v5276_v34 = vpop.eup %5275 }
 0x4d8   :  { %v1622_v35 = vsel %vm927_vm2, %v5276_v34, 0.0 }
 0x4d9   :  { %1623 = vadd.xlane.f32.xlu0 %v1622_v35 }
 0x4ef   :  { %1964 = vrot.lane.b32.xlu0 %v5755_v5, %s5557_s29 }
 0x4f3   :  { %v1597_v32 = vpop.xlane.xlu1 %1596  ;;  %2132 = vrot.lane.b32.xlu0 %v5760_v7, %s5557_s29 }
 0x4f4   :  { %v1605_v37 = vsub.f32 %v1424_v63, %v1597_v32 }
 0x4f6   :  { %v1610_v38 = vmul.f32 1.442695, %v1605_v37 }
 0x4f7   :  { %v1726_v39 = vpop.permute.xlu1 %1725  ;;  %2130 = vrot.lane.b32.xlu0 %v5764_v9, %s5557_s29 }
 0x4f8   :  { %5277 = vpow2.f32 %v1610_v38  ;;  %4942 = vmatpush3.msra.mxu0 %v1726_v39 }
 0x4f9   :  { %4943 = vmatprep.subr.mxu0 %v5568_v54 }
 0x4fb   :  { %v1643_v40 = vpop.permute.xlu1 %1642  ;;  %v1603_v41 = vpop.xlane.xlu0 %1602  ;;  %2128 = vrot.lane.b32.xlu0 %v5782_v13, %s5557_s29 }
 0x4fc   :  { %v1607_v50 = vsub.f32 %v1588_v3, %v1603_v41 }
 0x4fe   :  { %v1614_v51 = vmul.f32 1.442695, %v1607_v50 }
 0x4ff   :  { %v1724_v43 = vpop.permute.xlu1 %1723  ;;  %v1645_v44 = vpop.permute.xlu0 %1644 }
 0x500   :  { %4935 = vmatpush3.msra.mxu1 %v1645_v44  ;;  %4944 = vmatpush3.msra.mxu0 %v1724_v43  ;;  %5279 = vpow2.f32 %v1614_v51 }
 0x501   :  { %4936 = vmatprep.subr.mxu1 %v5568_v54  ;;  %4955 = vmatprep.subr.mxu0 %v5568_v54 }
 0x502   :  { %4937 = vmatpush3.msra.mxu1 %v1643_v40 }
 0x503   :  { %4948 = vmatprep.subr.mxu1 %v5568_v54  ;;  %v1807_v55 = vpop.permute.xlu0 %1806  ;;  %v1888_v11 = vpop.permute.xlu1 %1887 }
 0x505   :  { %v5278_v45 = vpop.eup %5277 }
 0x506   :  { %v1619_v47 = vsel %vm927_vm2, %v5278_v45, 0.0 }
 0x507   :  { %1620 = vadd.xlane.f32.xlu1 %v1619_v47  ;;  %v1805_v56 = vpop.permute.xlu0 %1804  ;;  %v1886_v19 = vpop.permute.xlu1 %1885 }
 0x50b   :  { %v1969_v57 = vpop.permute.xlu0 %1968  ;;  %v2051_v23 = vpop.permute.xlu1 %2050 }
 0x50d   :  { %v5280_v52 = vpop.eup %5279 }
 0x50e   :  { %v1625_v53 = vsel %vm927_vm2, %v5280_v52, 0.0 }
 0x50f   :  { %v1967_v58 = vpop.permute.xlu0 %1966 }
 0x518   :  { %2046 = vrot.lane.b32.xlu1 %v5784_v14, %s5557_s29 }
 0x53c   :  { %1626 = vadd.xlane.f32.xlu1 %v1625_v53 }
 0x54d   :  { %2214 = vrot.lane.b32.xlu1 %v5776_v12, %s5557_s29 }
 0x551   :  { %2212 = vrot.lane.b32.xlu1 %v5792_v15, %s5557_s29 }
 0x555   :  { %2210 = vrot.lane.b32.xlu1 %v5803_v16, %s5557_s29 }
 0x55a   :  { %v1618_v62 = vpop.xlane.xlu0 %1617 }
 0x55b   :  { %5281 = vrcp.f32 %v1618_v62 }
 0x562   :  { %v1624_v63 = vpop.xlane.xlu0 %1623 }
 0x563   :  { %5283 = vrcp.f32 %v1624_v63 }
 0x566   :  { %v1965_v4 = vpop.permute.xlu0 %1964 }
 0x568   :  { %v5282_v1 = vpop.eup %5281 }
 0x569   :  { %v6004_v2 = vmul.f32 %v5282_v1, %v5274_v26  ;;  %v2049_v26 = vpop.permute.xlu1 %2048 }
 0x56a   :  { %v2133_v8 = vpop.permute.xlu0 %2132 }
 0x56b   :  { %4939 = vmatmul.mubr.msk.f32.vlgmr.msra.gmra.mxu1 %vm927_vm2, %v6004_v2 }
 0x56c   :  { %4949 = vmatpush3.msra.mxu1 %v1807_v55  ;;  %4952 = vmatprep.mubr.msk.f32.mxu1 %vm5569_vm0, %v5568_v54 }
 0x56d   :  { %4950 = vmatprep.subr.mxu1 %v5568_v54 }
 0x56e   :  { %4951 = vmatpush3.msra.mxu1 %v1805_v56  ;;  %v2131_v17 = vpop.permute.xlu0 %2130 }
 0x56f   :  { %4962 = vmatprep.subr.mxu1 %v5568_v54 }
 0x570   :  { %v5284_v3 = vpop.eup %5283 }
 0x571   :  { %v6012_v6 = vmul.f32 %v5284_v3, %v5276_v34 }
 0x572   :  { %v2129_v20 = vpop.permute.xlu0 %2128 }
 0x573   :  { %4953 = vmatmul.mubr.msk.f32.vlgmr.msra.gmra.mxu1 %vm927_vm2, %v6012_v6 }
 0x574   :  { %4963 = vmatpush3.xpose.msk.msra.mxu1 %vm610_vm1, %v1969_v57  ;;  %4966 = vmatprep.mubr.msk.f32.mxu1 %vm5569_vm0, %v5568_v54 }
 0x575   :  { %4964 = vmatprep.subr.mxu1 %v5568_v54 }
 0x578   :  { %4965 = vmatpush3.xpose.msk.msra.mxu1 %vm610_vm1, %v1967_v58 }
 0x579   :  { %4976 = vmatprep.subr.mxu1 %v5568_v54 }
 0x57b   :  { %4967 = vmatmul.mubr.msk.f32.vlgmr.msra.gmra.mxu1 %vm610_vm1, %v1965_v4 }
 0x57c   :  { %4977 = vmatpush3.xpose.msk.msra.mxu1 %vm610_vm1, %v2133_v8  ;;  %4980 = vmatprep.mubr.msk.f32.mxu1 %vm5569_vm0, %v5568_v54 }
 0x57d   :  { %4978 = vmatprep.subr.mxu1 %v5568_v54 }
 0x580   :  { %4979 = vmatpush3.xpose.msk.msra.mxu1 %vm610_vm1, %v2131_v17 }
 0x581   :  { %4990 = vmatprep.subr.mxu1 %v5568_v54 }
 0x583   :  { %4981 = vmatmul.mubr.msk.f32.vlgmr.msra.gmra.mxu1 %vm610_vm1, %v2129_v20 }
 0x584   :  { %4994 = vmatprep.mubr.msk.f32.mxu1 %vm5569_vm0, %v5568_v54 }
 0x590   :  { %v1621_v33 = vpop.xlane.xlu1 %1620 }
 0x591   :  { %5285 = vrcp.f32 %v1621_v33 }
 0x594   :  { %v2047_v32 = vpop.permute.xlu1 %2046 }
 0x59e   :  { %v5286_v34 = vpop.eup %5285 }
 0x59f   :  { %v6032_v35 = vmul.f32 %v5286_v34, %v5278_v45 }
 0x5a1   :  { %4946 = vmatmul.mubr.msk.f32.vlgmr.msra.gmra.mxu0 %vm927_vm2, %v6032_v35 }
 0x5a2   :  { %4956 = vmatpush3.msra.mxu0 %v1888_v11  ;;  %4959 = vmatprep.mubr.msk.f32.mxu0 %vm5569_vm0, %v5568_v54 }
 0x5a3   :  { %4957 = vmatprep.subr.mxu0 %v5568_v54 }
 0x5a4   :  { %4958 = vmatpush3.msra.mxu0 %v1886_v19 }
 0x5a5   :  { %4969 = vmatprep.subr.mxu0 %v5568_v54 }
 0x5c5   :  { %v1627_v37 = vpop.xlane.xlu1 %1626 }
 0x5c6   :  { %5287 = vrcp.f32 %v1627_v37 }
 0x5c9   :  { %v2215_v40 = vpop.permute.xlu1 %2214 }
 0x5cd   :  { %v2213_v41 = vpop.permute.xlu1 %2212 }
 0x5d1   :  { %v2211_v43 = vpop.permute.xlu1 %2210 }
 0x5d3   :  { %v5288_v38 = vpop.eup %5287 }
 0x5d4   :  { %v6040_v39 = vmul.f32 %v5288_v38, %v5280_v52 }
 0x5d6   :  { %4960 = vmatmul.mubr.msk.f32.vlgmr.msra.gmra.mxu0 %vm927_vm2, %v6040_v39 }
 0x5d7   :  { %4970 = vmatpush3.xpose.msk.msra.mxu0 %vm610_vm1, %v2051_v23  ;;  %4973 = vmatprep.mubr.msk.f32.mxu0 %vm5569_vm0, %v5568_v54 }
 0x5d8   :  { %4971 = vmatprep.subr.mxu0 %v5568_v54 }
 0x5db   :  { %4972 = vmatpush3.xpose.msk.msra.mxu0 %vm610_vm1, %v2049_v26 }
 0x5dc   :  { %4983 = vmatprep.subr.mxu0 %v5568_v54 }
 0x5de   :  { %4974 = vmatmul.mubr.msk.f32.vlgmr.msra.gmra.mxu0 %vm610_vm1, %v2047_v32 }
 0x5df   :  { %4984 = vmatpush3.xpose.msk.msra.mxu0 %vm610_vm1, %v2215_v40  ;;  %4987 = vmatprep.mubr.msk.f32.mxu0 %vm5569_vm0, %v5568_v54 }
 0x5e0   :  { %4985 = vmatprep.subr.mxu0 %v5568_v54 }
 0x5e3   :  { %4986 = vmatpush3.xpose.msk.msra.mxu0 %vm610_vm1, %v2213_v41 }
 0x5e4   :  { %4997 = vmatprep.subr.mxu0 %v5568_v54 }
 0x5e6   :  { %4988 = vmatmul.mubr.msk.f32.vlgmr.msra.gmra.mxu0 %vm610_vm1, %v2211_v43 }
 0x5e7   :  { %5001 = vmatprep.mubr.msk.f32.mxu0 %vm5569_vm0, %v5568_v54 }
 0x62b   :  { %v6060_v44 = vpop.f32.mrf.mxu1 }
 0x62d   :  { %v4940_v45 = vpop.f32.mrf.mxu1 }
 0x633   :  { %v6062_v47 = vpop.f32.mrf.mxu1 }
 0x635   :  { %v4954_v50 = vpop.f32.mrf.mxu1 }
 0x63b   :  { %v2042_v51 = vpop.f32.mrf.mxu1 }
 0x63c   :  { %v2292_v52 = vsel %vm927_vm2, %v2042_v51, -inf }
 0x63d   :  { %2293 = vmax.xlane.f32.xlu0 %v2292_v52  ;;  %v4968_v53 = vpop.f32.mrf.mxu1 }
 0x643   :  { %v2206_v55 = vpop.f32.mrf.mxu1 }
 0x644   :  { %v2298_v56 = vsel %vm927_vm2, %v2206_v55, -inf }
 0x645   :  { %2299 = vmax.xlane.f32.xlu0 %v2298_v56  ;;  %v4982_v57 = vpop.f32.mrf.mxu1 }
 0x661   :  { %v6066_v58 = vpop.f32.mrf.mxu0 }
 0x662   :  { %v5115_v62 = vpack.i.bf16 %v6066_v58, %v6060_v44 }
 0x663   :  { %v4947_v63 = vpop.f32.mrf.mxu0 }
 0x696   :  { %v6070_v1 = vpop.f32.mrf.mxu0 }
 0x698   :  { %v4961_v3 = vpop.f32.mrf.mxu0 }
 0x69e   :  { %v2124_v4 = vpop.f32.mrf.mxu0 }
 0x69f   :  { %v2295_v8 = vsel %vm927_vm2, %v2124_v4, -inf }
 0x6a0   :  { %2296 = vmax.xlane.f32.xlu1 %v2295_v8  ;;  %v4975_v11 = vpop.f32.mrf.mxu0 }
 0x6a1   :  { %v1636_v11 = vadd.f32 %v6004_v2, %v5878_v28 }
 0x6a6   :  { %v2288_v17 = vpop.f32.mrf.mxu0 }
 0x6a7   :  { %v2301_v19 = vsel %vm927_vm2, %v2288_v17, -inf }
 0x6a8   :  { %2302 = vmax.xlane.f32.xlu0 %v2301_v19  ;;  %v4989_v20 = vpop.f32.mrf.mxu0 }
 0x6b1   :  { %2421 = vrot.lane.b32.xlu1 %v5819_v22, %s5557_s29 }
 0x6b5   :  { %2340 = vrot.lane.b32.xlu1 %v5822_v24, %s5557_s29 }
 0x6b9   :  { %2419 = vrot.lane.b32.xlu1 %v5816_v21, %s5557_s29 }
 0x6bd   :  { %2579 = vrot.lane.b32.xlu1 %v5842_v31, %s5557_s29 }
 0x6be   :  { %2342 = vrot.lane.b32.xlu0 %v5825_v25, %s5557_s29 }
 0x6c1   :  { %2577 = vrot.lane.b32.xlu1 %v5834_v27, %s5557_s29 }
 0x6c2   :  { %2500 = vrot.lane.b32.xlu0 %v5882_v30, %s5557_s29 }
 0x6c5   :  { %2742 = vrot.lane.b32.xlu1 %v5739_v59, %s5571_s8 }
 0x6c6   :  { %2498 = vrot.lane.b32.xlu0 %v5839_v29, %s5557_s29  ;;  %v2294_v23 = vpop.xlane.xlu0 %2293 }
 0x6c7   :  { %v2304_v26 = vsub.f32 %v2042_v51, %v2294_v23 }
 0x6c9   :  { %2740 = vrot.lane.b32.xlu1 %v5772_v10, %s5571_s8  ;;  %v2308_v34 = vmul.f32 1.442695, %v2304_v26 }
 0x6ca   :  { %2660 = vrot.lane.b32.xlu0 %v5741_v61, %s5571_s8 }
 0x6cb   :  { %5289 = vpow2.f32 %v2308_v34 }
 0x6ce   :  { %2658 = vrot.lane.b32.xlu0 %v5745_v0, %s5571_s8  ;;  %v2300_v33 = vpop.xlane.xlu0 %2299 }
 0x6cf   :  { %v2306_v32 = vsub.f32 %v2206_v55, %v2300_v33 }
 0x6d1   :  { %v2312_v37 = vmul.f32 1.442695, %v2306_v32 }
 0x6d3   :  { %5291 = vpow2.f32 %v2312_v37 }
 0x6d8   :  { %v5290_v59 = vpop.eup %5289 }
 0x6d9   :  { %v2316_v38 = vsel %vm927_vm2, %v5290_v59, 0.0 }
 0x6e0   :  { %v5292_v40 = vpop.eup %5291 }
 0x6e1   :  { %v2322_v10 = vsel %vm927_vm2, %v5292_v40, 0.0 }
 0x6ed   :  { %2317 = vadd.xlane.f32.xlu0 %v2316_v38 }
 0x6f1   :  { %2323 = vadd.xlane.f32.xlu0 %v2322_v10 }
 0x707   :  { %2656 = vrot.lane.b32.xlu0 %v5755_v5, %s5571_s8 }
 0x70b   :  { %2824 = vrot.lane.b32.xlu0 %v5760_v7, %s5571_s8 }
 0x70f   :  { %2822 = vrot.lane.b32.xlu0 %v5764_v9, %s5571_s8 }
 0x713   :  { %2820 = vrot.lane.b32.xlu0 %v5782_v13, %s5571_s8 }
 0x729   :  { %v2297_v61 = vpop.xlane.xlu1 %2296 }
 0x72a   :  { %v2305_v0 = vsub.f32 %v2124_v4, %v2297_v61 }
 0x72c   :  { %v2310_v41 = vmul.f32 1.442695, %v2305_v0 }
 0x72d   :  { %v2422_v43 = vpop.permute.xlu1 %2421 }
 0x72e   :  { %5293 = vpow2.f32 %v2310_v41  ;;  %4998 = vmatpush3.msra.mxu0 %v2422_v43 }
 0x72f   :  { %4999 = vmatprep.subr.mxu0 %v5568_v54 }
 0x731   :  { %v2341_v45 = vpop.permute.xlu1 %2340  ;;  %v2303_v50 = vpop.xlane.xlu0 %2302 }
 0x732   :  { %v2307_v13 = vsub.f32 %v2288_v17, %v2303_v50 }
 0x734   :  { %v2314_v52 = vmul.f32 1.442695, %v2307_v13 }
 0x735   :  { %v2420_v5 = vpop.permute.xlu1 %2419  ;;  %v2343_v51 = vpop.permute.xlu0 %2342 }
 0x736   :  { %4991 = vmatpush3.msra.mxu1 %v2343_v51  ;;  %5000 = vmatpush3.msra.mxu0 %v2420_v5  ;;  %5295 = vpow2.f32 %v2314_v52 }
 0x737   :  { %4992 = vmatprep.subr.mxu1 %v5568_v54  ;;  %5011 = vmatprep.subr.mxu0 %v5568_v54 }
 0x738   :  { %4993 = vmatpush3.msra.mxu1 %v2341_v45 }
 0x739   :  { %5004 = vmatprep.subr.mxu1 %v5568_v54  ;;  %v2501_v53 = vpop.permute.xlu0 %2500 }
 0x73b   :  { %v5294_v7 = vpop.eup %5293 }
 0x73c   :  { %v2319_v9 = vsel %vm927_vm2, %v5294_v7, 0.0 }
 0x73d   :  { %2320 = vadd.xlane.f32.xlu1 %v2319_v9  ;;  %v2499_v55 = vpop.permute.xlu0 %2498 }
 0x741   :  { %v2661_v56 = vpop.permute.xlu0 %2660 }
 0x743   :  { %v6115_v57 = vpop.eup %5295 }
 0x744   :  { %v2325_v63 = vsel %vm927_vm2, %v6115_v57, 0.0 }
 0x745   :  { %v2659_v3 = vpop.permute.xlu0 %2658 }
 0x74e   :  { %2738 = vrot.lane.b32.xlu1 %v5784_v14, %s5571_s8 }
 0x772   :  { %2326 = vadd.xlane.f32.xlu1 %v2325_v63 }
 0x776   :  { %v2318_v4 = vpop.xlane.xlu0 %2317 }
 0x777   :  { %5297 = vrcp.f32 %v2318_v4 }
 0x77a   :  { %v2324_v8 = vpop.xlane.xlu0 %2323 }
 0x77b   :  { %5299 = vrcp.f32 %v2324_v8 }
 0x77e   :  { %v2657_v23 = vpop.permute.xlu0 %2656 }
 0x783   :  { %2906 = vrot.lane.b32.xlu1 %v5776_v12, %s5571_s8  ;;  %v1638_v12 = vadd.f32 %v6012_v6, %v5892_v36  ;;  %v2825_v36 = vpop.permute.xlu0 %2824  ;;  %v2580_v6 = vpop.permute.xlu1 %2579 }
 0x784   :  { %v5298_v14 = vpop.eup %5297 }
 0x785   :  { %v2332_v17 = vmul.f32 %v5298_v14, %v5290_v59  ;;  %v1637_v59 = vadd.f32 %v6032_v35, %v5894_v18  ;;  %v1639_v18 = vadd.f32 %v6040_v39, %v5923_v42 }
 0x787   :  { %2904 = vrot.lane.b32.xlu1 %v5792_v15, %s5571_s8  ;;  %v6125_v19 = vadd.f32 %v2332_v17, %v1636_v11  ;;  %4995 = vmatmul.mubr.msk.f32.vlgmr.msra.gmra.mxu1 %vm927_vm2, %v2332_v17  ;;  %v2823_v2 = vpop.permute.xlu0 %2822  ;;  %v2578_v26 = vpop.permute.xlu1 %2577 }
 0x788   :  { %v5300_v20 = vpop.eup %5299  ;;  %5005 = vmatpush3.msra.mxu1 %v2501_v53  ;;  %5008 = vmatprep.mubr.msk.f32.mxu1 %vm5569_vm0, %v5568_v54 }
 0x789   :  { %5006 = vmatprep.subr.mxu1 %v5568_v54  ;;  %v2334_v28 = vmul.f32 %v5300_v20, %v5292_v40 }
 0x78a   :  { %5007 = vmatpush3.msra.mxu1 %v2499_v55 }
 0x78b   :  { %5018 = vmatprep.subr.mxu1 %v5568_v54  ;;  %2902 = vrot.lane.b32.xlu1 %v5803_v16, %s5571_s8  ;;  %v6136_v15 = vadd.f32 %v2334_v28, %v1638_v12  ;;  %v2821_v16 = vpop.permute.xlu0 %2820  ;;  %v2743_v33 = vpop.permute.xlu1 %2742 }
 0x78c   :  { %5009 = vmatmul.mubr.msk.f32.vlgmr.msra.gmra.mxu1 %vm927_vm2, %v2334_v28 }
 0x78d   :  { %5019 = vmatpush3.xpose.msk.msra.mxu1 %vm610_vm1, %v2661_v56  ;;  %5022 = vmatprep.mubr.msk.f32.mxu1 %vm5569_vm0, %v5568_v54 }
 0x78e   :  { %5020 = vmatprep.subr.mxu1 %v5568_v54 }
 0x78f   :  { %v2741_v34 = vpop.permute.xlu1 %2740 }
 0x791   :  { %5021 = vmatpush3.xpose.msk.msra.mxu1 %vm610_vm1, %v2659_v3 }
 0x792   :  { %5032 = vmatprep.subr.mxu1 %v5568_v54 }
 0x794   :  { %5023 = vmatmul.mubr.msk.f32.vlgmr.msra.gmra.mxu1 %vm610_vm1, %v2657_v23 }
 0x795   :  { %5033 = vmatpush3.xpose.msk.msra.mxu1 %vm610_vm1, %v2825_v36  ;;  %5036 = vmatprep.mubr.msk.f32.mxu1 %vm5569_vm0, %v5568_v54 }
 0x796   :  { %5034 = vmatprep.subr.mxu1 %v5568_v54 }
 0x799   :  { %5035 = vmatpush3.xpose.msk.msra.mxu1 %vm610_vm1, %v2823_v2 }
 0x79a   :  { %5046 = vmatprep.subr.mxu1 %v5568_v54 }
 0x79c   :  { %5037 = vmatmul.mubr.msk.f32.vlgmr.msra.gmra.mxu1 %vm610_vm1, %v2821_v16 }
 0x79d   :  { %5050 = vmatprep.mubr.msk.f32.mxu1 %vm5569_vm0, %v5568_v54 }
 0x7c6   :  { %v2321_v32 = vpop.xlane.xlu1 %2320 }
 0x7c7   :  { %5301 = vrcp.f32 %v2321_v32 }
 0x7ca   :  { %v2739_v10 = vpop.permute.xlu1 %2738 }
 0x7d4   :  { %v5302_v37 = vpop.eup %5301 }
 0x7d5   :  { %v2333_v38 = vmul.f32 %v5302_v37, %v5294_v7 }
 0x7d7   :  { %v6157_v40 = vadd.f32 %v2333_v38, %v1637_v59  ;;  %5002 = vmatmul.mubr.msk.f32.vlgmr.msra.gmra.mxu0 %vm927_vm2, %v2333_v38 }
 0x7d8   :  { %5012 = vmatpush3.msra.mxu0 %v2580_v6  ;;  %5015 = vmatprep.mubr.msk.f32.mxu0 %vm5569_vm0, %v5568_v54 }
 0x7d9   :  { %5013 = vmatprep.subr.mxu0 %v5568_v54 }
 0x7da   :  { %5014 = vmatpush3.msra.mxu0 %v2578_v26 }
 0x7db   :  { %5025 = vmatprep.subr.mxu0 %v5568_v54 }
 0x7fb   :  { %v2327_v61 = vpop.xlane.xlu1 %2326 }
 0x7fc   :  { %5303 = vrcp.f32 %v2327_v61  ;;  %v5120_v61 = vpack.i.bf16 %v6070_v1, %v6062_v47 }
 0x7ff   :  { %v2907_v43 = vpop.permute.xlu1 %2906 }
 0x803   :  { %v2905_v42 = vpop.permute.xlu1 %2904 }
 0x807   :  { %v2903_v39 = vpop.permute.xlu1 %2902 }
 0x809   :  { %v5304_v0 = vpop.eup %5303 }
 0x80a   :  { %v2335_v35 = vmul.f32 %v5304_v0, %v6115_v57 }
 0x80c   :  { %v6167_v41 = vadd.f32 %v2335_v35, %v1639_v18  ;;  %5016 = vmatmul.mubr.msk.f32.vlgmr.msra.gmra.mxu0 %vm927_vm2, %v2335_v35 }
 0x80d   :  { %5026 = vmatpush3.xpose.msk.msra.mxu0 %vm610_vm1, %v2743_v33  ;;  %5029 = vmatprep.mubr.msk.f32.mxu0 %vm5569_vm0, %v5568_v54 }
 0x80e   :  { %5027 = vmatprep.subr.mxu0 %v5568_v54 }
 0x811   :  { %5028 = vmatpush3.xpose.msk.msra.mxu0 %vm610_vm1, %v2741_v34 }
 0x812   :  { %5039 = vmatprep.subr.mxu0 %v5568_v54 }
 0x814   :  { %5030 = vmatmul.mubr.msk.f32.vlgmr.msra.gmra.mxu0 %vm610_vm1, %v2739_v10 }
 0x815   :  { %5040 = vmatpush3.xpose.msk.msra.mxu0 %vm610_vm1, %v2907_v43  ;;  %5043 = vmatprep.mubr.msk.f32.mxu0 %vm5569_vm0, %v5568_v54 }
 0x816   :  { %5041 = vmatprep.subr.mxu0 %v5568_v54 }
 0x819   :  { %5042 = vmatpush3.xpose.msk.msra.mxu0 %vm610_vm1, %v2905_v42 }
 0x81a   :  { %5053 = vmatprep.subr.mxu0 %v5568_v54 }
 0x81c   :  { %5044 = vmatmul.mubr.msk.f32.vlgmr.msra.gmra.mxu0 %vm610_vm1, %v2903_v39 }
 0x81d   :  { %5057 = vmatprep.mubr.msk.f32.mxu0 %vm5569_vm0, %v5568_v54 }
 0x847   :  { %v2415_v45 = vpop.f32.mrf.mxu1 }
 0x849   :  { %v4996_v50 = vpop.f32.mrf.mxu1 }
 0x84c   :  { %v6186_v5 = vpop.f32.mrf.mxu1 }
 0x84e   :  { %v5010_v51 = vpop.f32.mrf.mxu1 }
 0x854   :  { %v2734_v7 = vpop.f32.mrf.mxu1 }
 0x855   :  { %v2984_v9 = vsel %vm927_vm2, %v2734_v7, -inf }
 0x856   :  { %2985 = vmax.xlane.f32.xlu0 %v2984_v9  ;;  %v5024_v13 = vpop.f32.mrf.mxu1 }
 0x85c   :  { %v2898_v52 = vpop.f32.mrf.mxu1 }
 0x85d   :  { %v2990_v53 = vsel %vm927_vm2, %v2898_v52, -inf }
 0x85e   :  { %2991 = vmax.xlane.f32.xlu0 %v2990_v53  ;;  %v5038_v55 = vpop.f32.mrf.mxu1 }
 0x897   :  { %v2494_v56 = vpop.f32.mrf.mxu0 }
 0x899   :  { %v5003_v57 = vpop.f32.mrf.mxu0 }
 0x8cc   :  { %v6190_v63 = vpop.f32.mrf.mxu0 }
 0x8cd   :  { %v5130_v0 = vpack.i.bf16 %v6190_v63, %v6186_v5 }
 0x8ce   :  { %v5017_v3 = vpop.f32.mrf.mxu0 }
 0x8cf   :  { %v5169_v3 = vld [vmem:[#allocation13 + $0x38] sm:$0xff]  }
 0x8d4   :  { %v2816_v4 = vpop.f32.mrf.mxu0 }
 0x8d5   :  { %v2987_v8 = vsel %vm927_vm2, %v2816_v4, -inf }
 0x8d6   :  { %2988 = vmax.xlane.f32.xlu1 %v2987_v8  ;;  %v5031_v14 = vpop.f32.mrf.mxu0  ;;  %v5172_v8 = vld [vmem:[#allocation13 + $0x20] sm:$0xff]  }
 0x8dc   :  { %v2980_v11 = vpop.f32.mrf.mxu0 }
 0x8dd   :  { %v2993_v17 = vsel %vm927_vm2, %v2980_v11, -inf }
 0x8de   :  { %2994 = vmax.xlane.f32.xlu0 %v2993_v17  ;;  %v5045_v20 = vpop.f32.mrf.mxu0 }
 0x8df   :  { %v2986_v12 = vpop.xlane.xlu0 %2985 }
 0x8e0   :  { %v2996_v23 = vsub.f32 %v2734_v7, %v2986_v12  ;;  %v5174_v12 = vld [vmem:[#allocation13 + $0x10] sm:$0xff]  }
 0x8e2   :  { %v3000_v36 = vmul.f32 1.442695, %v2996_v23  ;;  %v5175_v23 = vld [vmem:[#allocation13 + $0x8] sm:$0xff]  }
 0x8e4   :  { %5305 = vpow2.f32 %v3000_v36 }
 0x8e7   :  { %3113 = vrot.lane.b32.xlu1 %v5819_v22, %s5571_s8  ;;  %v2992_v28 = vpop.xlane.xlu0 %2991 }
 0x8e8   :  { %v2998_v22 = vsub.f32 %v2898_v52, %v2992_v28  ;;  %v5176_v28 = vld [vmem:[#allocation13] sm:$0xff]  }
 0x8ea   :  { %v3004_v2 = vmul.f32 1.442695, %v2998_v22 }
 0x8eb   :  { %3032 = vrot.lane.b32.xlu1 %v5822_v24, %s5571_s8 }
 0x8ec   :  { %5307 = vpow2.f32 %v3004_v2 }
 0x8ef   :  { %3111 = vrot.lane.b32.xlu1 %v5816_v21, %s5571_s8 }
 0x8f1   :  { %v5306_v24 = vpop.eup %5305 }
 0x8f2   :  { %v3008_v21 = vsel %vm927_vm2, %v5306_v24, 0.0 }
 0x8f3   :  { %3271 = vrot.lane.b32.xlu1 %v5842_v31, %s5571_s8 }
 0x8f4   :  { %3034 = vrot.lane.b32.xlu0 %v5825_v25, %s5571_s8  ;;  %v5125_v25 = vpack.i.bf16 %v2494_v56, %v2415_v45 }
 0x8f8   :  { %3192 = vrot.lane.b32.xlu0 %v5882_v30, %s5571_s8 }
 0x8f9   :  { %v5308_v16 = vpop.eup %5307 }
 0x8fa   :  { %v3014_v31 = vsel %vm927_vm2, %v5308_v16, 0.0 }
 0x917   :  { %3009 = vadd.xlane.f32.xlu0 %v3008_v21 }
 0x91b   :  { %3015 = vadd.xlane.f32.xlu0 %v3014_v31 }
 0x931   :  { %3190 = vrot.lane.b32.xlu0 %v5839_v29, %s5571_s8 }
 0x935   :  { %5116 = vrot.lane.b32.xlu0 %v5115_v62, %s5571_s8 }
 0x939   :  { %5126 = vrot.lane.b32.xlu0 %v5125_v25, %s5557_s29 }
 0x95f   :  { %v2989_v30 = vpop.xlane.xlu1 %2988 }
 0x960   :  { %v2997_v6 = vsub.f32 %v2816_v4, %v2989_v30  ;;  %v5171_v4 = vld [vmem:[#allocation13 + $0x28] sm:$0xff]  }
 0x962   :  { %v3002_v26 = vmul.f32 1.442695, %v2997_v6 }
 0x963   :  { %v3114_v33 = vpop.permute.xlu1 %3113 }
 0x964   :  { %5309 = vpow2.f32 %v3002_v26  ;;  %5054 = vmatpush3.msra.mxu0 %v3114_v33 }
 0x965   :  { %5055 = vmatprep.subr.mxu0 %v5568_v54 }
 0x967   :  { %v3033_v34 = vpop.permute.xlu1 %3032  ;;  %v2995_v32 = vpop.xlane.xlu0 %2994 }
 0x968   :  { %v2999_v37 = vsub.f32 %v2980_v11, %v2995_v32 }
 0x96a   :  { %v3006_v29 = vmul.f32 1.442695, %v2999_v37 }
 0x96b   :  { %v3112_v59 = vpop.permute.xlu1 %3111  ;;  %v3035_v38 = vpop.permute.xlu0 %3034 }
 0x96c   :  { %5311 = vpow2.f32 %v3006_v29  ;;  %5047 = vmatpush3.msra.mxu1 %v3035_v38  ;;  %5056 = vmatpush3.msra.mxu0 %v3112_v59 }
 0x96d   :  { %5048 = vmatprep.subr.mxu1 %v5568_v54  ;;  %5067 = vmatprep.subr.mxu0 %v5568_v54 }
 0x96e   :  { %5049 = vmatpush3.msra.mxu1 %v3033_v34 }
 0x96f   :  { %5060 = vmatprep.subr.mxu1 %v5568_v54  ;;  %v3193_v18 = vpop.permute.xlu0 %3192  ;;  %v3272_v51 = vpop.permute.xlu1 %3271 }
 0x971   :  { %v5310_v44 = vpop.eup %5309 }
 0x972   :  { %v3011_v58 = vsel %vm927_vm2, %v5310_v44, 0.0 }
 0x973   :  { %3012 = vadd.xlane.f32.xlu1 %v3011_v58 }
 0x979   :  { %v5312_v62 = vpop.eup %5311 }
 0x97a   :  { %v3017_v10 = vsel %vm927_vm2, %v5312_v62, 0.0 }
 0x97b   :  { %3018 = vadd.xlane.f32.xlu1 %v3017_v10 }
 0x98c   :  { %3269 = vrot.lane.b32.xlu1 %v5834_v27, %s5571_s8 }
 0x990   :  { %5121 = vrot.lane.b32.xlu1 %v5120_v61, %s5571_s8 }
 0x994   :  { %5131 = vrot.lane.b32.xlu1 %v5130_v0, %s5557_s29 }
 0x9a0   :  { %v3010_v35 = vpop.xlane.xlu0 %3009 }
 0x9a1   :  { %5313 = vrcp.f32 %v3010_v35 }
 0x9a4   :  { %v3016_v43 = vpop.xlane.xlu0 %3015 }
 0x9a5   :  { %5315 = vrcp.f32 %v3016_v43 }
 0x9a8   :  { %v3191_v47 = vpop.permute.xlu0 %3190 }
 0x9ac   :  { %v5117_v31 = vpop.permute.xlu0 %5116 }
 0x9ad   :  { %v5119_v30 = vunpack.i.h.bf16 %v5117_v31  ;;  %v5118_v6 = vunpack.i.l.bf16 %v5117_v31 }
 0x9ae   :  { %v5314_v42 = vpop.eup %5313 }
 0x9af   :  { %v3024_v39 = vmul.f32 %v5314_v42, %v5306_v24  ;;  %v3405_v37 = vsel %vm610_vm1, %v5948_v49, %v5119_v30  ;;  %v3404_v29 = vsel %vm610_vm1, %v5944_v46, %v5118_v6 }
 0x9b0   :  { %v5127_v25 = vpop.permute.xlu0 %5126 }
 0x9b1   :  { %v3028_v45 = vadd.f32 %v3024_v39, %v6125_v19  ;;  %5051 = vmatmul.mubr.msk.f32.vlgmr.msra.gmra.mxu1 %vm927_vm2, %v3024_v39  ;;  %v5129_v33 = vunpack.i.h.bf16 %v5127_v25  ;;  %v5128_v34 = vunpack.i.l.bf16 %v5127_v25 }
 0x9b2   :  { %v5316_v27 = vpop.eup %5315  ;;  %5061 = vmatpush3.msra.mxu1 %v3193_v18  ;;  %5064 = vmatprep.mubr.msk.f32.mxu1 %vm5569_vm0, %v5568_v54 }
 0x9b3   :  { %v3348_v1 = vmul.f32 0.25, %v3028_v45  ;;  %5062 = vmatprep.subr.mxu1 %v5568_v54  ;;  %v3026_v50 = vmul.f32 %v5316_v27, %v5308_v16  ;;  %v3410_v58 = vsel %vm3408_vm3, %v3405_v37, %v5129_v33  ;;  %v5185_v33 = vld [vmem:[#allocation14 + $0xc4] ss:$16 sps:$4 sm:$0xff]   ;;  %v5186_v37 = vld [vmem:[#allocation14 + $0xc8] ss:$16 sps:$4 sm:$0xff]  }
 0x9b4   :  { %5063 = vmatpush3.msra.mxu1 %v3191_v47 }
 0x9b5   :  { %3352 = vst.msk [vmem:[%s6360_s20] sm:$0xff] %vm927_vm2, %v3348_v1  ;;  %v3030_v19 = vadd.f32 %v3026_v50, %v6136_v15  ;;  %5065 = vmatmul.mubr.msk.f32.vlgmr.msra.gmra.mxu1 %vm927_vm2, %v3026_v50  ;;  %5074 = vmatprep.subr.bf16.mxu1 %v5169_v3 }
 0x9b6   :  { %5075 = vmatpush3.bf16.msra.mxu1 %v5169_v3 }
 0x9b7   :  { %v3350_v5 = vmul.f32 0.25, %v3030_v19 }
 0x9b9   :  { %3354 = vst.msk [vmem:[%s6360_s20 + $0x10] sm:$0xff] %vm927_vm2, %v3350_v5 }
 0x9fc   :  { %v3013_v7 = vpop.xlane.xlu1 %3012 }
 0x9fd   :  { %5317 = vrcp.f32 %v3013_v7 }
 0xa04   :  { %v3019_v9 = vpop.xlane.xlu1 %3018 }
 0xa05   :  { %5319 = vrcp.f32 %v3019_v9 }
 0xa08   :  { %v3270_v15 = vpop.permute.xlu1 %3269 }
 0xa0a   :  { %v5318_v13 = vpop.eup %5317 }
 0xa0b   :  { %v3025_v52 = vmul.f32 %v5318_v13, %v5310_v44  ;;  %v3409_v44 = vsel %vm3408_vm3, %v3404_v29, %v5128_v34  ;;  %v5188_v34 = vld [vmem:[#allocation14 + $0xcc] ss:$16 sps:$4 sm:$0xff]   ;;  %v5191_v29 = vld [vmem:[#allocation14 + $0xa4] ss:$16 sps:$4 sm:$0xff]  }
 0xa0c   :  { %v5122_v26 = vpop.permute.xlu1 %5121 }
 0xa0d   :  { %v3029_v53 = vadd.f32 %v3025_v52, %v6157_v40  ;;  %5058 = vmatmul.mubr.msk.f32.vlgmr.msra.gmra.mxu0 %vm927_vm2, %v3025_v52  ;;  %v5124_v18 = vunpack.i.h.bf16 %v5122_v26  ;;  %v5123_v35 = vunpack.i.l.bf16 %v5122_v26  ;;  %v5337_v52 = vld [vmem:[#allocation2] sm:$0xff] }
 0xa0e   :  { %5068 = vmatpush3.msra.mxu0 %v3272_v51  ;;  %5071 = vmatprep.mubr.msk.f32.mxu0 %vm5569_vm0, %v5568_v54 }
 0xa0f   :  { %v3349_v55 = vmul.f32 0.25, %v3029_v53  ;;  %5069 = vmatprep.subr.mxu0 %v5568_v54  ;;  %v5170_v54 = vld [vmem:[#allocation13 + $0x30] sm:$0xff]   ;;  %v3407_v46 = vsel %vm610_vm1, %v5952_v60, %v5124_v18  ;;  %v3406_v39 = vsel %vm610_vm1, %v5946_v48, %v5123_v35  ;;  %v4508_v60 = vld [vmem:[%s6350_s10] ss:$0 sm:$0xff]  ;;  %v5204_v35 = vld [vmem:[#allocation14 + $0x68] ss:$16 sps:$4 sm:$0xff]  }
 0xa10   :  { %5070 = vmatpush3.msra.mxu0 %v3270_v15  ;;  %5076 = vmatprep.subr.bf16.mxu1 %v5170_v54  ;;  %v5203_v18 = vld [vmem:[#allocation14 + $0x64] ss:$16 sps:$4 sm:$0xff]  }
 0xa11   :  { %3353 = vst.msk [vmem:[%s6360_s20 + $0x8] sm:$0xff] %vm927_vm2, %v3349_v55  ;;  %5077 = vmatpush3.bf16.msra.mxu1 %v5170_v54  ;;  %v5340_v54 = vld [vmem:[#allocation2 + $0x18] sm:$0xff] }
 0xa12   :  { %v5320_v56 = vpop.eup %5319  ;;  %5078 = vmatprep.subr.bf16.mxu1 %v5171_v4 }
 0xa13   :  { %v3027_v57 = vmul.f32 %v5320_v56, %v5312_v62  ;;  %v5132_v62 = vpop.permute.xlu1 %5131  ;;  %v5338_v56 = vld [vmem:[#allocation2 + $0x10] sm:$0xff] }
 0xa14   :  { %v5134_v43 = vunpack.i.h.bf16 %v5132_v62  ;;  %v5133_v42 = vunpack.i.l.bf16 %v5132_v62  ;;  %v5200_v62 = vld [vmem:[#allocation14 + $0x8c] ss:$16 sps:$4 sm:$0xff]  }
 0xa15   :  { %v3031_v40 = vadd.f32 %v3027_v57, %v6167_v41  ;;  %5072 = vmatmul.mubr.msk.f32.vlgmr.msra.gmra.mxu0 %vm927_vm2, %v3027_v57  ;;  %5079 = vmatpush3.bf16.msra.mxu1 %v5171_v4  ;;  %v5173_v41 = vld [vmem:[#allocation13 + $0x18] sm:$0xff]  }
 0xa16   :  { %5080 = vmatprep.subr.bf16.mxu1 %v5172_v8  ;;  %v3411_v47 = vsel %vm3408_vm3, %v3406_v39, %v5133_v42  ;;  %v3412_v1 = vsel %vm3408_vm3, %v3407_v46, %v5134_v43  ;;  %v5206_v43 = vld [vmem:[#allocation14 + $0x6c] ss:$16 sps:$4 sm:$0xff]   ;;  %v5209_v42 = vld [vmem:[#allocation14 + $0x44] ss:$16 sps:$4 sm:$0xff]   ;;  %v5207_v46 = vld [vmem:[#allocation14 + $0x40] ss:$16 sps:$4 sm:$0xff]  }
 0xa17   :  { %v3351_v63 = vmul.f32 0.25, %v3031_v40  ;;  %v5210_v39 = vld [vmem:[#allocation14 + $0x48] ss:$16 sps:$4 sm:$0xff]  }
 0xa19   :  { %3355 = vst.msk [vmem:[%s6360_s20 + $0x18] sm:$0xff] %vm927_vm2, %v3351_v63  ;;  %5081 = vmatpush3.bf16.msra.mxu1 %v5172_v8  ;;  %v5339_v63 = vld [vmem:[#allocation2 + $0x8] sm:$0xff]  ;;  %v5177_v8 = vld [vmem:[#allocation14 + $0xe0] ss:$16 sps:$4 sm:$0xff]  }
 0xa1a   :  { %5082 = vmatprep.subr.bf16.mxu1 %v5173_v41 }
 0xa1d   :  { %5083 = vmatpush3.bf16.msra.mxu1 %v5173_v41  ;;  %v5179_v41 = vld [vmem:[#allocation14 + $0xe4] ss:$16 sps:$4 sm:$0xff]  }
 0xa1e   :  { %5084 = vmatprep.subr.bf16.mxu1 %v5174_v12  ;;  %3827 = vmatprep.subr.bf16.mxu0 %v5179_v41  ;;  %v4517_v41 = vld [vmem:[%s6351_s11] ss:$0 sm:$0xff] }
 0xa1f   :  { %3828 = vmatpush1.bf16.msra.mxu0 %v5177_v8 }
 0xa20   :  { %3829 = vmatprep.subr.bf16.mxu0 %v5185_v33  ;;  %v5230_v33 = vld [vmem:[#allocation16 + $0xf0] sm:$0xff]  }
 0xa21   :  { %5085 = vmatpush3.bf16.msra.mxu1 %v5174_v12 }
 0xa22   :  { %5086 = vmatprep.subr.bf16.mxu1 %v5175_v23 }
 0xa25   :  { %5087 = vmatpush3.bf16.msra.mxu1 %v5175_v23 }
 0xa26   :  { %5088 = vmatprep.subr.bf16.mxu1 %v5176_v28 }
 0xa29   :  { %5089 = vmatpush3.bf16.msra.mxu1 %v5176_v28 }
 0xa71   :  { %v3107_v14 = vpop.f32.mrf.mxu1 }
 0xa73   :  { %v5052_v11 = vpop.f32.mrf.mxu1 }
 0xa74   :  { %v5182_v11 = vld [vmem:[#allocation14 + $0xec] ss:$16 sps:$4 sm:$0xff]  }
 0xa75   :  { %v3265_v17 = vpop.f32.mrf.mxu1  ;;  %3880 = vmatprep.subr.bf16.mxu1 %v5182_v11 }
 0xa77   :  { %v5066_v20 = vpop.f32.mrf.mxu1 }
 0xacd   :  { %v3186_v36 = vpop.f32.mrf.mxu0 }
 0xace   :  { %v5135_v22 = vpack.i.bf16 %v3186_v36, %v3107_v14  ;;  %v5180_v14 = vld [vmem:[#allocation14 + $0xe8] ss:$16 sps:$4 sm:$0xff]  }
 0xacf   :  { %v5059_v2 = vpop.f32.mrf.mxu0 }
 0xad0   :  { %5136 = vrot.lane.b32.xlu0 %v5135_v22, %s5570_s30 }
 0xad5   :  { %v3344_v24 = vpop.f32.mrf.mxu0 }
 0xad6   :  { %v5140_v21 = vpack.i.bf16 %v3344_v24, %v3265_v17 }
 0xad7   :  { %v5073_v16 = vpop.f32.mrf.mxu0 }
 0xad8   :  { %5141 = vrot.lane.b32.xlu1 %v5140_v21, %s5570_s30 }
 0xb42   :  { %v5137_v32 = vpop.permute.xlu0 %5136 }
 0xb43   :  { %v5139_v59 = vunpack.i.h.bf16 %v5137_v32  ;;  %v5138_v38 = vunpack.i.l.bf16 %v5137_v32  ;;  %v5183_v32 = vld [vmem:[#allocation14 + $0xc0] ss:$16 sps:$4 sm:$0xff]  }
 0xb44   :  { %3830 = vmatpush1.bf16.msra.mxu0 %v5183_v32 }
 0xb45   :  { %v3414_v10 = vsel %vm3413_vm4, %v3409_v44, %v5138_v38  ;;  %v3415_v61 = vsel %vm3413_vm4, %v3410_v58, %v5139_v59  ;;  %v5194_v59 = vld [vmem:[#allocation14 + $0xac] ss:$16 sps:$4 sm:$0xff]   ;;  %v5189_v38 = vld [vmem:[#allocation14 + $0xa0] ss:$16 sps:$4 sm:$0xff]   ;;  %v5192_v44 = vld [vmem:[#allocation14 + $0xa8] ss:$16 sps:$4 sm:$0xff]   ;;  %3831 = vmatprep.subr.bf16.mxu0 %v5191_v29 }
 0xb46   :  { %v3418_v0 = vpack.c.bf16 %v3415_v61, %v3414_v10  ;;  %v5197_v58 = vld [vmem:[#allocation14 + $0x84] ss:$16 sps:$4 sm:$0xff]   ;;  %v5195_v10 = vld [vmem:[#allocation14 + $0x80] ss:$16 sps:$4 sm:$0xff]   ;;  %v5198_v61 = vld [vmem:[#allocation14 + $0x88] ss:$16 sps:$4 sm:$0xff]  }
 0xb47   :  { %v5234_v29 = vld [vmem:[#allocation16 + $0xe8] sm:$0xff]  }
 0xb48   :  { %5090 = vmatprep.mubr.bf16.mxu1 %v3418_v0  ;;  %3832 = vmatpush1.bf16.msra.mxu0 %v5189_v38  ;;  %v5201_v0 = vld [vmem:[#allocation14 + $0x60] ss:$16 sps:$4 sm:$0xff]  }
 0xb49   :  { %3833 = vmatprep.subr.bf16.mxu0 %v5197_v58  ;;  %v5236_v58 = vld [vmem:[#allocation16 + $0xa8] sm:$0xff]  }
 0xb4a   :  { %v5142_v49 = vpop.permute.xlu1 %5141 }
 0xb4b   :  { %v5144_v45 = vunpack.i.h.bf16 %v5142_v49  ;;  %v5143_v27 = vunpack.i.l.bf16 %v5142_v49  ;;  %v5212_v49 = vld [vmem:[#allocation14 + $0x4c] ss:$16 sps:$4 sm:$0xff]  }
 0xb4c   :  { %3834 = vmatpush1.bf16.msra.mxu0 %v5195_v10  ;;  %v5238_v10 = vld [vmem:[#allocation16 + $0xe0] sm:$0xff]  }
 0xb4d   :  { %v3417_v50 = vsel %vm3413_vm4, %v3412_v1, %v5144_v45  ;;  %v3416_v19 = vsel %vm3413_vm4, %v3411_v47, %v5143_v27  ;;  %3835 = vmatprep.subr.bf16.mxu0 %v5203_v18  ;;  %v5215_v45 = vld [vmem:[#allocation14 + $0x24] ss:$16 sps:$4 sm:$0xff]   ;;  %v5218_v27 = vld [vmem:[#allocation14 + $0x2c] ss:$16 sps:$4 sm:$0xff]   ;;  %v5572_v47 = vmov 0  }
 0xb4e   :  { %v3419_v5 = vpack.c.bf16 %v3417_v50, %v3416_v19  ;;  %3859 = vmatprep.mubr.bf16.mxu0 %v5572_v47  ;;  %v5213_v1 = vld [vmem:[#allocation14 + $0x20] ss:$16 sps:$4 sm:$0xff]   ;;  %v5216_v50 = vld [vmem:[#allocation14 + $0x28] ss:$16 sps:$4 sm:$0xff]   ;;  %v5221_v19 = vld [vmem:[#allocation14 + $0x4] ss:$16 sps:$4 sm:$0xff]  }
 0xb4f   :  { %v5241_v18 = vld [vmem:[#allocation16 + $0x58] sm:$0xff]  }
 0xb50   :  { %5091 = vmatmul.mubr.bf16.vlgmr.msra.gmra.mxu1 %v3419_v5  ;;  %3836 = vmatpush1.bf16.msra.mxu0 %v5201_v0  ;;  %v5224_v5 = vld [vmem:[#allocation14 + $0xc] ss:$16 sps:$4 sm:$0xff]   ;;  %v5240_v0 = vld [vmem:[#allocation16 + $0xa0] sm:$0xff]  }
 0xb51   :  { %3881 = vmatpush1.bf16.msra.mxu1 %v5180_v14  ;;  %3837 = vmatprep.subr.bf16.mxu0 %v5209_v42  ;;  %v5244_v42 = vld [vmem:[#allocation16 + $0x98] sm:$0xff]  }
 0xb52   :  { %3882 = vmatprep.subr.bf16.mxu1 %v5188_v34  ;;  %3912 = vmatprep.mubr.bf16.mxu1 %v5572_v47 }
 0xb54   :  { %3838 = vmatpush1.bf16.msra.mxu0 %v5207_v46  ;;  %v5246_v46 = vld [vmem:[#allocation16 + $0xd0] sm:$0xff]  }
 0xb55   :  { %3883 = vmatpush1.bf16.msra.mxu1 %v5186_v37  ;;  %3839 = vmatprep.subr.bf16.mxu0 %v5215_v45  ;;  %v5232_v37 = vld [vmem:[#allocation16 + $0xb0] sm:$0xff]  }
 0xb56   :  { %3884 = vmatprep.subr.bf16.mxu1 %v5194_v59  ;;  %v5248_v45 = vld [vmem:[#allocation16 + $0x90] sm:$0xff]  }
 0xb58   :  { %3840 = vmatpush1.bf16.msra.mxu0 %v5213_v1  ;;  %v5251_v1 = vld [vmem:[#allocation16 + $0x8] sm:$0xff]  }
 0xb59   :  { %3885 = vmatpush1.bf16.msra.mxu1 %v5192_v44  ;;  %3841 = vmatprep.subr.bf16.mxu0 %v5221_v19  ;;  %v5235_v44 = vld [vmem:[#allocation16 + $0x28] sm:$0xff]   ;;  %v5253_v19 = vld [vmem:[#allocation16 + $0x40] sm:$0xff]  }
 0xb5a   :  { %3886 = vmatprep.subr.bf16.mxu1 %v5200_v62  ;;  %v5237_v62 = vld [vmem:[#allocation16 + $0x60] sm:$0xff]  }
 0xb5d   :  { %3887 = vmatpush1.bf16.msra.mxu1 %v5198_v61  ;;  %v5239_v61 = vld [vmem:[#allocation16 + $0x20] sm:$0xff]  }
 0xb5e   :  { %3888 = vmatprep.subr.bf16.mxu1 %v5206_v43  ;;  %v5243_v43 = vld [vmem:[#allocation16 + $0x18] sm:$0xff]  }
 0xb61   :  { %3889 = vmatpush1.bf16.msra.mxu1 %v5204_v35  ;;  %v5242_v35 = vld [vmem:[#allocation16 + $0xd8] sm:$0xff]  }
 0xb62   :  { %3890 = vmatprep.subr.bf16.mxu1 %v5212_v49  ;;  %v5245_v49 = vld [vmem:[#allocation16 + $0x50] sm:$0xff]  }
 0xb65   :  { %3891 = vmatpush1.bf16.msra.mxu1 %v5210_v39  ;;  %v5247_v39 = vld [vmem:[#allocation16 + $0x10] sm:$0xff]  }
 0xb66   :  { %3892 = vmatprep.subr.bf16.mxu1 %v5218_v27  ;;  %v5249_v27 = vld [vmem:[#allocation16 + $0x48] sm:$0xff]  }
 0xb69   :  { %3893 = vmatpush1.bf16.msra.mxu1 %v5216_v50  ;;  %v5252_v50 = vld [vmem:[#allocation16 + $0x88] sm:$0xff]  }
 0xb6a   :  { %3894 = vmatprep.subr.bf16.mxu1 %v5224_v5  ;;  %v5254_v5 = vld [vmem:[#allocation16 + $0xc0] sm:$0xff]  }
 0xc10   :  { %v5092_v51 = vpop.f32.mrf.mxu1 }
 0xc11   :  { %v3534_v13 = vadd.f32 %v5092_v51, %v4508_v60  ;;  %v5219_v51 = vld [vmem:[#allocation14] ss:$16 sps:$4 sm:$0xff]  }
 0xc12   :  { %v3525_v7 = vpop.f32.mrf.mxu1  ;;  %3842 = vmatpush1.bf16.msra.mxu0 %v5219_v51  ;;  %v5255_v51 = vld [vmem:[#allocation16] sm:$0xff]  }
 0xc13   :  { %v3526_v9 = vadd.f32 %v4508_v60, %v3525_v7  ;;  %v3542_v57 = vadd.f32 %v5338_v56, %v3534_v13  ;;  %v5225_v7 = vld [vmem:[#allocation16 + $0x78] sm:$0xff]  }
 0xc14   :  { %v5093_v48 = vpop.f32.mrf.mxu1  ;;  %4726 = vmatprep.subr.bf16.mxu0 %v5225_v7  ;;  %v3647_v7 = vlaneseq }
 0xc15   :  { %v3540_v53 = vadd.f32 %v5337_v52, %v3526_v9  ;;  %v3537_v40 = vadd.f32 %v5093_v48, %v4508_v60  ;;  %v5226_v9 = vld [vmem:[#allocation16 + $0xf8] sm:$0xff]  }
 0xc16   :  { %v3528_v15 = vpop.f32.mrf.mxu1 }
 0xc17   :  { %v3529_v55 = vadd.f32 %v4508_v60, %v3528_v15  ;;  %3546 = vadd.xlane.f32.xlu0 %v3540_v53  ;;  %v3543_v4 = vadd.f32 %v5340_v54, %v3537_v40  ;;  %v5222_v60 = vld [vmem:[#allocation14 + $0x8] ss:$16 sps:$4 sm:$0xff]  }
 0xc18   :  { %3895 = vmatpush1.bf16.msra.mxu1 %v5222_v60  ;;  %v5256_v60 = vld [vmem:[#allocation16 + $0x80] sm:$0xff]  }
 0xc19   :  { %v3541_v3 = vadd.f32 %v5339_v63, %v3529_v55  ;;  %4754 = vmatprep.subr.bf16.mxu1 %v5226_v9  ;;  %v3648_v9 = vshrl.u32 %v3647_v7, 7 }
 0xc1b   :  { %3548 = vadd.xlane.f32.xlu1 %v3541_v3  ;;  %3550 = vadd.xlane.f32.xlu0 %v3542_v57 }
 0xc1f   :  { %3552 = vadd.xlane.f32.xlu0 %v3543_v4 }
 0xca0   :  { %v3547_v17 = vpop.xlane.xlu0 %3546 }
 0xca1   :  { %v3555_v20 = vmul.f32 0.0078125, %v3547_v17 }
 0xca3   :  { %v6280_v12 = vsub.f32 %v3540_v53, %v3555_v20 }
 0xca4   :  { %v3549_v23 = vpop.xlane.xlu1 %3548  ;;  %v3551_v28 = vpop.xlane.xlu0 %3550 }
 0xca5   :  { %v3556_v36 = vmul.f32 0.0078125, %v3549_v23  ;;  %v3557_v22 = vmul.f32 0.0078125, %v3551_v28  ;;  %v3563_v2 = vmul.f32 %v6280_v12, %v6280_v12  ;;  %v4518_v23 = vld [vmem:[%s6352_s12] ss:$0 sm:$0xff] }
 0xca7   :  { %v6284_v24 = vsub.f32 %v3541_v3, %v3556_v36  ;;  %v6286_v21 = vsub.f32 %v3542_v57, %v3557_v22  ;;  %3567 = vadd.xlane.f32.xlu0 %v3563_v2 }
 0xca8   :  { %v3553_v16 = vpop.xlane.xlu0 %3552 }
 0xca9   :  { %v3558_v31 = vmul.f32 0.0078125, %v3553_v16  ;;  %v3564_v25 = vmul.f32 %v6284_v24, %v6284_v24  ;;  %v3565_v30 = vmul.f32 %v6286_v21, %v6286_v21 }
 0xcab   :  { %v6292_v6 = vsub.f32 %v3543_v4, %v3558_v31  ;;  %3569 = vadd.xlane.f32.xlu1 %v3564_v25  ;;  %3571 = vadd.xlane.f32.xlu0 %v3565_v30  ;;  %v5227_v25 = vld [vmem:[#allocation16 + $0x38] sm:$0xff]  }
 0xcac   :  { %v5228_v30 = vld [vmem:[#allocation16 + $0xb8] sm:$0xff]  }
 0xcad   :  { %v3566_v26 = vmul.f32 %v6292_v6, %v6292_v6 }
 0xcaf   :  { %3573 = vadd.xlane.f32.xlu1 %v3566_v26  ;;  %v5229_v26 = vld [vmem:[#allocation16 + $0x70] sm:$0xff]  }
 0xd30   :  { %v3568_v48 = vpop.xlane.xlu0 %3567 }
 0xd31   :  { %v3575_v13 = vmul.f32 0.0078125, %v3568_v48  ;;  %v3653_v48 = vsub.s32 1, %v3648_v9 }
 0xd33   :  { %v3579_v52 = vadd.f32 1e-05, %v3575_v13  ;;  %v3661_v13 = vsub.s32 3, %v3648_v9 }
 0xd34   :  { %v3570_v53 = vpop.xlane.xlu1 %3569  ;;  %v3572_v15 = vpop.xlane.xlu0 %3571 }
 0xd35   :  { %5321 = vrsqrt.f32 %v3579_v52  ;;  %v3576_v55 = vmul.f32 0.0078125, %v3570_v53  ;;  %v3577_v56 = vmul.f32 0.0078125, %v3572_v15  ;;  %v3649_v52 = vsub.s32 0, %v3648_v9  ;;  %v3645_v15 = vld [vmem:[%s6354_s14] sm:$0xf] }
 0xd36   :  { %v3657_v53 = vsub.s32 2, %v3648_v9 }
 0xd37   :  { %v3580_v57 = vadd.f32 1e-05, %v3576_v55  ;;  %v3581_v40 = vadd.f32 1e-05, %v3577_v56 }
 0xd38   :  { %v3574_v63 = vpop.xlane.xlu1 %3573 }
 0xd39   :  { %5323 = vrsqrt.f32 %v3580_v57  ;;  %v3578_v3 = vmul.f32 0.0078125, %v3574_v63  ;;  %v3654_v57 = vrot.slane %v3645_v15, %v3653_v48  ;;  %v3650_v63 = vrot.slane %v3645_v15, %v3649_v52 }
 0xd3a   :  { %5325 = vrsqrt.f32 %v3581_v40  ;;  %v3662_v40 = vrot.slane %v3645_v15, %v3661_v13 }
 0xd3b   :  { %v3582_v54 = vadd.f32 1e-05, %v3578_v3  ;;  %v3658_v3 = vrot.slane %v3645_v15, %v3657_v53 }
 0xd3d   :  { %5327 = vrsqrt.f32 %v3582_v54 }
 0xd42   :  { %v5322_v4 = vpop.eup %5321 }
 0xd43   :  { %v3587_v8 = vmul.f32 %v5322_v4, %v6280_v12 }
 0xd45   :  { %v3597_v17 = vmul.f32 %v4517_v41, %v3587_v8 }
 0xd46   :  { %v5324_v14 = vpop.eup %5323 }
 0xd47   :  { %v3588_v11 = vmul.f32 %v5324_v14, %v6284_v24  ;;  %v5326_v20 = vpop.eup %5325  ;;  %v6304_v22 = vadd.f32 %v4518_v23, %v3597_v17 }
 0xd48   :  { %v3589_v12 = vmul.f32 %v5326_v20, %v6286_v21  ;;  %v5231_v21 = vld [vmem:[#allocation16 + $0x30] sm:$0xff]  }
 0xd49   :  { %v3598_v28 = vmul.f32 %v4517_v41, %v3588_v11 }
 0xd4a   :  { %v5328_v36 = vpop.eup %5327  ;;  %v3599_v34 = vmul.f32 %v4517_v41, %v3589_v12 }
 0xd4b   :  { %v6306_v2 = vadd.f32 %v4518_v23, %v3598_v28  ;;  %v3590_v16 = vmul.f32 %v5328_v36, %v6292_v6  ;;  %v5233_v6 = vld [vmem:[#allocation16 + $0x68] sm:$0xff]  }
 0xd4c   :  { %v6314_v59 = vadd.f32 %v4518_v23, %v3599_v34 }
 0xd4d   :  { %v3611_v31 = vpack.c.bf16 %v6306_v2, %v6304_v22  ;;  %v3600_v24 = vmul.f32 %v4517_v41, %v3590_v16 }
 0xd4f   :  { %3860 = vmatmul.mubr.bf16.vlgmr.msra.gmra.mxu0 %v3611_v31  ;;  %3913 = vmatmul.mubr.bf16.vlgmr.msra.gmra.mxu1 %v3611_v31  ;;  %v6312_v32 = vadd.f32 %v4518_v23, %v3600_v24 }
 0xd50   :  { %3869 = vmatprep.mubr.bf16.mxu0 %v5572_v47  ;;  %3922 = vmatprep.mubr.bf16.mxu1 %v5572_v47  ;;  %v5250_v47 = vld [vmem:[#allocation16 + $0xc8] sm:$0xff]  }
 0xd51   :  { %4727 = vmatpush3.bf16.msra.mxu0 %v5227_v25  ;;  %4755 = vmatpush3.bf16.msra.mxu1 %v5228_v30  ;;  %v3612_v38 = vpack.c.bf16 %v6312_v32, %v6314_v59 }
 0xd52   :  { %4728 = vmatprep.subr.bf16.mxu0 %v5229_v26  ;;  %4756 = vmatprep.subr.bf16.mxu1 %v5230_v33 }
 0xd55   :  { %4729 = vmatpush3.bf16.msra.mxu0 %v5231_v21  ;;  %4757 = vmatpush3.bf16.msra.mxu1 %v5232_v37 }
 0xd56   :  { %4730 = vmatprep.subr.bf16.mxu0 %v5233_v6  ;;  %4758 = vmatprep.subr.bf16.mxu1 %v5234_v29 }
 0xd57   :  { %3870 = vmatmul.mubr.bf16.gmra.mxu0 %v3612_v38  ;;  %3923 = vmatmul.mubr.bf16.gmra.mxu1 %v3612_v38 }
 0xd59   :  { %4731 = vmatpush3.bf16.msra.mxu0 %v5235_v44  ;;  %4759 = vmatpush3.bf16.msra.mxu1 %v5236_v58 }
 0xd5a   :  { %4732 = vmatprep.subr.bf16.mxu0 %v5237_v62  ;;  %4760 = vmatprep.subr.bf16.mxu1 %v5238_v10 }
 0xd5d   :  { %4733 = vmatpush3.bf16.msra.mxu0 %v5239_v61  ;;  %4761 = vmatpush3.bf16.msra.mxu1 %v5240_v0 }
 0xd5e   :  { %4734 = vmatprep.subr.bf16.mxu0 %v5241_v18  ;;  %4762 = vmatprep.subr.bf16.mxu1 %v5242_v35 }
 0xd61   :  { %4735 = vmatpush3.bf16.msra.mxu0 %v5243_v43  ;;  %4763 = vmatpush3.bf16.msra.mxu1 %v5244_v42 }
 0xd62   :  { %4736 = vmatprep.subr.bf16.mxu0 %v5245_v49  ;;  %4764 = vmatprep.subr.bf16.mxu1 %v5246_v46 }
 0xd65   :  { %4737 = vmatpush3.bf16.msra.mxu0 %v5247_v39  ;;  %4765 = vmatpush3.bf16.msra.mxu1 %v5248_v45 }
 0xd66   :  { %4738 = vmatprep.subr.bf16.mxu0 %v5249_v27  ;;  %4766 = vmatprep.subr.bf16.mxu1 %v5250_v47 }
 0xd69   :  { %4739 = vmatpush3.bf16.msra.mxu0 %v5251_v1  ;;  %4767 = vmatpush3.bf16.msra.mxu1 %v5252_v50 }
 0xd6a   :  { %4740 = vmatprep.subr.bf16.mxu0 %v5253_v19  ;;  %4768 = vmatprep.subr.bf16.mxu1 %v5254_v5 }
 0xd6d   :  { %4741 = vmatpush3.bf16.msra.mxu0 %v5255_v51  ;;  %4769 = vmatpush3.bf16.msra.mxu1 %v5256_v60 }
 0xe0f   :  { %v3861_v55 = vpop.f32.mrf.mxu0  ;;  %v3914_v56 = vpop.f32.mrf.mxu1 }
 0xe10   :  { %v3862_v23 = vadd.f32 %v3861_v55, %v3650_v63  ;;  %v3915_v28 = vadd.f32 %v3914_v56, %v3658_v3 }
 0xe11   :  { %v3863_v54 = vpop.f32.mrf.mxu0  ;;  %v3916_v4 = vpop.f32.mrf.mxu1 }
 0xe12   :  { %v3864_v14 = vadd.f32 %v3863_v54, %v3654_v57  ;;  %v3917_v11 = vadd.f32 %v3916_v4, %v3662_v40  ;;  %v3933_v6 = vmax.f32 %v3862_v23, 0.0  ;;  %v3935_v29 = vmax.f32 %v3915_v28, 0.0 }
 0xe13   :  { %v3865_v8 = vpop.f32.mrf.mxu0  ;;  %v3918_v41 = vpop.f32.mrf.mxu1 }
 0xe14   :  { %v3866_v17 = vadd.f32 %v3865_v8, %v3650_v63  ;;  %v3919_v20 = vadd.f32 %v3918_v41, %v3658_v3  ;;  %v3934_v33 = vmax.f32 %v3864_v14, 0.0  ;;  %v3936_v34 = vmax.f32 %v3917_v11, 0.0 }
 0xe15   :  { %v3867_v36 = vpop.f32.mrf.mxu0  ;;  %v3920_v12 = vpop.f32.mrf.mxu1 }
 0xe16   :  { %v3868_v16 = vadd.f32 %v3867_v36, %v3654_v57  ;;  %v3921_v31 = vadd.f32 %v3920_v12, %v3662_v40  ;;  %v3937_v24 = vmax.f32 %v3866_v17, 0.0  ;;  %v3939_v25 = vmax.f32 %v3919_v20, 0.0 }
 0xe17   :  { %v3871_v30 = vpop.f32.mrf.mxu0  ;;  %v3924_v26 = vpop.f32.mrf.mxu1 }
 0xe18   :  { %v3938_v21 = vmax.f32 %v3868_v16, 0.0  ;;  %v3940_v37 = vmax.f32 %v3921_v31, 0.0  ;;  %v3949_v10 = vpack.c.bf16 %v3937_v24, %v3933_v6  ;;  %v3951_v61 = vpack.c.bf16 %v3939_v25, %v3935_v29 }
 0xe19   :  { %v3873_v38 = vpop.f32.mrf.mxu0  ;;  %v3926_v44 = vpop.f32.mrf.mxu1  ;;  %v3872_v46 = vadd.f32 %v3871_v30, %v3650_v63  ;;  %v3925_v39 = vadd.f32 %v3924_v26, %v3658_v3 }
 0xe1a   :  { %v3950_v58 = vpack.c.bf16 %v3938_v21, %v3934_v33  ;;  %v3952_v62 = vpack.c.bf16 %v3940_v37, %v3936_v34  ;;  %v3874_v0 = vadd.f32 %v3873_v38, %v3654_v57  ;;  %v3927_v43 = vadd.f32 %v3926_v44, %v3662_v40 }
 0xe1b   :  { %v3875_v18 = vpop.f32.mrf.mxu0  ;;  %v3928_v35 = vpop.f32.mrf.mxu1  ;;  %v3941_v9 = vmax.f32 %v3872_v46, 0.0  ;;  %v3943_v48 = vmax.f32 %v3925_v39, 0.0 }
 0xe1c   :  { %v3876_v42 = vadd.f32 %v3875_v18, %v3650_v63  ;;  %v3929_v49 = vadd.f32 %v3928_v35, %v3658_v3  ;;  %4252 = vmatprep.mubr.bf16.mxu0 %v3950_v58  ;;  %4301 = vmatprep.mubr.bf16.mxu1 %v3952_v62  ;;  %v3942_v5 = vmax.f32 %v3874_v0, 0.0  ;;  %v3944_v51 = vmax.f32 %v3927_v43, 0.0 }
 0xe1d   :  { %v3877_v45 = vpop.f32.mrf.mxu0  ;;  %v3930_v27 = vpop.f32.mrf.mxu1  ;;  %4253 = vmatmul.mubr.bf16.vlgmr.msra.gmra.mxu0 %v3949_v10  ;;  %4302 = vmatmul.mubr.bf16.vlgmr.msra.gmra.mxu1 %v3951_v61 }
 0xe1e   :  { %v3878_v47 = vadd.f32 %v3877_v45, %v3654_v57  ;;  %v3931_v1 = vadd.f32 %v3930_v27, %v3662_v40  ;;  %v3945_v50 = vmax.f32 %v3876_v42, 0.0  ;;  %v3947_v19 = vmax.f32 %v3929_v49, 0.0  ;;  %v4551_v57 = vld [vmem:[%s6356_s16] ss:$0 sm:$0xff] }
 0xe20   :  { %v3946_v60 = vmax.f32 %v3878_v47, 0.0  ;;  %v3948_v7 = vmax.f32 %v3931_v1, 0.0  ;;  %v3953_v53 = vpack.c.bf16 %v3945_v50, %v3941_v9  ;;  %v3955_v15 = vpack.c.bf16 %v3947_v19, %v3943_v48 }
 0xe22   :  { %v3954_v13 = vpack.c.bf16 %v3946_v60, %v3942_v5  ;;  %v3956_v52 = vpack.c.bf16 %v3948_v7, %v3944_v51 }
 0xe24   :  { %4260 = vmatprep.mubr.bf16.mxu0 %v3954_v13  ;;  %4309 = vmatprep.mubr.bf16.mxu1 %v3956_v52 }
 0xe25   :  { %4261 = vmatmul.mubr.bf16.gmra.mxu0 %v3953_v53  ;;  %4310 = vmatmul.mubr.bf16.gmra.mxu1 %v3955_v15 }
 0xedd   :  { %v4742_v55 = vpop.f32.mrf.mxu0  ;;  %v4770_v56 = vpop.f32.mrf.mxu1 }
 0xedf   :  { %v4743_v40 = vpop.f32.mrf.mxu0  ;;  %v4771_v63 = vpop.f32.mrf.mxu1 }
 0xee0   :  { %v4744_v3 = vadd.f32 %v4743_v40, %v4742_v55  ;;  %v4772_v41 = vadd.f32 %v4771_v63, %v4770_v56  ;;  %v4585_v63 = vld [vmem:[%s6358_s18] ss:$0 sm:$0xff] }
 0xee1   :  { %v4745_v54 = vpop.f32.mrf.mxu0  ;;  %v4773_v4 = vpop.f32.mrf.mxu1 }
 0xee2   :  { %v4255_v8 = vadd.f32 %v4744_v3, %v4551_v57 }
 0xee3   :  { %v4746_v14 = vpop.f32.mrf.mxu0  ;;  %v4774_v11 = vpop.f32.mrf.mxu1 }
 0xee4   :  { %v4304_v17 = vadd.f32 %v4772_v41, %v4255_v8  ;;  %v4747_v20 = vadd.f32 %v4746_v14, %v4745_v54  ;;  %v4775_v12 = vadd.f32 %v4774_v11, %v4773_v4 }
 0xee5   :  { %v4748_v23 = vpop.f32.mrf.mxu0  ;;  %v4776_v28 = vpop.f32.mrf.mxu1 }
 0xee6   :  { %v4258_v36 = vadd.f32 %v4747_v20, %v4551_v57  ;;  %v4318_v16 = vadd.f32 %v4304_v17, %v6304_v22 }
 0xee7   :  { %v4749_v31 = vpop.f32.mrf.mxu0  ;;  %v4777_v24 = vpop.f32.mrf.mxu1 }
 0xee8   :  { %v4307_v25 = vadd.f32 %v4775_v12, %v4258_v36  ;;  %v4750_v30 = vadd.f32 %v4749_v31, %v4748_v23  ;;  %4324 = vadd.xlane.f32.xlu0 %v4318_v16  ;;  %v4778_v21 = vadd.f32 %v4777_v24, %v4776_v28 }
 0xee9   :  { %v4751_v26 = vpop.f32.mrf.mxu0  ;;  %v4779_v33 = vpop.f32.mrf.mxu1 }
 0xeea   :  { %v4263_v34 = vadd.f32 %v4750_v30, %v4551_v57  ;;  %v4319_v37 = vadd.f32 %v4307_v25, %v6306_v2 }
 0xeeb   :  { %v4752_v6 = vpop.f32.mrf.mxu0  ;;  %v4780_v29 = vpop.f32.mrf.mxu1 }
 0xeec   :  { %v4312_v38 = vadd.f32 %v4778_v21, %v4263_v34  ;;  %v4753_v44 = vadd.f32 %v4752_v6, %v4751_v26  ;;  %4326 = vadd.xlane.f32.xlu1 %v4319_v37  ;;  %v4781_v62 = vadd.f32 %v4780_v29, %v4779_v33 }
 0xeee   :  { %v4266_v58 = vadd.f32 %v4753_v44, %v4551_v57  ;;  %v4320_v22 = vadd.f32 %v4312_v38, %v6314_v59  ;;  %v4584_v57 = vld [vmem:[%s6357_s17] ss:$0 sm:$0xff]  ;;  %s5573_s17 = smov [#allocation17]  }
 0xeef   :  { %s4397_s7 = sshll.u32 %s5573_s17, 4  ;;  %s4398_s7 = int_to_ptr.vmem [resolvable:$true] %s4397_s7 }
 0xef0   :  { %v4315_v10 = vadd.f32 %v4781_v62, %v4266_v58  ;;  %4328 = vadd.xlane.f32.xlu0 %v4320_v22  ;;  %s5521_s18 = scalar_lea.vmem %s4398_s7, 512  ;;  %p5526_p4 = scmp.lt.s32.totalorder %s4398_s7, %s4398_s7 }
 0xef1   :  { %p5522_p3 = scmp.ne.s32.totalorder %s4398_s7, %s5521_s18  ;;  %p5527_p5 = scmp.lt.s32.totalorder %s5521_s18, %s5521_s18 }
 0xef2   :  { %v4321_v61 = vadd.f32 %v4315_v10, %v6312_v32 }
 0xef3   :  { %p5528_p6 = por %p5527_p5, %p5526_p4 }
 0xef4   :  { %4330 = vadd.xlane.f32.xlu1 %v4321_v61 }
 0xef5   :  { %p5529_p7 = pnand %p5528_p6, %p5522_p3 }
 0xf71   :  { %v4325_v0 = vpop.xlane.xlu0 %4324 }
 0xf72   :  { %v4332_v18 = vmul.f32 0.0078125, %v4325_v0 }
 0xf74   :  { %v4336_v35 = vsub.f32 %v4318_v16, %v4332_v18 }
 0xf75   :  { %v4327_v43 = vpop.xlane.xlu1 %4326 }
 0xf76   :  { %v4333_v42 = vmul.f32 0.0078125, %v4327_v43  ;;  %v4340_v2 = vmul.f32 %v4336_v35, %v4336_v35 }
 0xf78   :  { %v4337_v49 = vsub.f32 %v4319_v37, %v4333_v42  ;;  %4344 = vadd.xlane.f32.xlu0 %v4340_v2 }
 0xf79   :  { %v4329_v46 = vpop.xlane.xlu0 %4328 }
 0xf7a   :  { %v4334_v39 = vmul.f32 0.0078125, %v4329_v46  ;;  %v4341_v45 = vmul.f32 %v4337_v49, %v4337_v49 }
 0xf7c   :  { %v4338_v27 = vsub.f32 %v4320_v22, %v4334_v39  ;;  %4346 = vadd.xlane.f32.xlu1 %v4341_v45 }
 0xf7d   :  { %v4331_v47 = vpop.xlane.xlu1 %4330 }
 0xf7e   :  { %v4335_v59 = vmul.f32 0.0078125, %v4331_v47  ;;  %v4342_v1 = vmul.f32 %v4338_v27, %v4338_v27 }
 0xf80   :  { %v4339_v50 = vsub.f32 %v4321_v61, %v4335_v59  ;;  %4348 = vadd.xlane.f32.xlu0 %v4342_v1 }
 0xf82   :  { %v4343_v32 = vmul.f32 %v4339_v50, %v4339_v50 }
 0xf84   :  { %4350 = vadd.xlane.f32.xlu1 %v4343_v32 }
0x1001   :  { %v4345_v19 = vpop.xlane.xlu0 %4344 }
0x1002   :  { %v4352_v5 = vmul.f32 0.0078125, %v4345_v19 }
0x1004   :  { %v4356_v51 = vadd.f32 1e-05, %v4352_v5 }
0x1005   :  { %v4347_v60 = vpop.xlane.xlu1 %4346 }
0x1006   :  { %5329 = vrsqrt.f32 %v4356_v51  ;;  %v4353_v7 = vmul.f32 0.0078125, %v4347_v60 }
0x1008   :  { %v4357_v9 = vadd.f32 1e-05, %v4353_v7 }
0x1009   :  { %v4349_v48 = vpop.xlane.xlu0 %4348 }
0x100a   :  { %5331 = vrsqrt.f32 %v4357_v9  ;;  %v4354_v13 = vmul.f32 0.0078125, %v4349_v48 }
0x100c   :  { %v4358_v52 = vadd.f32 1e-05, %v4354_v13 }
0x100d   :  { %v4351_v53 = vpop.xlane.xlu1 %4350 }
0x100e   :  { %5333 = vrsqrt.f32 %v4358_v52  ;;  %v4355_v15 = vmul.f32 0.0078125, %v4351_v53 }
0x1010   :  { %v4359_v55 = vadd.f32 1e-05, %v4355_v15 }
0x1012   :  { %5335 = vrsqrt.f32 %v4359_v55 }
0x1013   :  { %v5330_v56 = vpop.eup %5329 }
0x1014   :  { %v4364_v40 = vmul.f32 %v5330_v56, %v4336_v35 }
0x1016   :  { %v4374_v3 = vmul.f32 %v4584_v57, %v4364_v40 }
0x1017   :  { %v5332_v54 = vpop.eup %5331 }
0x1018   :  { %v4365_v4 = vmul.f32 %v5332_v54, %v4337_v49  ;;  %v4384_v8 = vadd.f32 %v4585_v63, %v4374_v3 }
0x101a   :  { %v4375_v41 = vmul.f32 %v4584_v57, %v4365_v4  ;;  %4388 = vst [vmem:[#allocation17] sm:$0xff] %v4384_v8 }
0x101b   :  { %v5334_v14 = vpop.eup %5333 }
0x101c   :  { %v4366_v11 = vmul.f32 %v5334_v14, %v4338_v27  ;;  %v4385_v17 = vadd.f32 %v4585_v63, %v4375_v41 }
0x101e   :  { %v4376_v20 = vmul.f32 %v4584_v57, %v4366_v11  ;;  %4389 = vst [vmem:[#allocation17 + $0x8] sm:$0xff] %v4385_v17 }
0x101f   :  { %v5336_v23 = vpop.eup %5335 }
0x1020   :  { %v4367_v28 = vmul.f32 %v5336_v23, %v4339_v50  ;;  %v4386_v36 = vadd.f32 %v4585_v63, %v4376_v20 }
0x1022   :  { %v4377_v12 = vmul.f32 %v4584_v57, %v4367_v28  ;;  %4390 = vst [vmem:[#allocation17 + $0x10] sm:$0xff] %v4386_v36 }
0x1024   :  { %v4387_v16 = vadd.f32 %v4585_v63, %v4377_v12 }
0x1026   :  { %4391 = vst [vmem:[#allocation17 + $0x18] sm:$0xff] %v4387_v16 }
0x1027   :  { %5532 = shalt.err (!%p5529_p7)
}
0x1028   :  { %4403 = dma.vmem_to_hbm [thread:$0]  %s4398_s7, 512, %s6359_s19, [#allocation4], %s6373_s28, %s6373_s28, %s6372_s2  }
0x1029   :  { %5551 = dma.done.wait [#allocation4], 512  }
0x102a   :  { %5552 = vsyncadd [#allocation4], 4294966784 }
0x102b   :  { %4411 = vsyncpa [#allocation3], 1 }
0x102c   :  { %4412 = vsyncpa [#allocation6], 1 }
0x102d   :  { %4413 = vsyncpa [#allocation9], 1 }
0x102e   :  { %4414 = vsyncpa [#allocation12], 1 }
0x102f   :  { %4415 = vsyncpa [#allocation15], 1 }
0x1030   :  { %4416 = vsyncpa [#allocation4], 1 }

</bundles_post_ra>
